<compile_context>
chip_gen: v7x
topology: tpu7x:2x2x1
jax: 0.10.0
libtpu: 0.0.40
codegen_flags: <defaults>
</compile_context>

<pallas_src>
import jax
import jax.numpy as jnp
from jax import lax
from jax.experimental import pallas as pl
from jax.experimental.pallas import tpu as pltpu


def _upsample_nearest_kernel(x_ref, src_ref, o_ref):
    """out = x @ G  with  G[k, j] = 1 iff src[j] == k  (0/1 gather matrix).

    x_ref:   (R, H*W)    flattened spatial rows, one per (n, c) image
    src_ref: (1, CT)     int32 source flat-spatial index per output lane
    o_ref:   (R, CT)     lane-dense tile of the flattened output
    """
    hw = x_ref.shape[1]
    ct = o_ref.shape[1]
    # Source-row id varies along the sublane axis; compare against the
    # per-output-lane source index to build the one-hot gather matrix on the
    # VPU (never touches HBM).
    row_ids = lax.broadcasted_iota(jnp.int32, (hw, ct), 0)
    one = jnp.ones((), dtype=x_ref.dtype)
    zero = jnp.zeros((), dtype=x_ref.dtype)
    gather = jnp.where(src_ref[...] == row_ids, one, zero)          # (HW, CT)
    # Single MXU push (K = H*W, N = CT).  HIGHEST precision keeps the f32
    # pass-through exact (G is 0/1 with exactly one hot entry per column).
    o_ref[...] = jnp.dot(
        x_ref[...], gather,
        preferred_element_type=jnp.float32,
        precision=lax.Precision.HIGHEST,
    ).astype(o_ref.dtype)


def _choose_tiles(nc, hwo):
    # Row tile over fused (N*C): a multiple of 8 (sublanes) or the full extent
    # so every block satisfies the (8, 128) layout rule.
    rt = 8 if (nc % 8 == 0 and nc > 8) else nc
    # Column tile over the flattened output spatial axis: a multiple of 128
    # (lane-dense, unmasked stores) leaving >= 2 grid steps so both v7x
    # TensorCores get work and double-buffering can overlap DMA with compute.
    ct = hwo
    if hwo % 128 == 0:
        for cand in (1024, 512, 256, 128):
            if hwo % cand == 0 and hwo // cand >= 2:
                ct = cand
                break
    return rt, ct


def upsample_pallas(x, size=None, scale=2, mode="nearest", align_corners=None):
    """Equivalent of Upsample.forward: F.interpolate(x, (int(H*s), int(W*s)), mode)."""
    del size  # the reference module recomputes size from `scale` in forward()
    if mode != "nearest":
        # TODO(synk): bilinear/bicubic are also linear maps and fit the same
        # x @ G kernel with fractional weights; only 'nearest' is wired up.
        raise NotImplementedError(f"mode={mode!r} not implemented")
    del align_corners  # ignored for 'nearest' (as in PyTorch)

    N, C, H, W = x.shape
    Ho, Wo = int(H * scale), int(W * scale)
    NC, HW, HWo = N * C, H * W, Ho * Wo

    # PyTorch 'nearest': src = floor(dst * in / out), flattened over (h, w).
    io = (jnp.arange(Ho, dtype=jnp.int32) * H) // Ho                  # (Ho,)
    jo = (jnp.arange(Wo, dtype=jnp.int32) * W) // Wo                  # (Wo,)
    src = (io[:, None] * W + jo[None, :]).reshape(1, HWo)             # (1, HWo)

    x2 = x.reshape(NC, HW)                                            # free reshape
    rt, ct = _choose_tiles(NC, HWo)
    grid = (NC // rt, HWo // ct)

    # TODO(synk): for large feature maps also tile the H*W (K) axis — only the
    # input rows feeding the current output-column tile contribute to it.
    out2 = pl.pallas_call(
        _upsample_nearest_kernel,
        out_shape=jax.ShapeDtypeStruct((NC, HWo), x.dtype),
        grid_spec=pltpu.PrefetchScalarGridSpec(
            num_scalar_prefetch=0,
            grid=grid,
            in_specs=[
                pl.BlockSpec((rt, HW), lambda r, c: (r, 0)),
                pl.BlockSpec((1, ct), lambda r, c: (0, c)),
            ],
            out_specs=pl.BlockSpec((rt, ct), lambda r, c: (r, c)),
        ),
        compiler_params=pltpu.CompilerParams(
            dimension_semantics=("parallel", "parallel"),
            vmem_limit_bytes=32 * 1024 * 1024,
        ),
    )(x2, src)

    return out2.reshape(N, C, Ho, Wo)                                 # free reshape


def _reference(x, scale):
    """Pure-JAX reference for F.interpolate(mode='nearest')."""
    N, C, H, W = x.shape
    Ho, Wo = int(H * scale), int(W * scale)
    io = (jnp.arange(Ho) * H) // Ho
    jo = (jnp.arange(Wo) * W) // Wo
    return x[:, :, io[:, None], jo[None, :]]


if __name__ == "__main__":
    # Upsample(None, scale=2, mode='nearest') — the YoloV5 usage.
    N, C, H, W = 2, 4, 16, 16
    scale = 2

    key = jax.random.PRNGKey(0)
    x = jax.random.normal(key, (N, C, H, W), jnp.float32)

    out = upsample_pallas(x, size=None, scale=scale, mode="nearest")
    out = jax.block_until_ready(out)

    ref = _reference(x, scale)
    assert out.shape == (N, C, H * scale, W * scale)
    assert jnp.allclose(out, ref, atol=1e-4, rtol=1e-4), "mismatch vs reference"

    print("KERNEL_OK")
</pallas_src>

<mosaic_0001>
module attributes {stable_mosaic.version = 11 : i64} {
  func.func @_upsample_nearest_kernel(%arg0: i32, %arg1: i32, %arg2: memref<8x256xf32, #tpu.memory_space<vmem>>, %arg3: memref<1x512xi32, #tpu.memory_space<vmem>>, %arg4: memref<8x512xf32, #tpu.memory_space<vmem>>) attributes {dimension_semantics = [#tpu.dimension_semantics<parallel>, #tpu.dimension_semantics<parallel>], iteration_bounds = array<i64: 1, 2>, scalar_prefetch = 0 : i64, scratch_operands = 0 : i64, tpu.core_type = #tpu.core_type<tc>, window_params = [{transform_indices = @transform_0, window_bounds = array<i64: 8, 256>}, {transform_indices = @transform_1, window_bounds = array<i64: 1, 512>}, {transform_indices = @transform_2, window_bounds = array<i64: 8, 512>}]} {
    %0 = tpu.iota {dimensions = array<i32: 0>} : vector<256x512xi32>
    %c0 = arith.constant 0 : index
    %c0_0 = arith.constant 0 : index
    %1 = vector.load %arg3[%c0, %c0_0] : memref<1x512xi32, #tpu.memory_space<vmem>>, vector<1x512xi32>
    %2 = vector.broadcast %1 : vector<1x512xi32> to vector<256x512xi32>
    %3 = arith.cmpi eq, %2, %0 : vector<256x512xi32>
    %cst = arith.constant 1.000000e+00 : f32
    %cst_1 = arith.constant 0.000000e+00 : f32
    %4 = vector.broadcast %cst : f32 to vector<256x512xf32>
    %5 = vector.broadcast %cst_1 : f32 to vector<256x512xf32>
    %6 = arith.select %3, %4, %5 : vector<256x512xi1>, vector<256x512xf32>
    %c0_2 = arith.constant 0 : index
    %c0_3 = arith.constant 0 : index
    %7 = vector.load %arg2[%c0_2, %c0_3] : memref<8x256xf32, #tpu.memory_space<vmem>>, vector<8x256xf32>
    %cst_4 = arith.constant dense<0.000000e+00> : vector<8x512xf32>
    %8 = tpu.matmul %7, %6, %cst_4 {dimension_numbers = #tpu.dot_dimension_numbers<[1], [0], [0], [1], [0, 0, 1, 1], [], []>, precision = #tpu.contract_precision<fp32>} : vector<8x256xf32>, vector<256x512xf32>, vector<8x512xf32> -> vector<8x512xf32>
    %c0_5 = arith.constant 0 : index
    %c0_6 = arith.constant 0 : index
    %9 = vector.load %arg4[%c0_5, %c0_6] : memref<8x512xf32, #tpu.memory_space<vmem>>, vector<8x512xf32>
    tpu.vector_store %arg4[%c0_5, %c0_6], %8 {strides = array<i32>} : memref<8x512xf32, #tpu.memory_space<vmem>>, vector<8x512xf32>,
    return
  }
  func.func @transform_0(%arg0: i32, %arg1: i32) -> (i32, i32) {
    %c0_i32 = arith.constant 0 : i32
    %c0_i32_0 = arith.constant 0 : i32
    return %arg0, %c0_i32 : i32, i32
  }
  func.func @transform_1(%arg0: i32, %arg1: i32) -> (i32, i32) {
    %c0_i32 = arith.constant 0 : i32
    %c0_i32_0 = arith.constant 0 : i32
    return %c0_i32, %arg1 : i32, i32
  }
  func.func @transform_2(%arg0: i32, %arg1: i32) -> (i32, i32) {
    %c0_i32 = arith.constant 0 : i32
    return %arg0, %arg1 : i32, i32
  }
}

</mosaic_0001>

<bundles_post_ra>
// kernel: tpu_custom_call.1
= control target key start
LH: loop header
LB: loop body
LE: loop exit
PB: predicated region body
PF: predicated region fallthrough
CT: control target
= control target key end

     0   :  { %7 = vsyncpa [#allocation3], 0  ;;  %s6594_s0 = inlined_call_operand.hbm [shape: f32[8,256], index: 0, kind: input, shape index: {}]   ;;  %s6595_s1 = inlined_call_operand.hbm [shape: s32[1,1024], index: 1, kind: input, shape index: {}]   ;;  %s6596_s2 = inlined_call_operand.hbm [shape: f32[8,1024], index: 2, kind: output, shape index: {}]  }
   0x1   :  { %8 = vsyncpa [#allocation6], 0 }
   0x2   :  { %10 = vsyncpa [#allocation6 + $0x1], 0 }
   0x3   :  { %11 = vsyncpa [#allocation4], 0 }
   0x4   :  { %13 = vsyncpa [#allocation4 + $0x1], 0  ;;  %s3853_s9 = smov 0   ;;  %s3855_s10 = smov 0  }
   0x5   :  { %s3857_s11 = smov 0   ;;  %s3859_s12 = smov 0  }
   0x6   :  { %s3861_s13 = smov 0   ;;  %s3863_s14 = smov 0  }
   0x7 LB: > { %s2421_s15 = sadd.s32 4294967295, %s3831_s14   ;;  %s2422_s16 = sadd.s32 4294967294, %s3831_s14   ;;  %s3831_s14 = sphi %s3863_s14, %s19_s14   ;;  %s3827_s13 = sphi %s3861_s13, %s8217_s13   ;;  %s3823_s12 = sphi %s3859_s12, %s8216_s12   ;;  %s3819_s11 = sphi %s3857_s11, %s8215_s11   ;;  %s3815_s10 = sphi %s3855_s10, %s8214_s10   ;;  %s3811_s9 = sphi %s3853_s9, %s8213_s9  }
   0x8   : > { %p77_p0 = scmp.ne.s32.totalorder %s3815_s10, %s3811_s9  ;;  %p3887_p1 = scmp.eq.s32.totalorder %s2421_s15, 0 }
   0x9   : > { %p3891_p2 = scmp.eq.s32.totalorder %s2421_s15, 1  ;;  %p109_p3 = scmp.eq.s32.totalorder %s2422_s16, 1 }
   0xa   : > { %s7176_s17 = scalar_select %p3887_p1, 1, 0 }
   0xb   : > { %s7177_s18 = scalar_select %p3891_p2, 1, 0 }
   0xc   : > { %p3897_p4 = por %p3887_p1, %p77_p0  ;;  %p2423_p5 = scmp.ge.s32.totalorder %s3831_s14, 1 }
   0xd   : > { %p3902_p6 = por %p109_p3, %p77_p0  ;;  %p116_p7 = scmp.lt.s32.totalorder %s3831_s14, 3 }
   0xe   : > { %s7178_s19 = scalar_select %p3897_p4, 1, 0 }
   0xf   : > { %s7179_s20 = scalar_select %p3902_p6, 1, 0 }
  0x10   : > { %p3907_p8 = pnand %p2423_p5, %p116_p7  ;;  %s3833_s22 = smov [#allocation2]  }
  0x11   : > { %s132_s23 = sshll.u32 %s3833_s22, 4  ;;  %s28_s25 = sadd.s32 1, %s3827_s13  ;;  %s133_s23 = int_to_ptr.vmem [resolvable:$true] %s132_s23 }
  0x12   : > { %s7180_s21 = scalar_select %p3907_p8, 1, 0 }
  0x13   : > { %p3620_p10 = pneg %p3907_p8  ;;  %s64_s26 = sadd.s32 1, %s3819_s11 }
  0x14   : > { %p3922_p12 = scmp.ge.s32.totalorder %s28_s25, 2  ;;  %s3687_s30 = scalar_lea.hbm %s6594_s0, 256 }
  0x15   : > { %p3916_p11 = pnand %p3620_p10, %p3887_p1  ;;  %p3688_p13 = scmp.ne.s32.totalorder %s6594_s0, %s3687_s30 }
  0x16   : > { %s7182_s27 = scalar_select %p3922_p12, 1, 0 }
  0x17   : > { %p3689_p0 = pneg %p3916_p11  ;;  %p3694_p7 = scmp.lt.u32.totalorder %s3687_s30, %s6594_s0 }
  0x19   : > { %p3690_p3 = pnand %p3689_p0, %p3688_p13 }
  0x1b   : > { %p3691_p5 = pneg %p3690_p3 }
  0x1d   : > { %p3696_p10 = pnand %p3694_p7, %p3691_p5 }
  0x1f   : > { %3699 = shalt.err (!%p3696_p10)
}
  0x20   : > { %s3700_s7 = scalar_lea.vmem %s133_s23, 256  ;;  %p3708_p1 = scmp.lt.s32.totalorder %s133_s23, %s133_s23 }
  0x21   : > { %p3701_p9 = scmp.ne.s32.totalorder %s133_s23, %s3700_s7  ;;  %p3709_p8 = scmp.lt.s32.totalorder %s3700_s7, %s3700_s7 }
  0x23   : > { %p3703_p6 = pnand %p3701_p9, %p3689_p0  ;;  %p3710_p2 = por %p3709_p8, %p3708_p1 }
  0x25   : > { %p3704_p4 = pneg %p3703_p6 }
  0x27   : > { %p3711_p12 = pnand %p3710_p2, %p3704_p4 }
  0x29   : > { %3714 = shalt.err (!%p3711_p12)
}
  0x2a   : > { %3623 = dma.hbm_to_vmem [thread:$0]  (!%p3916_p11), %s6594_s0, 256, %s133_s23, [#allocation3]  }
  0x2b   : > { %p7183_p1 = scmp.ne.s32.totalorder %s7182_s27, 0  ;;  %p71_p2 = scmp.ne.s32.totalorder %s3819_s11, %s3815_s10 }
  0x2c   : > { %p72_p4 = scmp.eq.s32.totalorder %s3831_s14, 0  ;;  %p3633_p6 = scmp.lt.s32.totalorder %s3831_s14, 2 }
  0x2d   : > { %s8219_s25 = smov (%p7183_p1, %s28_s25), 0  ;;  %p7184_p12 = scmp.ne.s32.totalorder %s7177_s18, 0 }
  0x2e   : > { %s61_s16 = ssub.s32 %s3827_s13, %s8219_s25  ;;  %p73_p9 = por %p72_p4, %p71_p2 }
  0x2f   : > { %p62_p8 = scmp.eq.s32.totalorder %s61_s16, 0  ;;  %p3954_p13 = por %p7184_p12, %p71_p2 }
  0x30   : > { %s143_s24 = sand.u32 1, %s3819_s11   ;;  %s2822_s27 = sshll.u32 %s3827_s13, 6 }
  0x31   : > { %s3962_s28 = scalar_select %p62_p8, %s3819_s11, %s64_s26  }
  0x32   : > { %s2426_s23 = sshll.u32 %s143_s24, 2  ;;  %s3968_s3 = scalar_lea.hbm %s6595_s1, %s2822_s27 }
  0x33   : > { %s147_s18 = scalar_lea.vmem [#allocation5], %s2426_s23  ;;  %p3972_p11 = pnand %p3633_p6, %p73_p9 }
  0x34   : > { %s155_s4 = sshll.u32 %s147_s18, 4  ;;  %s144_s26 = scalar_lea.sflag [#allocation6], %s143_s24  ;;  %s3970_s4 = int_to_ptr.vmem [resolvable:$true] %s155_s4 }
  0x35   : > { %s3715_s6 = scalar_lea.hbm %s3968_s3, 64  ;;  %p3717_p3 = pneg %p3972_p11 }
  0x36   : > { %p3716_p0 = scmp.ne.s32.totalorder %s3968_s3, %s3715_s6  ;;  %s3720_s15 = scalar_lea.hbm %s6595_s1, 128 }
  0x37   : > { %p3721_p10 = scmp.lt.u32.totalorder %s3968_s3, %s6595_s1  ;;  %p3722_p1 = scmp.lt.u32.totalorder %s3720_s15, %s3715_s6 }
  0x38   : > { %p3718_p5 = pnand %p3717_p3, %p3716_p0  ;;  %p3724_p4 = scmp.lt.u32.totalorder %s3715_s6, %s3968_s3 }
  0x39   : > { %p3723_p2 = por %p3722_p1, %p3721_p10 }
  0x3a   : > { %p3719_p7 = pneg %p3718_p5 }
  0x3b   : > { %p3725_p6 = por %p3724_p4, %p3723_p2 }
  0x3d   : > { %p3726_p8 = pnand %p3725_p6, %p3719_p7 }
  0x3f   : > { %3729 = shalt.err (!%p3726_p8)
}
  0x40   : > { %s3730_s24 = scalar_lea.vmem %s3970_s4, 64  ;;  %s3834_s27 = smov [#allocation5]  }
  0x41   : > { %p3731_p9 = scmp.ne.s32.totalorder %s3970_s4, %s3730_s24  ;;  %s3735_s29 = sshll.u32 %s3834_s27, 4  ;;  %s3736_s29 = int_to_ptr.vmem [resolvable:$false] %s3735_s29 }
  0x42   : > { %s3737_s30 = scalar_lea.vmem %s3736_s29, 128  ;;  %p3738_p5 = scmp.lt.s32.totalorder %s3970_s4, %s3736_s29 }
  0x43   : > { %p3733_p12 = pnand %p3731_p9, %p3717_p3  ;;  %p3739_p10 = scmp.lt.s32.totalorder %s3737_s30, %s3730_s24 }
  0x45   : > { %p3734_p0 = pneg %p3733_p12  ;;  %p3740_p1 = por %p3739_p10, %p3738_p5 }
  0x47   : > { %p3741_p2 = pnand %p3740_p1, %p3734_p0 }
  0x49   : > { %3744 = shalt.err (!%p3741_p2)
}
  0x4a   : > { %3627 = dma.hbm_to_vmem [thread:$0]  (!%p3972_p11), %s3968_s3, 64, %s3970_s4, %s144_s26  }
  0x4b   : > { %p7187_p7 = scmp.ne.s32.totalorder %s7180_s21, 0 }
  0x4d   : > { %164 = sbr.rel (%p7187_p7) target bundleno = 845 (0x34d), region = 28 }
  0x54   : > { %p7188_p3 = scmp.ne.s32.totalorder %s7176_s17, 0 }
  0x56   : > { %3798 = dma.done.wait (%p7188_p3), [#allocation3], 256  }
  0x57   : > { %3800 = vsyncadd (%p7188_p3), [#allocation3], 4294967040  ;;  %s4008_s18 = sand.u32 1, %s3815_s10   ;;  %p7189_p4 = scmp.ne.s32.totalorder %s7178_s19, 0 }
  0x58   : > { %s2431_s6 = sshll.u32 %s4008_s18, 2  ;;  %s171_s5 = scalar_lea.sflag [#allocation6], %s4008_s18 }
  0x59   : > { %s174_s7 = scalar_lea.vmem [#allocation5], %s2431_s6 }
  0x5a   : > { %3802 = dma.done.wait (%p7189_p4), %s171_s5, 64  }
  0x5b   : > { %3804 = vsyncadd (%p7189_p4), %s171_s5, 4294967232  ;;  %v197_v0 = vlaneseq  ;;  %v230_v14 = vld [vmem:[%s174_s7] sm:$0xf]  ;;  %v6633_v27 = vmov 0.0   ;;  %v7190_v30 = vmov 0  ;;  %v7195_v36 = vmov 0 }
  0x5c   : > { %v6607_v33 = vmov 1.0|1.0   ;;  %v7198_v41 = vmov 0  ;;  %v7203_v46 = vmov 0  ;;  %v7208_v53 = vmov 0  ;;  %s2432_s17 = sshll.u32 %s4008_s18, 5 }
  0x5d   : > { %v4016_v1 = vshrl.u32 %v197_v0, 7  ;;  %v7211_v58 = vmov 0  ;;  %s194_s19 = scalar_lea.vmem [#allocation7], %s2432_s17  ;;  %s2823_s3 = sshll.u32 %s3823_s12, 9 }
  0x5e   : > { %s2326_s21 = sshll.u32 %s194_s19, 4  ;;  %s6547_s8 = scalar_lea.hbm %s6596_s2, %s2823_s3  ;;  %s6542_s21 = int_to_ptr.vmem [resolvable:$true] %s2326_s21 }
  0x5f   : > { %v233_v2 = vsub.s32 0, %v4016_v1  ;;  %v237_v3 = vsub.s32 1, %v4016_v1  ;;  %v241_v4 = vsub.s32 2, %v4016_v1  ;;  %v245_v5 = vsub.s32 3, %v4016_v1  ;;  %s2310_s15 = scalar_lea.sflag [#allocation4], %s4008_s18  ;;  %s3745_s12 = scalar_lea.vmem %s6542_s21, 512 }
  0x60   : > { %v199_v6 = vadd.s32 8, %v4016_v1  ;;  %v4024_v7 = vadd.s32 16, %v4016_v1  ;;  %v4027_v8 = vadd.s32 24, %v4016_v1  ;;  %v4030_v9 = vadd.s32 32, %v4016_v1  ;;  %p3746_p11 = scmp.ne.s32.totalorder %s6542_s21, %s3745_s12  ;;  %s3837_s16 = smov [#allocation7]  }
  0x61   : > { %v4033_v10 = vadd.s32 40, %v4016_v1  ;;  %v4036_v11 = vadd.s32 48, %v4016_v1  ;;  %v4039_v12 = vadd.s32 56, %v4016_v1  ;;  %v4042_v13 = vadd.s32 64, %v4016_v1  ;;  %s3749_s23 = sshll.u32 %s3837_s16, 4  ;;  %s3750_s23 = int_to_ptr.vmem [resolvable:$false] %s3749_s23 }
  0x62   : > { %v4045_v15 = vadd.s32 72, %v4016_v1  ;;  %v4048_v16 = vadd.s32 80, %v4016_v1  ;;  %v4051_v17 = vadd.s32 88, %v4016_v1  ;;  %v4054_v18 = vadd.s32 96, %v4016_v1  ;;  %p3747_p6 = pnand %p3746_p11, %p3954_p13  ;;  %s3751_s24 = scalar_lea.vmem %s3750_s23, 1024 }
  0x63   : > { %v4056_v19 = vrot.slane %v230_v14, %v233_v2  ;;  %v4058_v20 = vrot.slane %v230_v14, %v237_v3  ;;  %v4060_v21 = vrot.slane %v230_v14, %v241_v4  ;;  %v4062_v22 = vrot.slane %v230_v14, %v245_v5  ;;  %p3752_p9 = scmp.lt.s32.totalorder %s6542_s21, %s3750_s23  ;;  %p3753_p12 = scmp.lt.s32.totalorder %s3751_s24, %s3745_s12 }
  0x64   : > { %v4065_v23 = vadd.s32 104, %v4016_v1  ;;  %v4068_v24 = vadd.s32 112, %v4016_v1  ;;  %v4071_v25 = vadd.s32 120, %v4016_v1  ;;  %v4074_v26 = vadd.s32 128, %v4016_v1  ;;  %p3748_p8 = pneg %p3747_p6 }
  0x65   : > { %vm248_vm0 = vcmp.eq.s32.totalorder %v4058_v20, %v4016_v1  ;;  %vm252_vm1 = vcmp.eq.s32.totalorder %v4058_v20, %v199_v6  ;;  %vm250_vm2 = vcmp.eq.s32.totalorder %v4062_v22, %v4016_v1  ;;  %vm254_vm3 = vcmp.eq.s32.totalorder %v4062_v22, %v199_v6  ;;  %p3754_p0 = por %p3753_p12, %p3752_p9 }
  0x66   : > { %v376_v28 = vsel %vm248_vm0, 1.0, %v6633_v27  ;;  %v380_v29 = vsel %vm252_vm1, 1.0, %v6633_v27  ;;  %vm4084_vm4 = vmpackc.low %vm252_vm1, %vm248_vm0  ;;  %v378_v31 = vsel %vm250_vm2, 1.0, %v6633_v27  ;;  %v382_v32 = vsel %vm254_vm3, 1.0, %v6633_v27 }
  0x67   : > { %v7191_v30 = vsel %vm4084_vm4, 4294967295, %v7190_v30  ;;  %2825 = vmatprep.subr.msk.bf16.mxu0 %vm4084_vm4, %v6607_v33  ;;  %v4093_v34 = vsub.f32 %v376_v28, %v376_v28  ;;  %v4095_v35 = vsub.f32 %v380_v29, %v380_v29  ;;  %vm4097_vm5 = vmpackc.low %vm254_vm3, %vm250_vm2  ;;  %v4101_v37 = vsub.f32 %v378_v31, %v378_v31  ;;  %p3755_p5 = pnand %p3754_p0, %p3748_p8 }
  0x68   : > { %7192 = vst [vmem:[#allocation11_spill] sm:$0xff] %v7191_v30  ;;  %v7196_v36 = vsel %vm4097_vm5, 4294967295, %v7195_v36  ;;  %v4103_v38 = vsub.f32 %v382_v32, %v382_v32  ;;  %3209 = vmatprep.subr.msk.bf16.mxu1 %vm4097_vm5, %v6607_v33  ;;  %vm247_vm6 = vcmp.eq.s32.totalorder %v4056_v19, %v4016_v1  ;;  %vm251_vm7 = vcmp.eq.s32.totalorder %v4056_v19, %v199_v6 }
  0x69   : > { %7193 = vst [vmem:[#allocation12_spill] sm:$0xff] %v4093_v34  ;;  %7194 = vst [vmem:[#allocation13_spill] sm:$0xff] %v4095_v35  ;;  %vm249_vm8 = vcmp.eq.s32.totalorder %v4060_v21, %v4016_v1  ;;  %vm253_vm9 = vcmp.eq.s32.totalorder %v4060_v21, %v199_v6  ;;  %v375_v39 = vsel %vm247_vm6, 1.0, %v6633_v27  ;;  %v379_v40 = vsel %vm251_vm7, 1.0, %v6633_v27 }
  0x6a   : > { %7197 = vst [vmem:[#allocation14_spill] sm:$0xff] %v7196_v36  ;;  %vm4116_vm10 = vmpackc.low %vm251_vm7, %vm247_vm6  ;;  %v377_v42 = vsel %vm249_vm8, 1.0, %v6633_v27  ;;  %v381_v43 = vsel %vm253_vm9, 1.0, %v6633_v27  ;;  %v4125_v44 = vsub.f32 %v375_v39, %v375_v39  ;;  %v4127_v45 = vsub.f32 %v379_v40, %v379_v40 }
  0x6b   : > { %v7199_v41 = vsel %vm4116_vm10, 4294967295, %v7198_v41  ;;  %2827 = vmatpush1.bf16.msk.msra.mxu0 %vm4116_vm10, %v6607_v33  ;;  %vm4129_vm11 = vmpackc.low %vm253_vm9, %vm249_vm8  ;;  %v4133_v47 = vsub.f32 %v377_v42, %v377_v42  ;;  %v4135_v48 = vsub.f32 %v381_v43, %v381_v43  ;;  %vm256_vm12 = vcmp.eq.s32.totalorder %v4058_v20, %v4024_v7 }
  0x6c   : > { %7200 = vst [vmem:[#allocation15_spill] sm:$0xff] %v7199_v41  ;;  %7201 = vst [vmem:[#allocation16_spill] sm:$0xff] %v4125_v44  ;;  %v7204_v46 = vsel %vm4129_vm11, 4294967295, %v7203_v46  ;;  %3211 = vmatpush1.bf16.msk.msra.mxu1 %vm4129_vm11, %v6607_v33  ;;  %vm260_vm13 = vcmp.eq.s32.totalorder %v4058_v20, %v4027_v8  ;;  %vm258_vm14 = vcmp.eq.s32.totalorder %v4062_v22, %v4024_v7  ;;  %v6604_v49 = vand.u32 4294901760, %v4125_v44 }
  0x6d   : > { %7202 = vst [vmem:[#allocation17_spill] sm:$0xff] %v4127_v45  ;;  %7205 = vst [vmem:[#allocation18_spill] sm:$0xff] %v7204_v46  ;;  %vm262_vm15 = vcmp.eq.s32.totalorder %v4062_v22, %v4027_v8  ;;  %v6603_v50 = vand.u32 4294901760, %v4127_v45  ;;  %v6602_v51 = vand.u32 4294901760, %v4133_v47  ;;  %v6601_v52 = vand.u32 4294901760, %v4135_v48 }
  0x6e   : > { %7206 = vst [vmem:[#allocation19_spill] sm:$0xff] %v4133_v47  ;;  %7207 = vst [vmem:[#allocation20_spill] sm:$0xff] %v4135_v48  ;;  %v384_v54 = vsel %vm256_vm12, 1.0, %v6633_v27  ;;  %v388_v55 = vsel %vm260_vm13, 1.0, %v6633_v27  ;;  %v386_v56 = vsel %vm258_vm14, 1.0, %v6633_v27  ;;  %v390_v57 = vsel %vm262_vm15, 1.0, %v6633_v27 }
  0x6f   : > { %vm4152_vm0 = vmpackc.low %vm260_vm13, %vm256_vm12  ;;  %v4170_v59 = vsub.f32 %v4125_v44, %v6604_v49  ;;  %v4175_v60 = vsub.f32 %v4127_v45, %v6603_v50  ;;  %v4180_v61 = vsub.f32 %v4133_v47, %v6602_v51  ;;  %v4185_v62 = vsub.f32 %v4135_v48, %v6601_v52 }
  0x70   : > { %v7209_v53 = vsel %vm4152_vm0, 4294967295, %v7208_v53  ;;  %2829 = vmatprep.subr.msk.bf16.mxu0 %vm4152_vm0, %v6607_v33  ;;  %vm4163_vm1 = vmpackc.low %vm262_vm15, %vm258_vm14  ;;  %v4190_v63 = vsub.f32 %v384_v54, %v384_v54  ;;  %v4192_v0 = vsub.f32 %v388_v55, %v388_v55  ;;  %v4194_v2 = vsub.f32 %v386_v56, %v386_v56 }
  0x71   : > { %7210 = vst [vmem:[#allocation21_spill] sm:$0xff] %v7209_v53  ;;  %v7212_v58 = vsel %vm4163_vm1, 4294967295, %v7211_v58  ;;  %3213 = vmatprep.subr.msk.bf16.mxu1 %vm4163_vm1, %v6607_v33  ;;  %v4196_v3 = vsub.f32 %v390_v57, %v390_v57  ;;  %vm255_vm2 = vcmp.eq.s32.totalorder %v4056_v19, %v4024_v7  ;;  %vm259_vm3 = vcmp.eq.s32.totalorder %v4056_v19, %v4027_v8 }
  0x72   : > { %7213 = vst [vmem:[#allocation22_spill] sm:$0xff] %v7212_v58  ;;  %7214 = vst [vmem:[#allocation23_spill] sm:$0xff] %v4194_v2  ;;  %vm257_vm6 = vcmp.eq.s32.totalorder %v4060_v21, %v4024_v7  ;;  %vm261_vm7 = vcmp.eq.s32.totalorder %v4060_v21, %v4027_v8  ;;  %v383_v28 = vsel %vm255_vm2, 1.0, %v6633_v27  ;;  %v387_v29 = vsel %vm259_vm3, 1.0, %v6633_v27 }
  0x73   : > { %7215 = vst [vmem:[#allocation24_spill] sm:$0xff] %v4196_v3  ;;  %vm4212_vm8 = vmpackc.low %vm259_vm3, %vm255_vm2  ;;  %v7216_v31 = vmov 0  ;;  %v385_v32 = vsel %vm257_vm6, 1.0, %v6633_v27  ;;  %v389_v39 = vsel %vm261_vm7, 1.0, %v6633_v27  ;;  %v4221_v7 = vsub.f32 %v383_v28, %v383_v28 }
  0x74   : > { %v7217_v31 = vsel %vm4212_vm8, 4294967295, %v7216_v31  ;;  %2831 = vmatpush1.bf16.msk.msra.mxu0 %vm4212_vm8, %v6607_v33  ;;  %v4223_v40 = vsub.f32 %v387_v29, %v387_v29  ;;  %vm4225_vm9 = vmpackc.low %vm261_vm7, %vm257_vm6  ;;  %v7221_v8 = vmov 0  ;;  %v4229_v42 = vsub.f32 %v385_v32, %v385_v32 }
  0x75   : > { %7218 = vst [vmem:[#allocation25_spill] sm:$0xff] %v7217_v31  ;;  %7219 = vst [vmem:[#allocation26_spill] sm:$0xff] %v4221_v7  ;;  %v7222_v8 = vsel %vm4225_vm9, 4294967295, %v7221_v8  ;;  %v4231_v43 = vsub.f32 %v389_v39, %v389_v39  ;;  %3215 = vmatpush1.bf16.msk.msra.mxu1 %vm4225_vm9, %v6607_v33  ;;  %vm264_vm12 = vcmp.eq.s32.totalorder %v4058_v20, %v4030_v9  ;;  %v7226_v28 = vmov 0 }
  0x76   : > { %7220 = vst [vmem:[#allocation27_spill] sm:$0xff] %v4223_v40  ;;  %7223 = vst [vmem:[#allocation28_spill] sm:$0xff] %v7222_v8  ;;  %vm268_vm13 = vcmp.eq.s32.totalorder %v4058_v20, %v4033_v10  ;;  %vm266_vm14 = vcmp.eq.s32.totalorder %v4062_v22, %v4030_v9  ;;  %vm270_vm15 = vcmp.eq.s32.totalorder %v4062_v22, %v4033_v10  ;;  %v392_v29 = vsel %vm264_vm12, 1.0, %v6633_v27 }
  0x77   : > { %7224 = vst [vmem:[#allocation29_spill] sm:$0xff] %v4229_v42  ;;  %7225 = vst [vmem:[#allocation30_spill] sm:$0xff] %v4231_v43  ;;  %v396_v32 = vsel %vm268_vm13, 1.0, %v6633_v27  ;;  %v394_v39 = vsel %vm266_vm14, 1.0, %v6633_v27  ;;  %v398_v52 = vsel %vm270_vm15, 1.0, %v6633_v27  ;;  %v7229_v51 = vmov 0 }
  0x78   : > { %vm4248_vm2 = vmpackc.low %vm268_vm13, %vm264_vm12  ;;  %v4263_v50 = vsub.f32 %v392_v29, %v392_v29  ;;  %v4265_v49 = vsub.f32 %v396_v32, %v396_v32  ;;  %v4270_v57 = vsub.f32 %v394_v39, %v394_v39  ;;  %v4272_v56 = vsub.f32 %v398_v52, %v398_v52 }
  0x79   : > { %v7227_v28 = vsel %vm4248_vm2, 4294967295, %v7226_v28  ;;  %2833 = vmatprep.subr.msk.bf16.mxu0 %vm4248_vm2, %v6607_v33  ;;  %vm4259_vm3 = vmpackc.low %vm270_vm15, %vm266_vm14  ;;  %vm263_vm6 = vcmp.eq.s32.totalorder %v4056_v19, %v4030_v9  ;;  %vm267_vm7 = vcmp.eq.s32.totalorder %v4056_v19, %v4033_v10  ;;  %vm265_vm12 = vcmp.eq.s32.totalorder %v4060_v21, %v4030_v9 }
  0x7a   : > { %7228 = vst [vmem:[#allocation31_spill] sm:$0xff] %v7227_v28  ;;  %v7230_v51 = vsel %vm4259_vm3, 4294967295, %v7229_v51  ;;  %7232 = vst [vmem:[#allocation33_spill] sm:$0xff] %v4263_v50  ;;  %3217 = vmatprep.subr.msk.bf16.mxu1 %vm4259_vm3, %v6607_v33  ;;  %vm269_vm13 = vcmp.eq.s32.totalorder %v4060_v21, %v4033_v10  ;;  %v391_v29 = vsel %vm263_vm6, 1.0, %v6633_v27  ;;  %v395_v32 = vsel %vm267_vm7, 1.0, %v6633_v27 }
  0x7b   : > { %7231 = vst [vmem:[#allocation32_spill] sm:$0xff] %v7230_v51  ;;  %7233 = vst [vmem:[#allocation34_spill] sm:$0xff] %v4265_v49  ;;  %v7236_v39 = vmov 0  ;;  %v393_v52 = vsel %vm265_vm12, 1.0, %v6633_v27  ;;  %v397_v55 = vsel %vm269_vm13, 1.0, %v6633_v27  ;;  %v4293_v9 = vsub.f32 %v391_v29, %v391_v29 }
  0x7c   : > { %7234 = vst [vmem:[#allocation35_spill] sm:$0xff] %v4270_v57  ;;  %7235 = vst [vmem:[#allocation36_spill] sm:$0xff] %v4272_v56  ;;  %v4295_v54 = vsub.f32 %v395_v32, %v395_v32  ;;  %v7241_v10 = vmov 0  ;;  %v4301_v14 = vsub.f32 %v393_v52, %v393_v52  ;;  %v4303_v6 = vsub.f32 %v397_v55, %v397_v55 }
  0x7d   : > { %vm4284_vm14 = vmpackc.low %vm267_vm7, %vm263_vm6  ;;  %7239 = vst [vmem:[#allocation38_spill] sm:$0xff] %v4293_v9  ;;  %vm272_vm6 = vcmp.eq.s32.totalorder %v4058_v20, %v4036_v11  ;;  %vm276_vm7 = vcmp.eq.s32.totalorder %v4058_v20, %v4039_v12  ;;  %v7246_v5 = vmov 0  ;;  %v7250_v32 = vmov 0 }
  0x7e   : > { %v7237_v39 = vsel %vm4284_vm14, 4294967295, %v7236_v39  ;;  %2835 = vmatpush1.bf16.msk.msra.mxu0 %vm4284_vm14, %v6607_v33  ;;  %7240 = vst [vmem:[#allocation39_spill] sm:$0xff] %v4295_v54  ;;  %vm4297_vm15 = vmpackc.low %vm269_vm13, %vm265_vm12  ;;  %vm274_vm12 = vcmp.eq.s32.totalorder %v4062_v22, %v4036_v11  ;;  %vm278_vm13 = vcmp.eq.s32.totalorder %v4062_v22, %v4039_v12  ;;  %v400_v4 = vsel %vm272_vm6, 1.0, %v6633_v27 }
  0x7f   : > { %7238 = vst [vmem:[#allocation37_spill] sm:$0xff] %v7237_v39  ;;  %v7242_v10 = vsel %vm4297_vm15, 4294967295, %v7241_v10  ;;  %7244 = vst [vmem:[#allocation41_spill] sm:$0xff] %v4301_v14  ;;  %3219 = vmatpush1.bf16.msk.msra.mxu1 %vm4297_vm15, %v6607_v33  ;;  %v404_v33 = vsel %vm276_vm7, 1.0, %v6633_v27  ;;  %v402_v29 = vsel %vm274_vm12, 1.0, %v6633_v27  ;;  %v406_v55 = vsel %vm278_vm13, 1.0, %v6633_v27 }
  0x80   : > { %7243 = vst [vmem:[#allocation40_spill] sm:$0xff] %v7242_v10  ;;  %7245 = vst [vmem:[#allocation42_spill] sm:$0xff] %v4303_v6  ;;  %v7249_v10 = vmov 1.0|1.0   ;;  %v4335_v52 = vsub.f32 %v400_v4, %v400_v4  ;;  %v4337_v39 = vsub.f32 %v404_v33, %v404_v33  ;;  %v4342_v51 = vsub.f32 %v402_v29, %v402_v29 }
  0x81   : > { %vm4320_vm15 = vmpackc.low %vm276_vm7, %vm272_vm6  ;;  %vm271_vm6 = vcmp.eq.s32.totalorder %v4056_v19, %v4036_v11  ;;  %vm275_vm7 = vcmp.eq.s32.totalorder %v4056_v19, %v4039_v12  ;;  %v7257_v29 = vmov 0 }
  0x82   : > { %v7247_v5 = vsel %vm4320_vm15, 4294967295, %v7246_v5  ;;  %2837 = vmatprep.subr.msk.bf16.mxu0 %vm4320_vm15, %v7249_v10  ;;  %vm4331_vm14 = vmpackc.low %vm278_vm13, %vm274_vm12  ;;  %7253 = vst [vmem:[#allocation45_spill] sm:$0xff] %v4335_v52  ;;  %vm273_vm12 = vcmp.eq.s32.totalorder %v4060_v21, %v4036_v11  ;;  %vm277_vm13 = vcmp.eq.s32.totalorder %v4060_v21, %v4039_v12  ;;  %v399_v33 = vsel %vm271_vm6, 1.0, %v6633_v27 }
  0x83   : > { %7248 = vst [vmem:[#allocation43_spill] sm:$0xff] %v7247_v5  ;;  %v7251_v32 = vsel %vm4331_vm14, 4294967295, %v7250_v32  ;;  %7254 = vst [vmem:[#allocation46_spill] sm:$0xff] %v4337_v39  ;;  %3221 = vmatprep.subr.msk.bf16.mxu1 %vm4331_vm14, %v7249_v10  ;;  %v4344_v5 = vsub.f32 %v406_v55, %v406_v55  ;;  %v403_v4 = vsel %vm275_vm7, 1.0, %v6633_v27  ;;  %v401_v55 = vsel %vm273_vm12, 1.0, %v6633_v27 }
  0x84   : > { %7252 = vst [vmem:[#allocation44_spill] sm:$0xff] %v7251_v32  ;;  %7255 = vst [vmem:[#allocation47_spill] sm:$0xff] %v4342_v51  ;;  %v405_v32 = vsel %vm277_vm13, 1.0, %v6633_v27  ;;  %v4365_v11 = vsub.f32 %v399_v33, %v399_v33  ;;  %v4367_v8 = vsub.f32 %v403_v4, %v403_v4  ;;  %v7262_v12 = vmov 0 }
  0x85   : > { %7256 = vst [vmem:[#allocation48_spill] sm:$0xff] %v4344_v5  ;;  %vm4356_vm14 = vmpackc.low %vm275_vm7, %vm271_vm6  ;;  %v4373_v28 = vsub.f32 %v401_v55, %v401_v55  ;;  %v4375_v31 = vsub.f32 %v405_v32, %v405_v32  ;;  %vm280_vm6 = vcmp.eq.s32.totalorder %v4058_v20, %v4042_v13  ;;  %vm284_vm7 = vcmp.eq.s32.totalorder %v4058_v20, %v4045_v15 }
  0x86   : > { %v7258_v29 = vsel %vm4356_vm14, 4294967295, %v7257_v29  ;;  %2839 = vmatpush1.bf16.msk.msra.mxu0 %vm4356_vm14, %v7249_v10  ;;  %7260 = vst [vmem:[#allocation50_spill] sm:$0xff] %v4365_v11  ;;  %7261 = vst [vmem:[#allocation51_spill] sm:$0xff] %v4367_v8  ;;  %v7267_v27 = vmov 0  ;;  %v7271_v4 = vmov 0 }
  0x87   : > { %7259 = vst [vmem:[#allocation49_spill] sm:$0xff] %v7258_v29  ;;  %vm4369_vm15 = vmpackc.low %vm277_vm13, %vm273_vm12  ;;  %vm282_vm12 = vcmp.eq.s32.totalorder %v4062_v22, %v4042_v13  ;;  %vm286_vm13 = vcmp.eq.s32.totalorder %v4062_v22, %v4045_v15 }
  0x88   : > { %v7263_v12 = vsel %vm4369_vm15, 4294967295, %v7262_v12  ;;  %7265 = vst [vmem:[#allocation53_spill] sm:$0xff] %v4373_v28  ;;  %7266 = vst [vmem:[#allocation54_spill] sm:$0xff] %v4375_v31  ;;  %3223 = vmatpush1.bf16.msk.msra.mxu1 %vm4369_vm15, %v7249_v10 }
  0x89   : > { %7264 = vst [vmem:[#allocation52_spill] sm:$0xff] %v7263_v12  ;;  %vm4392_vm15 = vmpackc.low %vm284_vm7, %vm280_vm6  ;;  %v7270_v12 = vmov 0.0  }
  0x8a   : > { %v7268_v27 = vsel %vm4392_vm15, 4294967295, %v7267_v27  ;;  %v408_v29 = vsel %vm280_vm6, 1.0, %v7270_v12  ;;  %v412_v58 = vsel %vm284_vm7, 1.0, %v7270_v12  ;;  %2841 = vmatprep.subr.msk.bf16.mxu0 %vm4392_vm15, %v7249_v10  ;;  %v410_v33 = vsel %vm282_vm12, 1.0, %v7270_v12  ;;  %vm4403_vm14 = vmpackc.low %vm286_vm13, %vm282_vm12 }
  0x8b   : > { %7269 = vst [vmem:[#allocation55_spill] sm:$0xff] %v7268_v27  ;;  %v414_v32 = vsel %vm286_vm13, 1.0, %v7270_v12  ;;  %v7272_v4 = vsel %vm4403_vm14, 4294967295, %v7271_v4  ;;  %v4407_v55 = vsub.f32 %v408_v29, %v408_v29  ;;  %v4409_v46 = vsub.f32 %v412_v58, %v412_v58  ;;  %3225 = vmatprep.subr.msk.bf16.mxu1 %vm4403_vm14, %v7249_v10 }
  0x8c   : > { %7273 = vst [vmem:[#allocation56_spill] sm:$0xff] %v7272_v4  ;;  %v4414_v53 = vsub.f32 %v410_v33, %v410_v33  ;;  %v4416_v27 = vsub.f32 %v414_v32, %v414_v32  ;;  %vm279_vm6 = vcmp.eq.s32.totalorder %v4056_v19, %v4042_v13  ;;  %vm283_vm7 = vcmp.eq.s32.totalorder %v4056_v19, %v4045_v15 }
  0x8d   : > { %7274 = vst [vmem:[#allocation57_spill] sm:$0xff] %v4407_v55  ;;  %7275 = vst [vmem:[#allocation58_spill] sm:$0xff] %v4409_v46  ;;  %vm281_vm12 = vcmp.eq.s32.totalorder %v4060_v21, %v4042_v13  ;;  %vm285_vm13 = vcmp.eq.s32.totalorder %v4060_v21, %v4045_v15  ;;  %v407_v58 = vsel %vm279_vm6, 1.0, %v7270_v12  ;;  %v411_v29 = vsel %vm283_vm7, 1.0, %v7270_v12 }
  0x8e   : > { %7276 = vst [vmem:[#allocation59_spill] sm:$0xff] %v4414_v53  ;;  %7277 = vst [vmem:[#allocation60_spill] sm:$0xff] %v4416_v27  ;;  %v7278_v33 = vmov 0  ;;  %v409_v32 = vsel %vm281_vm12, 1.0, %v7270_v12  ;;  %v413_v4 = vsel %vm285_vm13, 1.0, %v7270_v12  ;;  %v4437_v13 = vsub.f32 %v407_v58, %v407_v58 }
  0x8f   : > { %vm4428_vm14 = vmpackc.low %vm283_vm7, %vm279_vm6  ;;  %v4439_v41 = vsub.f32 %v411_v29, %v411_v29  ;;  %v7283_v15 = vmov 0  ;;  %v4445_v36 = vsub.f32 %v409_v32, %v409_v32  ;;  %v4447_v30 = vsub.f32 %v413_v4, %v413_v4 }
  0x90   : > { %v7279_v33 = vsel %vm4428_vm14, 4294967295, %v7278_v33  ;;  %2843 = vmatpush1.bf16.msk.msra.mxu0 %vm4428_vm14, %v7249_v10  ;;  %7281 = vst [vmem:[#allocation62_spill] sm:$0xff] %v4437_v13  ;;  %vm4441_vm15 = vmpackc.low %vm285_vm13, %vm281_vm12  ;;  %vm288_vm6 = vcmp.eq.s32.totalorder %v4058_v20, %v4048_v16  ;;  %vm292_vm7 = vcmp.eq.s32.totalorder %v4058_v20, %v4051_v17  ;;  %vm290_vm12 = vcmp.eq.s32.totalorder %v4062_v22, %v4048_v16 }
  0x91   : > { %7280 = vst [vmem:[#allocation61_spill] sm:$0xff] %v7279_v33  ;;  %7282 = vst [vmem:[#allocation63_spill] sm:$0xff] %v4439_v41  ;;  %v7284_v15 = vsel %vm4441_vm15, 4294967295, %v7283_v15  ;;  %3227 = vmatpush1.bf16.msk.msra.mxu1 %vm4441_vm15, %v7249_v10  ;;  %vm294_vm13 = vcmp.eq.s32.totalorder %v4062_v22, %v4051_v17  ;;  %v416_v33 = vsel %vm288_vm6, 1.0, %v7270_v12  ;;  %v420_v48 = vsel %vm292_vm7, 1.0, %v7270_v12 }
  0x92   : > { %7285 = vst [vmem:[#allocation64_spill] sm:$0xff] %v7284_v15  ;;  %7286 = vst [vmem:[#allocation65_spill] sm:$0xff] %v4445_v36  ;;  %v7288_v15 = vmov 0  ;;  %v418_v58 = vsel %vm290_vm12, 1.0, %v7270_v12  ;;  %v422_v4 = vsel %vm294_vm13, 1.0, %v7270_v12  ;;  %v7291_v29 = vmov 0 }
  0x93   : > { %7287 = vst [vmem:[#allocation66_spill] sm:$0xff] %v4447_v30  ;;  %vm4464_vm15 = vmpackc.low %vm292_vm7, %vm288_vm6  ;;  %v4479_v32 = vsub.f32 %v416_v33, %v416_v33  ;;  %v4481_v47 = vsub.f32 %v420_v48, %v420_v48  ;;  %v4486_v45 = vsub.f32 %v418_v58, %v418_v58  ;;  %vm287_vm6 = vcmp.eq.s32.totalorder %v4056_v19, %v4048_v16 }
  0x94   : > { %v7289_v15 = vsel %vm4464_vm15, 4294967295, %v7288_v15  ;;  %2845 = vmatprep.subr.msk.bf16.mxu0 %vm4464_vm15, %v7249_v10  ;;  %vm4475_vm14 = vmpackc.low %vm294_vm13, %vm290_vm12  ;;  %vm291_vm7 = vcmp.eq.s32.totalorder %v4056_v19, %v4051_v17  ;;  %vm289_vm12 = vcmp.eq.s32.totalorder %v4060_v21, %v4048_v16  ;;  %vm293_vm13 = vcmp.eq.s32.totalorder %v4060_v21, %v4051_v17 }
  0x95   : > { %7290 = vst [vmem:[#allocation67_spill] sm:$0xff] %v7289_v15  ;;  %v7292_v29 = vsel %vm4475_vm14, 4294967295, %v7291_v29  ;;  %7294 = vst [vmem:[#allocation69_spill] sm:$0xff] %v4479_v32  ;;  %3229 = vmatprep.subr.msk.bf16.mxu1 %vm4475_vm14, %v7249_v10  ;;  %v4488_v15 = vsub.f32 %v422_v4, %v422_v4  ;;  %v415_v48 = vsel %vm287_vm6, 1.0, %v7270_v12  ;;  %v419_v33 = vsel %vm291_vm7, 1.0, %v7270_v12 }
  0x96   : > { %7293 = vst [vmem:[#allocation68_spill] sm:$0xff] %v7292_v29  ;;  %7295 = vst [vmem:[#allocation70_spill] sm:$0xff] %v4481_v47  ;;  %v7298_v58 = vmov 0  ;;  %v417_v4 = vsel %vm289_vm12, 1.0, %v7270_v12  ;;  %v421_v29 = vsel %vm293_vm13, 1.0, %v7270_v12  ;;  %v4509_v16 = vsub.f32 %v415_v48, %v415_v48 }
  0x97   : > { %7296 = vst [vmem:[#allocation71_spill] sm:$0xff] %v4486_v45  ;;  %7297 = vst [vmem:[#allocation72_spill] sm:$0xff] %v4488_v15  ;;  %v4511_v44 = vsub.f32 %v419_v33, %v419_v33  ;;  %v7303_v17 = vmov 0  ;;  %v4517_v15 = vsub.f32 %v417_v4, %v417_v4  ;;  %v4519_v45 = vsub.f32 %v421_v29, %v421_v29 }
  0x98   : > { %vm4500_vm14 = vmpackc.low %vm291_vm7, %vm287_vm6  ;;  %7301 = vst [vmem:[#allocation74_spill] sm:$0xff] %v4509_v16  ;;  %vm296_vm6 = vcmp.eq.s32.totalorder %v4058_v20, %v4054_v18  ;;  %vm300_vm7 = vcmp.eq.s32.totalorder %v4058_v20, %v4065_v23  ;;  %v7311_v33 = vmov 0 }
  0x99   : > { %v7299_v58 = vsel %vm4500_vm14, 4294967295, %v7298_v58  ;;  %2847 = vmatpush1.bf16.msk.msra.mxu0 %vm4500_vm14, %v7249_v10  ;;  %7302 = vst [vmem:[#allocation75_spill] sm:$0xff] %v4511_v44  ;;  %vm4513_vm15 = vmpackc.low %vm293_vm13, %vm289_vm12  ;;  %vm298_vm12 = vcmp.eq.s32.totalorder %v4062_v22, %v4054_v18  ;;  %vm302_vm13 = vcmp.eq.s32.totalorder %v4062_v22, %v4065_v23  ;;  %v428_v47 = vsel %vm300_vm7, 1.0, %v7270_v12 }
  0x9a   : > { %7300 = vst [vmem:[#allocation73_spill] sm:$0xff] %v7299_v58  ;;  %v7304_v17 = vsel %vm4513_vm15, 4294967295, %v7303_v17  ;;  %7306 = vst [vmem:[#allocation77_spill] sm:$0xff] %v4517_v15  ;;  %3231 = vmatpush1.bf16.msk.msra.mxu1 %vm4513_vm15, %v7249_v10  ;;  %v424_v58 = vsel %vm296_vm6, 1.0, %v7270_v12  ;;  %v426_v48 = vsel %vm298_vm12, 1.0, %v7270_v12  ;;  %v430_v29 = vsel %vm302_vm13, 1.0, %v7270_v12 }
  0x9b   : > { %7305 = vst [vmem:[#allocation76_spill] sm:$0xff] %v7304_v17  ;;  %7307 = vst [vmem:[#allocation78_spill] sm:$0xff] %v4519_v45  ;;  %v7308_v17 = vmov 0  ;;  %v4551_v4 = vsub.f32 %v424_v58, %v424_v58  ;;  %v4553_v45 = vsub.f32 %v428_v47, %v428_v47  ;;  %v4558_v15 = vsub.f32 %v426_v48, %v426_v48 }
  0x9c   : > { %vm4536_vm15 = vmpackc.low %vm300_vm7, %vm296_vm6  ;;  %vm295_vm6 = vcmp.eq.s32.totalorder %v4056_v19, %v4054_v18  ;;  %vm299_vm7 = vcmp.eq.s32.totalorder %v4056_v19, %v4065_v23  ;;  %v7318_v48 = vmov 0 }
  0x9d   : > { %v7309_v17 = vsel %vm4536_vm15, 4294967295, %v7308_v17  ;;  %2849 = vmatprep.subr.msk.bf16.mxu0 %vm4536_vm15, %v7249_v10  ;;  %vm4547_vm14 = vmpackc.low %vm302_vm13, %vm298_vm12  ;;  %7314 = vst [vmem:[#allocation81_spill] sm:$0xff] %v4551_v4  ;;  %vm297_vm12 = vcmp.eq.s32.totalorder %v4060_v21, %v4054_v18  ;;  %vm301_vm13 = vcmp.eq.s32.totalorder %v4060_v21, %v4065_v23  ;;  %v423_v47 = vsel %vm295_vm6, 1.0, %v7270_v12 }
  0x9e   : > { %7310 = vst [vmem:[#allocation79_spill] sm:$0xff] %v7309_v17  ;;  %v7312_v33 = vsel %vm4547_vm14, 4294967295, %v7311_v33  ;;  %7315 = vst [vmem:[#allocation82_spill] sm:$0xff] %v4553_v45  ;;  %3233 = vmatprep.subr.msk.bf16.mxu1 %vm4547_vm14, %v7249_v10  ;;  %v4560_v17 = vsub.f32 %v430_v29, %v430_v29  ;;  %v427_v58 = vsel %vm299_vm7, 1.0, %v7270_v12  ;;  %v425_v29 = vsel %vm297_vm12, 1.0, %v7270_v12 }
  0x9f   : > { %7313 = vst [vmem:[#allocation80_spill] sm:$0xff] %v7312_v33  ;;  %7316 = vst [vmem:[#allocation83_spill] sm:$0xff] %v4558_v15  ;;  %v429_v33 = vsel %vm301_vm13, 1.0, %v7270_v12  ;;  %v4581_v18 = vsub.f32 %v423_v47, %v423_v47  ;;  %v7323_v23 = vmov 0  ;;  %v4589_v15 = vsub.f32 %v425_v29, %v425_v29 }
  0xa0   : > { %7317 = vst [vmem:[#allocation84_spill] sm:$0xff] %v4560_v17  ;;  %vm4572_vm14 = vmpackc.low %vm299_vm7, %vm295_vm6  ;;  %v4583_v17 = vsub.f32 %v427_v58, %v427_v58  ;;  %v4591_v45 = vsub.f32 %v429_v33, %v429_v33  ;;  %vm304_vm6 = vcmp.eq.s32.totalorder %v4058_v20, %v4068_v24  ;;  %vm308_vm7 = vcmp.eq.s32.totalorder %v4058_v20, %v4071_v25 }
  0xa1   : > { %v7319_v48 = vsel %vm4572_vm14, 4294967295, %v7318_v48  ;;  %2851 = vmatpush1.bf16.msk.msra.mxu0 %vm4572_vm14, %v7249_v10  ;;  %7321 = vst [vmem:[#allocation86_spill] sm:$0xff] %v4581_v18  ;;  %vm4585_vm15 = vmpackc.low %vm301_vm13, %vm297_vm12  ;;  %vm306_vm12 = vcmp.eq.s32.totalorder %v4062_v22, %v4068_v24  ;;  %vm310_vm13 = vcmp.eq.s32.totalorder %v4062_v22, %v4071_v25  ;;  %v436_v4 = vsel %vm308_vm7, 1.0, %v7270_v12 }
  0xa2   : > { %7320 = vst [vmem:[#allocation85_spill] sm:$0xff] %v7319_v48  ;;  %7322 = vst [vmem:[#allocation87_spill] sm:$0xff] %v4583_v17  ;;  %v7324_v23 = vsel %vm4585_vm15, 4294967295, %v7323_v23  ;;  %3235 = vmatpush1.bf16.msk.msra.mxu1 %vm4585_vm15, %v7249_v10  ;;  %v432_v48 = vsel %vm304_vm6, 1.0, %v7270_v12  ;;  %v434_v47 = vsel %vm306_vm12, 1.0, %v7270_v12  ;;  %v438_v33 = vsel %vm310_vm13, 1.0, %v7270_v12 }
  0xa3   : > { %7325 = vst [vmem:[#allocation88_spill] sm:$0xff] %v7324_v23  ;;  %7326 = vst [vmem:[#allocation89_spill] sm:$0xff] %v4589_v15  ;;  %v7328_v23 = vmov 0  ;;  %v7331_v58 = vmov 0  ;;  %v4623_v29 = vsub.f32 %v432_v48, %v432_v48  ;;  %v4630_v15 = vsub.f32 %v434_v47, %v434_v47 }
  0xa4   : > { %7327 = vst [vmem:[#allocation90_spill] sm:$0xff] %v4591_v45  ;;  %vm4608_vm15 = vmpackc.low %vm308_vm7, %vm304_vm6  ;;  %v4625_v45 = vsub.f32 %v436_v4, %v436_v4  ;;  %vm303_vm6 = vcmp.eq.s32.totalorder %v4056_v19, %v4068_v24  ;;  %vm307_vm7 = vcmp.eq.s32.totalorder %v4056_v19, %v4071_v25  ;;  %v7338_v47 = vmov 0 }
  0xa5   : > { %v7329_v23 = vsel %vm4608_vm15, 4294967295, %v7328_v23  ;;  %2853 = vmatprep.subr.msk.bf16.mxu0 %vm4608_vm15, %v7249_v10  ;;  %vm4619_vm14 = vmpackc.low %vm310_vm13, %vm306_vm12  ;;  %7334 = vst [vmem:[#allocation93_spill] sm:$0xff] %v4623_v29  ;;  %vm305_vm12 = vcmp.eq.s32.totalorder %v4060_v21, %v4068_v24  ;;  %vm309_vm13 = vcmp.eq.s32.totalorder %v4060_v21, %v4071_v25  ;;  %v431_v4 = vsel %vm303_vm6, 1.0, %v7270_v12 }
  0xa6   : > { %7330 = vst [vmem:[#allocation91_spill] sm:$0xff] %v7329_v23  ;;  %v7332_v58 = vsel %vm4619_vm14, 4294967295, %v7331_v58  ;;  %7335 = vst [vmem:[#allocation94_spill] sm:$0xff] %v4625_v45  ;;  %3237 = vmatprep.subr.msk.bf16.mxu1 %vm4619_vm14, %v7249_v10  ;;  %v4632_v23 = vsub.f32 %v438_v33, %v438_v33  ;;  %v435_v48 = vsel %vm307_vm7, 1.0, %v7270_v12  ;;  %v433_v33 = vsel %vm305_vm12, 1.0, %v7270_v12 }
  0xa7   : > { %7333 = vst [vmem:[#allocation92_spill] sm:$0xff] %v7332_v58  ;;  %7336 = vst [vmem:[#allocation95_spill] sm:$0xff] %v4630_v15  ;;  %v437_v58 = vsel %vm309_vm13, 1.0, %v7270_v12  ;;  %v4653_v24 = vsub.f32 %v431_v4, %v431_v4  ;;  %v7343_v25 = vmov 0  ;;  %v4661_v15 = vsub.f32 %v433_v33, %v433_v33 }
  0xa8   : > { %7337 = vst [vmem:[#allocation96_spill] sm:$0xff] %v4632_v23  ;;  %vm4644_vm14 = vmpackc.low %vm307_vm7, %vm303_vm6  ;;  %v4655_v23 = vsub.f32 %v435_v48, %v435_v48  ;;  %v4663_v45 = vsub.f32 %v437_v58, %v437_v58  ;;  %v215_v29 = vadd.s32 136, %v4016_v1  ;;  %vm312_vm6 = vcmp.eq.s32.totalorder %v4058_v20, %v4074_v26 }
  0xa9   : > { %v7339_v47 = vsel %vm4644_vm14, 4294967295, %v7338_v47  ;;  %2855 = vmatpush1.bf16.msk.msra.mxu0 %vm4644_vm14, %v7249_v10  ;;  %7341 = vst [vmem:[#allocation98_spill] sm:$0xff] %v4653_v24  ;;  %vm4657_vm15 = vmpackc.low %vm309_vm13, %vm305_vm12  ;;  %vm314_vm7 = vcmp.eq.s32.totalorder %v4062_v22, %v4074_v26  ;;  %v7348_v4 = vmov 0  ;;  %v7413_v18 = vmov 0 }
  0xaa   : > { %7340 = vst [vmem:[#allocation97_spill] sm:$0xff] %v7339_v47  ;;  %7342 = vst [vmem:[#allocation99_spill] sm:$0xff] %v4655_v23  ;;  %v7344_v25 = vsel %vm4657_vm15, 4294967295, %v7343_v25  ;;  %3239 = vmatpush1.bf16.msk.msra.mxu1 %vm4657_vm15, %v7249_v10  ;;  %vm316_vm13 = vcmp.eq.s32.totalorder %v4058_v20, %v215_v29  ;;  %vm318_vm15 = vcmp.eq.s32.totalorder %v4062_v22, %v215_v29  ;;  %v442_v47 = vsel %vm314_vm7, 1.0, %v7270_v12 }
  0xab   : > { %7345 = vst [vmem:[#allocation100_spill] sm:$0xff] %v7344_v25  ;;  %7346 = vst [vmem:[#allocation101_spill] sm:$0xff] %v4661_v15  ;;  %v440_v25 = vsel %vm312_vm6, 1.0, %v7270_v12  ;;  %v444_v17 = vsel %vm316_vm13, 1.0, %v7270_v12  ;;  %v446_v33 = vsel %vm318_vm15, 1.0, %v7270_v12  ;;  %v4694_v58 = vsub.f32 %v442_v47, %v442_v47 }
  0xac   : > { %7347 = vst [vmem:[#allocation102_spill] sm:$0xff] %v4663_v45  ;;  %vm4687_vm12 = vmpackc.low %vm316_vm13, %vm312_vm6  ;;  %v4691_v48 = vsub.f32 %v440_v25, %v440_v25  ;;  %v4699_v45 = vsub.f32 %v444_v17, %v444_v17  ;;  %v7354_v15 = vmov 0  ;;  %v4708_v23 = vsub.f32 %v446_v33, %v446_v33 }
  0xad   : > { %v7349_v4 = vsel %vm4687_vm12, 4294967295, %v7348_v4  ;;  %7352 = vst [vmem:[#allocation105_spill] sm:$0xff] %v4694_v58  ;;  %2857 = vmatprep.subr.msk.bf16.mxu0 %vm4687_vm12, %v7249_v10  ;;  %vm4704_vm14 = vmpackc.low %vm318_vm15, %vm314_vm7  ;;  %vm315_vm6 = vcmp.eq.s32.totalorder %v4056_v19, %v215_v29  ;;  %vm7358_vm13 = vcmp.eq.s32.totalorder %v4056_v19, %v4074_v26  ;;  %v7360_v25 = vmov 0 }
  0xae   : > { %7350 = vst [vmem:[#allocation103_spill] sm:$0xff] %v7349_v4  ;;  %7351 = vst [vmem:[#allocation104_spill] sm:$0xff] %v4691_v48  ;;  %v7355_v15 = vsel %vm4704_vm14, 4294967295, %v7354_v15  ;;  %v439_v47 = vsel %vm7358_vm13, 1.0, %v7270_v12  ;;  %3241 = vmatprep.subr.msk.bf16.mxu1 %vm4704_vm14, %v7249_v10  ;;  %v443_v17 = vsel %vm315_vm6, 1.0, %v7270_v12  ;;  %vm313_vm12 = vcmp.eq.s32.totalorder %v4060_v21, %v4074_v26 }
  0xaf   : > { %7353 = vst [vmem:[#allocation106_spill] sm:$0xff] %v4699_v45  ;;  %7356 = vst [vmem:[#allocation107_spill] sm:$0xff] %v7355_v15  ;;  %v4726_v33 = vsub.f32 %v439_v47, %v439_v47  ;;  %v4734_v15 = vsub.f32 %v443_v17, %v443_v17  ;;  %v441_v4 = vsel %vm313_vm12, 1.0, %v7270_v12  ;;  %v7365_v58 = vmov 0 }
  0xb0   : > { %7357 = vst [vmem:[#allocation108_spill] sm:$0xff] %v4708_v23  ;;  %vm7359_vm15 = vmmov %vm7358_vm13  ;;  %vm317_vm13 = vcmp.eq.s32.totalorder %v4060_v21, %v215_v29  ;;  %v216_v47 = vadd.s32 144, %v4016_v1  ;;  %v4747_v29 = vsub.f32 %v441_v4, %v441_v4  ;;  %v4824_v48 = vadd.s32 176, %v4016_v1 }
  0xb1   : > { %vm4722_vm7 = vmpackc.low %vm315_vm6, %vm7359_vm15  ;;  %7363 = vst [vmem:[#allocation110_spill] sm:$0xff] %v4726_v33  ;;  %v445_v23 = vsel %vm317_vm13, 1.0, %v7270_v12 }
  0xb2   : > { %v7361_v25 = vsel %vm4722_vm7, 4294967295, %v7360_v25  ;;  %2859 = vmatpush1.bf16.msk.msra.mxu0 %vm4722_vm7, %v7249_v10  ;;  %7364 = vst [vmem:[#allocation111_spill] sm:$0xff] %v4734_v15  ;;  %vm4738_vm6 = vmpackc.low %vm317_vm13, %vm313_vm12  ;;  %v4749_v17 = vsub.f32 %v445_v23, %v445_v23  ;;  %vm320_vm12 = vcmp.eq.s32.totalorder %v4058_v20, %v216_v47  ;;  %vm322_vm15 = vcmp.eq.s32.totalorder %v4062_v22, %v216_v47 }
  0xb3   : > { %7362 = vst [vmem:[#allocation109_spill] sm:$0xff] %v7361_v25  ;;  %v7366_v58 = vsel %vm4738_vm6, 4294967295, %v7365_v58  ;;  %3243 = vmatpush1.bf16.msk.msra.mxu1 %vm4738_vm6, %v7249_v10  ;;  %7368 = vst [vmem:[#allocation113_spill] sm:$0xff] %v4747_v29  ;;  %v217_v25 = vadd.s32 152, %v4016_v1  ;;  %v448_v4 = vsel %vm320_vm12, 1.0, %v7270_v12  ;;  %v450_v15 = vsel %vm322_vm15, 1.0, %v7270_v12 }
  0xb4   : > { %7367 = vst [vmem:[#allocation112_spill] sm:$0xff] %v7366_v58  ;;  %7369 = vst [vmem:[#allocation114_spill] sm:$0xff] %v4749_v17  ;;  %v7370_v58 = vmov 0  ;;  %v4765_v45 = vsub.f32 %v448_v4, %v448_v4  ;;  %v7375_v17 = vmov 0  ;;  %v4779_v29 = vsub.f32 %v450_v15, %v450_v15 }
  0xb5   : > { %vm324_vm6 = vcmp.eq.s32.totalorder %v4058_v20, %v217_v25  ;;  %vm326_vm14 = vcmp.eq.s32.totalorder %v4062_v22, %v217_v25 }
  0xb6   : > { %v452_v23 = vsel %vm324_vm6, 1.0, %v7270_v12  ;;  %vm4761_vm7 = vmpackc.low %vm324_vm6, %vm320_vm12  ;;  %7373 = vst [vmem:[#allocation116_spill] sm:$0xff] %v4765_v45  ;;  %v454_v26 = vsel %vm326_vm14, 1.0, %v7270_v12  ;;  %vm323_vm6 = vcmp.eq.s32.totalorder %v4056_v19, %v217_v25  ;;  %vm7380_vm12 = vcmp.eq.s32.totalorder %v4056_v19, %v216_v47 }
  0xb7   : > { %v7371_v58 = vsel %vm4761_vm7, 4294967295, %v7370_v58  ;;  %2861 = vmatprep.subr.msk.bf16.mxu0 %vm4761_vm7, %v7249_v10  ;;  %v4772_v33 = vsub.f32 %v452_v23, %v452_v23  ;;  %vm4775_vm13 = vmpackc.low %vm326_vm14, %vm322_vm15  ;;  %7378 = vst [vmem:[#allocation119_spill] sm:$0xff] %v4779_v29  ;;  %v4785_v4 = vsub.f32 %v454_v26, %v454_v26  ;;  %v447_v23 = vsel %vm7380_vm12, 1.0, %v7270_v12 }
  0xb8   : > { %7372 = vst [vmem:[#allocation115_spill] sm:$0xff] %v7371_v58  ;;  %v7376_v17 = vsel %vm4775_vm13, 4294967295, %v7375_v17  ;;  %3245 = vmatprep.subr.msk.bf16.mxu1 %vm4775_vm13, %v7249_v10  ;;  %v451_v58 = vsel %vm323_vm6, 1.0, %v7270_v12  ;;  %vm7381_vm14 = vmmov %vm7380_vm12  ;;  %vm321_vm7 = vcmp.eq.s32.totalorder %v4060_v21, %v216_v47  ;;  %v4801_v15 = vsub.f32 %v447_v23, %v447_v23 }
  0xb9   : > { %7374 = vst [vmem:[#allocation117_spill] sm:$0xff] %v4772_v33  ;;  %7377 = vst [vmem:[#allocation118_spill] sm:$0xff] %v7376_v17  ;;  %v7382_v33 = vmov 0  ;;  %v4803_v26 = vsub.f32 %v451_v58, %v451_v58  ;;  %vm325_vm12 = vcmp.eq.s32.totalorder %v4060_v21, %v217_v25  ;;  %v449_v17 = vsel %vm321_vm7, 1.0, %v7270_v12 }
  0xba   : > { %7379 = vst [vmem:[#allocation120_spill] sm:$0xff] %v4785_v4  ;;  %vm4793_vm15 = vmpackc.low %vm323_vm6, %vm7381_vm14  ;;  %v453_v4 = vsel %vm325_vm12, 1.0, %v7270_v12  ;;  %v7387_v29 = vmov 0  ;;  %v4812_v45 = vsub.f32 %v449_v17, %v449_v17  ;;  %v218_v47 = vadd.s32 160, %v4016_v1 }
  0xbb   : > { %v7383_v33 = vsel %vm4793_vm15, 4294967295, %v7382_v33  ;;  %2863 = vmatpush1.bf16.msk.msra.mxu0 %vm4793_vm15, %v7249_v10  ;;  %7385 = vst [vmem:[#allocation122_spill] sm:$0xff] %v4801_v15  ;;  %7386 = vst [vmem:[#allocation123_spill] sm:$0xff] %v4803_v26  ;;  %v4821_v25 = vsub.f32 %v453_v4, %v453_v4  ;;  %v7392_v4 = vmov 0  ;;  %v7397_v26 = vmov 0 }
  0xbc   : > { %7384 = vst [vmem:[#allocation121_spill] sm:$0xff] %v7383_v33  ;;  %vm4808_vm6 = vmpackc.low %vm325_vm12, %vm321_vm7  ;;  %v219_v33 = vadd.s32 168, %v4016_v1  ;;  %vm328_vm7 = vcmp.eq.s32.totalorder %v4058_v20, %v218_v47  ;;  %vm330_vm12 = vcmp.eq.s32.totalorder %v4062_v22, %v218_v47 }
  0xbd   : > { %v7388_v29 = vsel %vm4808_vm6, 4294967295, %v7387_v29  ;;  %7390 = vst [vmem:[#allocation125_spill] sm:$0xff] %v4812_v45  ;;  %3247 = vmatpush1.bf16.msk.msra.mxu1 %vm4808_vm6, %v7249_v10  ;;  %7391 = vst [vmem:[#allocation126_spill] sm:$0xff] %v4821_v25  ;;  %v456_v58 = vsel %vm328_vm7, 1.0, %v7270_v12  ;;  %v458_v23 = vsel %vm330_vm12, 1.0, %v7270_v12 }
  0xbe   : > { %7389 = vst [vmem:[#allocation124_spill] sm:$0xff] %v7388_v29  ;;  %vm332_vm14 = vcmp.eq.s32.totalorder %v4058_v20, %v219_v33  ;;  %vm334_vm15 = vcmp.eq.s32.totalorder %v4062_v22, %v219_v33  ;;  %v4841_v17 = vsub.f32 %v456_v58, %v456_v58  ;;  %v4854_v15 = vsub.f32 %v458_v23, %v458_v23 }
  0xbf   : > { %v460_v29 = vsel %vm332_vm14, 1.0, %v7270_v12  ;;  %vm4833_vm6 = vmpackc.low %vm332_vm14, %vm328_vm7  ;;  %v462_v25 = vsel %vm334_vm15, 1.0, %v7270_v12  ;;  %vm327_vm7 = vcmp.eq.s32.totalorder %v4056_v19, %v218_v47  ;;  %vm331_vm14 = vcmp.eq.s32.totalorder %v4056_v19, %v219_v33 }
  0xc0   : > { %v7393_v4 = vsel %vm4833_vm6, 4294967295, %v7392_v4  ;;  %2865 = vmatprep.subr.msk.bf16.mxu0 %vm4833_vm6, %v7249_v10  ;;  %7395 = vst [vmem:[#allocation128_spill] sm:$0xff] %v4841_v17  ;;  %v4843_v45 = vsub.f32 %v460_v29, %v460_v29  ;;  %vm4847_vm13 = vmpackc.low %vm334_vm15, %vm330_vm12  ;;  %v455_v29 = vsel %vm327_vm7, 1.0, %v7270_v12  ;;  %v459_v58 = vsel %vm331_vm14, 1.0, %v7270_v12 }
  0xc1   : > { %7394 = vst [vmem:[#allocation127_spill] sm:$0xff] %v7393_v4  ;;  %v7398_v26 = vsel %vm4847_vm13, 4294967295, %v7397_v26  ;;  %3249 = vmatprep.subr.msk.bf16.mxu1 %vm4847_vm13, %v7249_v10  ;;  %7400 = vst [vmem:[#allocation131_spill] sm:$0xff] %v4854_v15  ;;  %v4856_v4 = vsub.f32 %v462_v25, %v462_v25  ;;  %vm329_vm12 = vcmp.eq.s32.totalorder %v4060_v21, %v218_v47  ;;  %v7407_v15 = vmov 0 }
  0xc2   : > { %7396 = vst [vmem:[#allocation129_spill] sm:$0xff] %v4843_v45  ;;  %7399 = vst [vmem:[#allocation130_spill] sm:$0xff] %v7398_v26  ;;  %v7402_v45 = vmov 0  ;;  %vm333_vm13 = vcmp.eq.s32.totalorder %v4060_v21, %v219_v33  ;;  %v4871_v23 = vsub.f32 %v455_v29, %v455_v29  ;;  %v4873_v25 = vsub.f32 %v459_v58, %v459_v58 }
  0xc3   : > { %7401 = vst [vmem:[#allocation132_spill] sm:$0xff] %v4856_v4  ;;  %vm4862_vm15 = vmpackc.low %vm331_vm14, %vm327_vm7  ;;  %v457_v26 = vsel %vm329_vm12, 1.0, %v7270_v12  ;;  %v461_v4 = vsel %vm333_vm13, 1.0, %v7270_v12  ;;  %v221_v29 = vadd.s32 184, %v4016_v1  ;;  %vm336_vm14 = vcmp.eq.s32.totalorder %v4058_v20, %v4824_v48 }
  0xc4   : > { %v7403_v45 = vsel %vm4862_vm15, 4294967295, %v7402_v45  ;;  %2867 = vmatpush1.bf16.msk.msra.mxu0 %vm4862_vm15, %v7249_v10  ;;  %7405 = vst [vmem:[#allocation134_spill] sm:$0xff] %v4871_v23  ;;  %7406 = vst [vmem:[#allocation135_spill] sm:$0xff] %v4873_v25  ;;  %v4884_v33 = vsub.f32 %v457_v26, %v457_v26  ;;  %v4886_v47 = vsub.f32 %v461_v4, %v461_v4  ;;  %v464_v17 = vsel %vm336_vm14, 1.0, %v7270_v12 }
  0xc5   : > { %7404 = vst [vmem:[#allocation133_spill] sm:$0xff] %v7403_v45  ;;  %vm4877_vm7 = vmpackc.low %vm333_vm13, %vm329_vm12  ;;  %vm338_vm13 = vcmp.eq.s32.totalorder %v4062_v22, %v4824_v48  ;;  %vm340_vm12 = vcmp.eq.s32.totalorder %v4058_v20, %v221_v29  ;;  %v4899_v4 = vsub.f32 %v464_v17, %v464_v17  ;;  %vm342_vm15 = vcmp.eq.s32.totalorder %v4062_v22, %v221_v29 }
  0xc6   : > { %v7408_v15 = vsel %vm4877_vm7, 4294967295, %v7407_v15  ;;  %3251 = vmatpush1.bf16.msk.msra.mxu1 %vm4877_vm7, %v7249_v10  ;;  %7410 = vst [vmem:[#allocation137_spill] sm:$0xff] %v4884_v33  ;;  %7411 = vst [vmem:[#allocation138_spill] sm:$0xff] %v4886_v47  ;;  %v468_v24 = vsel %vm340_vm12, 1.0, %v7270_v12  ;;  %v466_v45 = vsel %vm338_vm13, 1.0, %v7270_v12  ;;  %vm335_vm6 = vcmp.eq.s32.totalorder %v4056_v19, %v4824_v48 }
  0xc7   : > { %7409 = vst [vmem:[#allocation136_spill] sm:$0xff] %v7408_v15  ;;  %7412 = vst [vmem:[#allocation139_spill] sm:$0xff] %v4899_v4  ;;  %v4913_v26 = vsub.f32 %v468_v24, %v468_v24  ;;  %v470_v17 = vsel %vm342_vm15, 1.0, %v7270_v12  ;;  %v7417_v15 = vmov 0  ;;  %v4920_v58 = vsub.f32 %v466_v45, %v466_v45 }
  0xc8   : > { %vm4902_vm7 = vmpackc.low %vm340_vm12, %vm336_vm14  ;;  %vm339_vm14 = vcmp.eq.s32.totalorder %v4056_v19, %v221_v29  ;;  %v4926_v4 = vsub.f32 %v470_v17, %v470_v17  ;;  %v4962_v33 = vadd.s32 208, %v4016_v1  ;;  %v7453_v23 = vmov 0 }
  0xc9   : > { %v7414_v18 = vsel %vm4902_vm7, 4294967295, %v7413_v18  ;;  %2869 = vmatprep.subr.msk.bf16.mxu0 %vm4902_vm7, %v7249_v10  ;;  %7416 = vst [vmem:[#allocation141_spill] sm:$0xff] %v4913_v26  ;;  %vm4916_vm3 = vmpackc.low %vm342_vm15, %vm338_vm13  ;;  %v467_v24 = vsel %vm339_vm14, 1.0, %v7270_v12  ;;  %v7422_v26 = vmov 0  ;;  %vm337_vm15 = vcmp.eq.s32.totalorder %v4060_v21, %v4824_v48 }
  0xca   : > { %7415 = vst [vmem:[#allocation140_spill] sm:$0xff] %v7414_v18  ;;  %v7418_v15 = vsel %vm4916_vm3, 4294967295, %v7417_v15  ;;  %7420 = vst [vmem:[#allocation143_spill] sm:$0xff] %v4920_v58  ;;  %3253 = vmatprep.subr.msk.bf16.mxu1 %vm4916_vm3, %v7249_v10  ;;  %v463_v18 = vsel %vm335_vm6, 1.0, %v7270_v12  ;;  %vm341_vm13 = vcmp.eq.s32.totalorder %v4060_v21, %v221_v29  ;;  %v465_v17 = vsel %vm337_vm15, 1.0, %v7270_v12 }
  0xcb   : > { %7419 = vst [vmem:[#allocation142_spill] sm:$0xff] %v7418_v15  ;;  %7421 = vst [vmem:[#allocation144_spill] sm:$0xff] %v4926_v4  ;;  %v4939_v45 = vsub.f32 %v463_v18, %v463_v18  ;;  %v4941_v15 = vsub.f32 %v467_v24, %v467_v24  ;;  %v469_v4 = vsel %vm341_vm13, 1.0, %v7270_v12  ;;  %v7427_v58 = vmov 0 }
  0xcc   : > { %vm4930_vm12 = vmpackc.low %vm339_vm14, %vm335_vm6  ;;  %v4950_v47 = vsub.f32 %v465_v17, %v465_v17  ;;  %v222_v48 = vadd.s32 192, %v4016_v1  ;;  %v4959_v29 = vsub.f32 %v469_v4, %v469_v4  ;;  %v7432_v4 = vmov 0 }
  0xcd   : > { %v7423_v26 = vsel %vm4930_vm12, 4294967295, %v7422_v26  ;;  %2871 = vmatpush1.bf16.msk.msra.mxu0 %vm4930_vm12, %v7249_v10  ;;  %7425 = vst [vmem:[#allocation146_spill] sm:$0xff] %v4939_v45  ;;  %7426 = vst [vmem:[#allocation147_spill] sm:$0xff] %v4941_v15  ;;  %v7437_v15 = vmov 0 }
  0xce   : > { %7424 = vst [vmem:[#allocation145_spill] sm:$0xff] %v7423_v26  ;;  %vm4946_vm6 = vmpackc.low %vm341_vm13, %vm337_vm15  ;;  %v223_v26 = vadd.s32 200, %v4016_v1  ;;  %vm344_vm14 = vcmp.eq.s32.totalorder %v4058_v20, %v222_v48  ;;  %vm346_vm13 = vcmp.eq.s32.totalorder %v4062_v22, %v222_v48 }
  0xcf   : > { %v7428_v58 = vsel %vm4946_vm6, 4294967295, %v7427_v58  ;;  %7430 = vst [vmem:[#allocation149_spill] sm:$0xff] %v4950_v47  ;;  %3255 = vmatpush1.bf16.msk.msra.mxu1 %vm4946_vm6, %v7249_v10  ;;  %7431 = vst [vmem:[#allocation150_spill] sm:$0xff] %v4959_v29  ;;  %v472_v24 = vsel %vm344_vm14, 1.0, %v7270_v12  ;;  %v474_v18 = vsel %vm346_vm13, 1.0, %v7270_v12 }
  0xd0   : > { %7429 = vst [vmem:[#allocation148_spill] sm:$0xff] %v7428_v58  ;;  %vm348_vm15 = vcmp.eq.s32.totalorder %v4058_v20, %v223_v26  ;;  %vm350_vm12 = vcmp.eq.s32.totalorder %v4062_v22, %v223_v26  ;;  %v4979_v17 = vsub.f32 %v472_v24, %v472_v24  ;;  %v4992_v45 = vsub.f32 %v474_v18, %v474_v18 }
  0xd1   : > { %v476_v58 = vsel %vm348_vm15, 1.0, %v7270_v12  ;;  %vm4971_vm6 = vmpackc.low %vm348_vm15, %vm344_vm14  ;;  %v478_v29 = vsel %vm350_vm12, 1.0, %v7270_v12  ;;  %vm343_vm14 = vcmp.eq.s32.totalorder %v4056_v19, %v222_v48  ;;  %vm347_vm15 = vcmp.eq.s32.totalorder %v4056_v19, %v223_v26 }
  0xd2   : > { %v7433_v4 = vsel %vm4971_vm6, 4294967295, %v7432_v4  ;;  %2873 = vmatprep.subr.msk.bf16.mxu0 %vm4971_vm6, %v7249_v10  ;;  %7435 = vst [vmem:[#allocation152_spill] sm:$0xff] %v4979_v17  ;;  %v4981_v47 = vsub.f32 %v476_v58, %v476_v58  ;;  %vm4985_vm3 = vmpackc.low %vm350_vm12, %vm346_vm13  ;;  %v471_v58 = vsel %vm343_vm14, 1.0, %v7270_v12  ;;  %v475_v24 = vsel %vm347_vm15, 1.0, %v7270_v12 }
  0xd3   : > { %7434 = vst [vmem:[#allocation151_spill] sm:$0xff] %v7433_v4  ;;  %v7438_v15 = vsel %vm4985_vm3, 4294967295, %v7437_v15  ;;  %3257 = vmatprep.subr.msk.bf16.mxu1 %vm4985_vm3, %v7249_v10  ;;  %7440 = vst [vmem:[#allocation155_spill] sm:$0xff] %v4992_v45  ;;  %v4994_v4 = vsub.f32 %v478_v29, %v478_v29  ;;  %vm345_vm13 = vcmp.eq.s32.totalorder %v4060_v21, %v222_v48  ;;  %v7447_v45 = vmov 0 }
  0xd4   : > { %7436 = vst [vmem:[#allocation153_spill] sm:$0xff] %v4981_v47  ;;  %7439 = vst [vmem:[#allocation154_spill] sm:$0xff] %v7438_v15  ;;  %v7442_v47 = vmov 0  ;;  %vm349_vm3 = vcmp.eq.s32.totalorder %v4060_v21, %v223_v26  ;;  %v5009_v18 = vsub.f32 %v471_v58, %v471_v58  ;;  %v5011_v29 = vsub.f32 %v475_v24, %v475_v24 }
  0xd5   : > { %7441 = vst [vmem:[#allocation156_spill] sm:$0xff] %v4994_v4  ;;  %vm5000_vm12 = vmpackc.low %vm347_vm15, %vm343_vm14  ;;  %v473_v15 = vsel %vm345_vm13, 1.0, %v7270_v12  ;;  %v477_v4 = vsel %vm349_vm3, 1.0, %v7270_v12  ;;  %v225_v58 = vadd.s32 216, %v4016_v1  ;;  %vm352_vm15 = vcmp.eq.s32.totalorder %v4058_v20, %v4962_v33 }
  0xd6   : > { %v7443_v47 = vsel %vm5000_vm12, 4294967295, %v7442_v47  ;;  %2875 = vmatpush1.bf16.msk.msra.mxu0 %vm5000_vm12, %v7249_v10  ;;  %7445 = vst [vmem:[#allocation158_spill] sm:$0xff] %v5009_v18  ;;  %7446 = vst [vmem:[#allocation159_spill] sm:$0xff] %v5011_v29  ;;  %v5022_v26 = vsub.f32 %v473_v15, %v473_v15  ;;  %v5024_v48 = vsub.f32 %v477_v4, %v477_v4  ;;  %v480_v17 = vsel %vm352_vm15, 1.0, %v7270_v12 }
  0xd7   : > { %7444 = vst [vmem:[#allocation157_spill] sm:$0xff] %v7443_v47  ;;  %vm5015_vm14 = vmpackc.low %vm349_vm3, %vm345_vm13  ;;  %vm354_vm3 = vcmp.eq.s32.totalorder %v4062_v22, %v4962_v33  ;;  %vm356_vm13 = vcmp.eq.s32.totalorder %v4058_v20, %v225_v58  ;;  %v5037_v4 = vsub.f32 %v480_v17, %v480_v17  ;;  %vm358_vm12 = vcmp.eq.s32.totalorder %v4062_v22, %v225_v58 }
  0xd8   : > { %v7448_v45 = vsel %vm5015_vm14, 4294967295, %v7447_v45  ;;  %3259 = vmatpush1.bf16.msk.msra.mxu1 %vm5015_vm14, %v7249_v10  ;;  %7450 = vst [vmem:[#allocation161_spill] sm:$0xff] %v5022_v26  ;;  %7451 = vst [vmem:[#allocation162_spill] sm:$0xff] %v5024_v48  ;;  %v484_v25 = vsel %vm356_vm13, 1.0, %v7270_v12  ;;  %v482_v47 = vsel %vm354_vm3, 1.0, %v7270_v12  ;;  %vm351_vm6 = vcmp.eq.s32.totalorder %v4056_v19, %v4962_v33 }
  0xd9   : > { %7449 = vst [vmem:[#allocation160_spill] sm:$0xff] %v7448_v45  ;;  %7452 = vst [vmem:[#allocation163_spill] sm:$0xff] %v5037_v4  ;;  %v5051_v15 = vsub.f32 %v484_v25, %v484_v25  ;;  %v486_v17 = vsel %vm358_vm12, 1.0, %v7270_v12  ;;  %v7457_v45 = vmov 0  ;;  %v5058_v24 = vsub.f32 %v482_v47, %v482_v47 }
  0xda   : > { %vm5040_vm14 = vmpackc.low %vm356_vm13, %vm352_vm15  ;;  %vm355_vm15 = vcmp.eq.s32.totalorder %v4056_v19, %v225_v58  ;;  %v5064_v4 = vsub.f32 %v486_v17, %v486_v17  ;;  %v5100_v26 = vadd.s32 240, %v4016_v1  ;;  %v7493_v29 = vmov 0 }
  0xdb   : > { %v7454_v23 = vsel %vm5040_vm14, 4294967295, %v7453_v23  ;;  %2877 = vmatprep.subr.msk.bf16.mxu0 %vm5040_vm14, %v7249_v10  ;;  %7456 = vst [vmem:[#allocation165_spill] sm:$0xff] %v5051_v15  ;;  %vm5054_vm7 = vmpackc.low %vm358_vm12, %vm354_vm3  ;;  %v483_v25 = vsel %vm355_vm15, 1.0, %v7270_v12  ;;  %v7462_v15 = vmov 0  ;;  %vm353_vm12 = vcmp.eq.s32.totalorder %v4060_v21, %v4962_v33 }
  0xdc   : > { %7455 = vst [vmem:[#allocation164_spill] sm:$0xff] %v7454_v23  ;;  %v7458_v45 = vsel %vm5054_vm7, 4294967295, %v7457_v45  ;;  %7460 = vst [vmem:[#allocation167_spill] sm:$0xff] %v5058_v24  ;;  %3261 = vmatprep.subr.msk.bf16.mxu1 %vm5054_vm7, %v7249_v10  ;;  %v479_v23 = vsel %vm351_vm6, 1.0, %v7270_v12  ;;  %vm357_vm3 = vcmp.eq.s32.totalorder %v4060_v21, %v225_v58  ;;  %v481_v17 = vsel %vm353_vm12, 1.0, %v7270_v12 }
  0xdd   : > { %7459 = vst [vmem:[#allocation166_spill] sm:$0xff] %v7458_v45  ;;  %7461 = vst [vmem:[#allocation168_spill] sm:$0xff] %v5064_v4  ;;  %v5077_v47 = vsub.f32 %v479_v23, %v479_v23  ;;  %v5079_v45 = vsub.f32 %v483_v25, %v483_v25  ;;  %v485_v4 = vsel %vm357_vm3, 1.0, %v7270_v12  ;;  %v7467_v24 = vmov 0 }
  0xde   : > { %vm5068_vm13 = vmpackc.low %vm355_vm15, %vm351_vm6  ;;  %v5088_v48 = vsub.f32 %v481_v17, %v481_v17  ;;  %v226_v33 = vadd.s32 224, %v4016_v1  ;;  %v5097_v58 = vsub.f32 %v485_v4, %v485_v4  ;;  %v7472_v4 = vmov 0 }
  0xdf   : > { %v7463_v15 = vsel %vm5068_vm13, 4294967295, %v7462_v15  ;;  %2879 = vmatpush1.bf16.msk.msra.mxu0 %vm5068_vm13, %v7249_v10  ;;  %7465 = vst [vmem:[#allocation170_spill] sm:$0xff] %v5077_v47  ;;  %7466 = vst [vmem:[#allocation171_spill] sm:$0xff] %v5079_v45  ;;  %v7477_v45 = vmov 0 }
  0xe0   : > { %7464 = vst [vmem:[#allocation169_spill] sm:$0xff] %v7463_v15  ;;  %vm5084_vm6 = vmpackc.low %vm357_vm3, %vm353_vm12  ;;  %v227_v15 = vadd.s32 232, %v4016_v1  ;;  %vm360_vm15 = vcmp.eq.s32.totalorder %v4058_v20, %v226_v33  ;;  %vm362_vm3 = vcmp.eq.s32.totalorder %v4062_v22, %v226_v33 }
  0xe1   : > { %v7468_v24 = vsel %vm5084_vm6, 4294967295, %v7467_v24  ;;  %7470 = vst [vmem:[#allocation173_spill] sm:$0xff] %v5088_v48  ;;  %3263 = vmatpush1.bf16.msk.msra.mxu1 %vm5084_vm6, %v7249_v10  ;;  %7471 = vst [vmem:[#allocation174_spill] sm:$0xff] %v5097_v58  ;;  %v488_v25 = vsel %vm360_vm15, 1.0, %v7270_v12  ;;  %v490_v23 = vsel %vm362_vm3, 1.0, %v7270_v12 }
  0xe2   : > { %7469 = vst [vmem:[#allocation172_spill] sm:$0xff] %v7468_v24  ;;  %vm364_vm12 = vcmp.eq.s32.totalorder %v4058_v20, %v227_v15  ;;  %vm366_vm13 = vcmp.eq.s32.totalorder %v4062_v22, %v227_v15  ;;  %v5117_v17 = vsub.f32 %v488_v25, %v488_v25  ;;  %v5130_v47 = vsub.f32 %v490_v23, %v490_v23 }
  0xe3   : > { %v492_v24 = vsel %vm364_vm12, 1.0, %v7270_v12  ;;  %vm5109_vm6 = vmpackc.low %vm364_vm12, %vm360_vm15  ;;  %v494_v58 = vsel %vm366_vm13, 1.0, %v7270_v12  ;;  %vm359_vm15 = vcmp.eq.s32.totalorder %v4056_v19, %v226_v33  ;;  %vm363_vm12 = vcmp.eq.s32.totalorder %v4056_v19, %v227_v15 }
  0xe4   : > { %v7473_v4 = vsel %vm5109_vm6, 4294967295, %v7472_v4  ;;  %2881 = vmatprep.subr.msk.bf16.mxu0 %vm5109_vm6, %v7249_v10  ;;  %7475 = vst [vmem:[#allocation176_spill] sm:$0xff] %v5117_v17  ;;  %v5119_v48 = vsub.f32 %v492_v24, %v492_v24  ;;  %vm5123_vm7 = vmpackc.low %vm366_vm13, %vm362_vm3  ;;  %v487_v24 = vsel %vm359_vm15, 1.0, %v7270_v12  ;;  %v491_v25 = vsel %vm363_vm12, 1.0, %v7270_v12 }
  0xe5   : > { %7474 = vst [vmem:[#allocation175_spill] sm:$0xff] %v7473_v4  ;;  %v7478_v45 = vsel %vm5123_vm7, 4294967295, %v7477_v45  ;;  %3265 = vmatprep.subr.msk.bf16.mxu1 %vm5123_vm7, %v7249_v10  ;;  %7480 = vst [vmem:[#allocation179_spill] sm:$0xff] %v5130_v47  ;;  %v5132_v4 = vsub.f32 %v494_v58, %v494_v58  ;;  %vm361_vm3 = vcmp.eq.s32.totalorder %v4060_v21, %v226_v33  ;;  %v7487_v47 = vmov 0 }
  0xe6   : > { %7476 = vst [vmem:[#allocation177_spill] sm:$0xff] %v5119_v48  ;;  %7479 = vst [vmem:[#allocation178_spill] sm:$0xff] %v7478_v45  ;;  %v7482_v48 = vmov 0  ;;  %vm365_vm7 = vcmp.eq.s32.totalorder %v4060_v21, %v227_v15  ;;  %v5147_v23 = vsub.f32 %v487_v24, %v487_v24  ;;  %v5149_v58 = vsub.f32 %v491_v25, %v491_v25 }
  0xe7   : > { %7481 = vst [vmem:[#allocation180_spill] sm:$0xff] %v5132_v4  ;;  %vm5138_vm13 = vmpackc.low %vm363_vm12, %vm359_vm15  ;;  %v489_v45 = vsel %vm361_vm3, 1.0, %v7270_v12  ;;  %v493_v4 = vsel %vm365_vm7, 1.0, %v7270_v12  ;;  %v229_v24 = vadd.s32 248, %v4016_v1  ;;  %vm368_vm12 = vcmp.eq.s32.totalorder %v4058_v20, %v5100_v26 }
  0xe8   : > { %v7483_v48 = vsel %vm5138_vm13, 4294967295, %v7482_v48  ;;  %2883 = vmatpush1.bf16.msk.msra.mxu0 %vm5138_vm13, %v7249_v10  ;;  %7485 = vst [vmem:[#allocation182_spill] sm:$0xff] %v5147_v23  ;;  %7486 = vst [vmem:[#allocation183_spill] sm:$0xff] %v5149_v58  ;;  %v5160_v15 = vsub.f32 %v489_v45, %v489_v45  ;;  %v5162_v33 = vsub.f32 %v493_v4, %v493_v4  ;;  %v496_v17 = vsel %vm368_vm12, 1.0, %v7270_v12 }
  0xe9   : > { %7484 = vst [vmem:[#allocation181_spill] sm:$0xff] %v7483_v48  ;;  %vm5153_vm15 = vmpackc.low %vm365_vm7, %vm361_vm3  ;;  %vm370_vm7 = vcmp.eq.s32.totalorder %v4062_v22, %v5100_v26  ;;  %vm372_vm3 = vcmp.eq.s32.totalorder %v4058_v20, %v229_v24  ;;  %v5175_v4 = vsub.f32 %v496_v17, %v496_v17  ;;  %vm374_vm13 = vcmp.eq.s32.totalorder %v4062_v22, %v229_v24  ;;  %v504_v22 = vld [vmem:[#allocation2 + $0x8] sm:$0xff] }
  0xea   : > { %v7488_v47 = vsel %vm5153_vm15, 4294967295, %v7487_v47  ;;  %3267 = vmatpush1.bf16.msk.msra.mxu1 %vm5153_vm15, %v7249_v10  ;;  %7490 = vst [vmem:[#allocation185_spill] sm:$0xff] %v5160_v15  ;;  %7491 = vst [vmem:[#allocation186_spill] sm:$0xff] %v5162_v33  ;;  %v500_v1 = vsel %vm372_vm3, 1.0, %v7270_v12  ;;  %v498_v48 = vsel %vm370_vm7, 1.0, %v7270_v12  ;;  %vm367_vm6 = vcmp.eq.s32.totalorder %v4056_v19, %v5100_v26 }
  0xeb   : > { %7489 = vst [vmem:[#allocation184_spill] sm:$0xff] %v7488_v47  ;;  %7492 = vst [vmem:[#allocation187_spill] sm:$0xff] %v5175_v4  ;;  %v5189_v20 = vsub.f32 %v500_v1, %v500_v1  ;;  %v502_v17 = vsel %vm374_vm13, 1.0, %v7270_v12  ;;  %v7497_v45 = vmov 0  ;;  %v5196_v47 = vsub.f32 %v498_v48, %v498_v48 }
  0xec   : > { %vm5178_vm15 = vmpackc.low %vm372_vm3, %vm368_vm12  ;;  %vm371_vm12 = vcmp.eq.s32.totalorder %v4056_v19, %v229_v24  ;;  %v5202_v25 = vsub.f32 %v502_v17, %v502_v17  ;;  %v495_v1 = vsel %vm367_vm6, 1.0, %v7270_v12  ;;  %v7517_v4 = vand.u32 4294901760, %v4175_v60 }
  0xed   : > { %v7494_v29 = vsel %vm5178_vm15, 4294967295, %v7493_v29  ;;  %2885 = vmatprep.subr.msk.bf16.mxu0 %vm5178_vm15, %v7249_v10  ;;  %7496 = vst [vmem:[#allocation189_spill] sm:$0xff] %v5189_v20  ;;  %vm5192_vm14 = vmpackc.low %vm374_vm13, %vm370_vm7  ;;  %v7502_v20 = vmov 0  ;;  %vm369_vm13 = vcmp.eq.s32.totalorder %v4060_v21, %v5100_v26  ;;  %v5215_v19 = vsub.f32 %v495_v1, %v495_v1  ;;  %v503_v1 = vld [vmem:[#allocation2] sm:$0xff] }
  0xee   : > { %7495 = vst [vmem:[#allocation188_spill] sm:$0xff] %v7494_v29  ;;  %v7498_v45 = vsel %vm5192_vm14, 4294967295, %v7497_v45  ;;  %7500 = vst [vmem:[#allocation191_spill] sm:$0xff] %v5196_v47  ;;  %3269 = vmatprep.subr.msk.bf16.mxu1 %vm5192_vm14, %v7249_v10  ;;  %v499_v29 = vsel %vm371_vm12, 1.0, %v7270_v12  ;;  %vm373_vm7 = vcmp.eq.s32.totalorder %v4060_v21, %v229_v24  ;;  %v497_v17 = vsel %vm369_vm13, 1.0, %v7270_v12 }
  0xef   : > { %7499 = vst [vmem:[#allocation190_spill] sm:$0xff] %v7498_v45  ;;  %7501 = vst [vmem:[#allocation192_spill] sm:$0xff] %v5202_v25  ;;  %v5217_v48 = vsub.f32 %v499_v29, %v499_v29  ;;  %v501_v45 = vsel %vm373_vm7, 1.0, %v7270_v12  ;;  %v7507_v25 = vmov 0  ;;  %v5226_v47 = vsub.f32 %v497_v17, %v497_v17 }
  0xf0   : > { %vm5206_vm3 = vmpackc.low %vm371_vm12, %vm367_vm6  ;;  %7505 = vst [vmem:[#allocation194_spill] sm:$0xff] %v5215_v19  ;;  %v5228_v26 = vand.u32 4294901760, %v504_v22  ;;  %v5236_v21 = vsub.f32 %v501_v45, %v501_v45  ;;  %v6966_v12 = vand.u32 4294901760, %v4095_v35  ;;  %v6973_v29 = vand.u32 4294901760, %v4101_v37 }
  0xf1   : > { %v7503_v20 = vsel %vm5206_vm3, 4294967295, %v7502_v20  ;;  %2887 = vmatpush1.bf16.msk.msra.mxu0 %vm5206_vm3, %v7249_v10  ;;  %7506 = vst [vmem:[#allocation195_spill] sm:$0xff] %v5217_v48  ;;  %vm5222_vm6 = vmpackc.low %vm373_vm7, %vm369_vm13  ;;  %v7519_v48 = vand.u32 4294901760, %v4180_v61  ;;  %v6977_v60 = vand.u32 4294901760, %v4190_v63 }
  0xf2   : > { %7504 = vst [vmem:[#allocation193_spill] sm:$0xff] %v7503_v20  ;;  %v7508_v25 = vsel %vm5222_vm6, 4294967295, %v7507_v25  ;;  %7510 = vst [vmem:[#allocation197_spill] sm:$0xff] %v5226_v47  ;;  %v6959_v20 = vand.u32 4294901760, %v4093_v34  ;;  %3271 = vmatpush1.bf16.msk.msra.mxu1 %vm5222_vm6, %v7249_v10  ;;  %v5241_v17 = vsub.f32 %v504_v22, %v5228_v26  ;;  %v598_v45 = vsub.f32 %v4095_v35, %v6966_v12 }
  0xf3   : > { %7509 = vst [vmem:[#allocation196_spill] sm:$0xff] %v7508_v25  ;;  %7511 = vst [vmem:[#allocation198_spill] sm:$0xff] %v5228_v26  ;;  %v6974_v25 = vand.u32 4294901760, %v4103_v38  ;;  %v5252_v10 = vand.u32 4294901760, %v503_v1  ;;  %v608_v61 = vsub.f32 %v4190_v63, %v6977_v60 }
  0xf4   : > { %7512 = vst [vmem:[#allocation199_spill] sm:$0xff] %v5236_v21  ;;  %7513 = vst [vmem:[#allocation200_spill] sm:$0xff] %v5241_v17  ;;  %v588_v33 = vsub.f32 %v4093_v34, %v6959_v20  ;;  %v5255_v24 = vand.u32 4294901760, %v5241_v17  ;;  %v1488_v20 = vsub.f32 %v4101_v37, %v6973_v29  ;;  %v7516_v34 = vand.u32 4294901760, %v4170_v59 }
  0xf5   : > { %7514 = vst [vmem:[#allocation201_spill] sm:$0xff] %v5252_v10  ;;  %v599_v47 = vand.u32 4294901760, %v598_v45  ;;  %v1498_v12 = vsub.f32 %v4103_v38, %v6974_v25  ;;  %v5268_v35 = vsub.f32 %v503_v1, %v5252_v10  ;;  %v6981_v1 = vand.u32 4294901760, %v4194_v2 }
  0xf6   : > { %7515 = vst [vmem:[#allocation202_spill] sm:$0xff] %v5255_v24  ;;  %v589_v22 = vand.u32 4294901760, %v588_v33  ;;  %v2890_v21 = vpack.c.bf16 %v7517_v4, %v7516_v34  ;;  %v7520_v33 = vand.u32 4294901760, %v4185_v62  ;;  %v572_v29 = vsub.f32 %v5241_v17, %v5255_v24 }
  0xf7   : > { %7518 = vst [vmem:[#allocation203_spill] sm:$0xff] %v5268_v35  ;;  %v1489_v59 = vand.u32 4294901760, %v1488_v20  ;;  %v6978_v34 = vand.u32 4294901760, %v4192_v0  ;;  %v1499_v45 = vand.u32 4294901760, %v1498_v12  ;;  %v5279_v25 = vand.u32 4294901760, %v5268_v35 }
  0xf8   : > { %v3274_v19 = vpack.c.bf16 %v7520_v33, %v7519_v48  ;;  %v2888_v4 = vpack.c.bf16 %v599_v47, %v589_v22  ;;  %v573_v10 = vand.u32 4294901760, %v572_v29  ;;  %v6988_v20 = vand.u32 4294901760, %v4196_v3 }
  0xf9   : > { %7521 = vst [vmem:[#allocation204_spill] sm:$0xff] %v5279_v25  ;;  %v618_v62 = vsub.f32 %v4192_v0, %v6978_v34  ;;  %v3272_v48 = vpack.c.bf16 %v1499_v45, %v1489_v59  ;;  %v578_v47 = vsub.f32 %v5268_v35, %v5279_v25  ;;  %v1508_v12 = vsub.f32 %v4194_v2, %v6981_v1 }
  0xfa   : > { %2889 = vmatprep.subr.bf16.mxu0 %v2888_v4  ;;  %v7522_v29 = vand.u32 4294901760, %v4221_v7  ;;  %574 = vmatprep.mubr.f32.mxu0 %v573_v10  ;;  %v609_v33 = vand.u32 4294901760, %v608_v61  ;;  %v1518_v4 = vsub.f32 %v4196_v3, %v6988_v20  ;;  %v7523_v59 = vand.u32 4294901760, %v4223_v40 }
  0xfb   : > { %1474 = vmatprep.mubr.f32.mxu1 %v573_v10  ;;  %v619_v60 = vand.u32 4294901760, %v618_v62  ;;  %3273 = vmatprep.subr.bf16.mxu1 %v3272_v48  ;;  %v579_v34 = vand.u32 4294901760, %v578_v47  ;;  %v1509_v25 = vand.u32 4294901760, %v1508_v12  ;;  %v7524_v24 = vand.u32 4294901760, %v4229_v42 }
  0xfc   : > { %v613_v22 = vsub.f32 %v4221_v7, %v7522_v29  ;;  %v623_v45 = vsub.f32 %v4223_v40, %v7523_v59  ;;  %v1519_v10 = vand.u32 4294901760, %v1518_v4  ;;  %v7525_v62 = vand.u32 4294901760, %v4231_v43 }
  0xfd   : > { %v1513_v29 = vsub.f32 %v4229_v42, %v7524_v24  ;;  %v2892_v35 = vpack.c.bf16 %v619_v60, %v609_v33  ;;  %580 = vmatmul.mubr.f32.vlgmr.msra.gmra.mrb[0].mxu0 %v579_v34  ;;  %1480 = vmatmul.mubr.f32.vlgmr.msra.gmra.mrb[0].mxu1 %v579_v34  ;;  %v7000_v59 = vand.u32 4294901760, %v4263_v50  ;;  %v6991_v48 = vand.u32 4294901760, %v4265_v49 }
  0xfe   : > { %v614_v1 = vand.u32 4294901760, %v613_v22  ;;  %v624_v61 = vand.u32 4294901760, %v623_v45  ;;  %v1523_v17 = vsub.f32 %v4231_v43, %v7525_v62  ;;  %v6989_v47 = vand.u32 4294901760, %v4270_v57  ;;  %2891 = vmatpush1.bf16.msra.mxu0 %v2890_v21  ;;  %3275 = vmatpush1.bf16.msra.mxu1 %v3274_v19 }
  0xff   : > { %v1514_v20 = vand.u32 4294901760, %v1513_v29  ;;  %v3276_v12 = vpack.c.bf16 %v1519_v10, %v1509_v25  ;;  %v6990_v22 = vand.u32 4294901760, %v4272_v56  ;;  %2893 = vmatprep.subr.bf16.mxu0 %v2892_v35  ;;  %v628_v33 = vsub.f32 %v4263_v50, %v7000_v59  ;;  %907 = vmatprep.mubr.f32.mxu0 %v5228_v26 }
 0x100   : > { %v2894_v24 = vpack.c.bf16 %v624_v61, %v614_v1  ;;  %v1524_v60 = vand.u32 4294901760, %v1523_v17  ;;  %v638_v34 = vsub.f32 %v4265_v49, %v6991_v48  ;;  %v1528_v4 = vsub.f32 %v4270_v57, %v6989_v47  ;;  %1807 = vmatprep.mubr.f32.mxu1 %v5228_v26 }
 0x101   : > { %v7526_v19 = vand.u32 4294901760, %v4293_v9  ;;  %3277 = vmatprep.subr.bf16.mxu1 %v3276_v12  ;;  %v1538_v35 = vsub.f32 %v4272_v56, %v6990_v22  ;;  %v7527_v17 = vand.u32 4294901760, %v4295_v54  ;;  %v7528_v45 = vand.u32 4294901760, %v4301_v14 }
 0x102   : > { %v3278_v21 = vpack.c.bf16 %v1524_v60, %v1514_v20  ;;  %v629_v10 = vand.u32 4294901760, %v628_v33  ;;  %v639_v61 = vand.u32 4294901760, %v638_v34  ;;  %v1529_v62 = vand.u32 4294901760, %v1528_v4  ;;  %2895 = vmatpush1.bf16.msra.mxu0 %v2894_v24 }
 0x103   : > { %v633_v25 = vsub.f32 %v4293_v9, %v7526_v19  ;;  %v643_v1 = vsub.f32 %v4295_v54, %v7527_v17  ;;  %v1533_v29 = vsub.f32 %v4301_v14, %v7528_v45  ;;  %v1539_v20 = vand.u32 4294901760, %v1538_v35 }
 0x104   : > { %3279 = vmatpush1.bf16.msra.mxu1 %v3278_v21  ;;  %v7529_v19 = vand.u32 4294901760, %v4303_v6  ;;  %v2896_v22 = vpack.c.bf16 %v639_v61, %v629_v10  ;;  %v6999_v45 = vand.u32 4294901760, %v4335_v52  ;;  %v6993_v33 = vand.u32 4294901760, %v4337_v39 }
 0x105   : > { %v634_v47 = vand.u32 4294901760, %v633_v25  ;;  %v644_v12 = vand.u32 4294901760, %v643_v1  ;;  %v1534_v60 = vand.u32 4294901760, %v1533_v29  ;;  %v6992_v34 = vand.u32 4294901760, %v4342_v51 }
 0x106   : > { %v1543_v17 = vsub.f32 %v4303_v6, %v7529_v19  ;;  %v3280_v4 = vpack.c.bf16 %v1539_v20, %v1529_v62  ;;  %v6994_v24 = vand.u32 4294901760, %v4344_v5  ;;  %2897 = vmatprep.subr.bf16.mxu0 %v2896_v22  ;;  %v648_v21 = vsub.f32 %v4335_v52, %v6999_v45 }
 0x107   : > { %v2898_v25 = vpack.c.bf16 %v644_v12, %v634_v47  ;;  %v658_v35 = vsub.f32 %v4337_v39, %v6993_v33  ;;  %v1548_v1 = vsub.f32 %v4342_v51, %v6992_v34  ;;  %v7530_v29 = vand.u32 4294901760, %v4365_v11 }
 0x108   : > { %v1544_v48 = vand.u32 4294901760, %v1543_v17  ;;  %3281 = vmatprep.subr.bf16.mxu1 %v3280_v4  ;;  %v1558_v22 = vsub.f32 %v4344_v5, %v6994_v24  ;;  %v7531_v61 = vand.u32 4294901760, %v4367_v8  ;;  %v6997_v20 = vand.u32 4294901760, %v4407_v55 }
 0x109   : > { %v653_v47 = vsub.f32 %v4365_v11, %v7530_v29  ;;  %2899 = vmatpush1.bf16.msra.mxu0 %v2898_v25  ;;  %v649_v12 = vand.u32 4294901760, %v648_v21  ;;  %v659_v19 = vand.u32 4294901760, %v658_v35  ;;  %v1549_v17 = vand.u32 4294901760, %v1548_v1 }
 0x10a   : > { %v3282_v10 = vpack.c.bf16 %v1544_v48, %v1534_v60  ;;  %v663_v62 = vsub.f32 %v4367_v8, %v7531_v61  ;;  %v1559_v33 = vand.u32 4294901760, %v1558_v22  ;;  %v7532_v4 = vand.u32 4294901760, %v4373_v28  ;;  %v7598_v8 = vld [vmem:[#allocation132_spill] sm:$0xff] }
 0x10b   : > { %v654_v34 = vand.u32 4294901760, %v653_v47  ;;  %v7533_v60 = vand.u32 4294901760, %v4375_v31  ;;  %v2900_v24 = vpack.c.bf16 %v659_v19, %v649_v12  ;;  %v668_v61 = vsub.f32 %v4407_v55, %v6997_v20  ;;  %v7538_v20 = vld [vmem:[#allocation70_spill] sm:$0xff] }
 0x10c   : > { %3283 = vmatpush1.bf16.msra.mxu1 %v3282_v10  ;;  %v664_v29 = vand.u32 4294901760, %v663_v62  ;;  %v1553_v48 = vsub.f32 %v4373_v28, %v7532_v4  ;;  %v6996_v21 = vand.u32 4294901760, %v4409_v46  ;;  %v6995_v35 = vand.u32 4294901760, %v4414_v53 }
 0x10d   : > { %v1563_v25 = vsub.f32 %v4375_v31, %v7533_v60  ;;  %v3284_v1 = vpack.c.bf16 %v1559_v33, %v1549_v17  ;;  %2901 = vmatprep.subr.bf16.mxu0 %v2900_v24  ;;  %v669_v62 = vand.u32 4294901760, %v668_v61  ;;  %v6998_v19 = vand.u32 4294901760, %v4416_v27 }
 0x10e   : > { %v2902_v47 = vpack.c.bf16 %v664_v29, %v654_v34  ;;  %v1554_v10 = vand.u32 4294901760, %v1553_v48  ;;  %v678_v4 = vsub.f32 %v4409_v46, %v6996_v21  ;;  %v1568_v12 = vsub.f32 %v4414_v53, %v6995_v35 }
 0x10f   : > { %v1564_v22 = vand.u32 4294901760, %v1563_v25  ;;  %3285 = vmatprep.subr.bf16.mxu1 %v3284_v1  ;;  %v7534_v33 = vand.u32 4294901760, %v4437_v13  ;;  %v7535_v24 = vand.u32 4294901760, %v4439_v41  ;;  %v7005_v29 = vand.u32 4294901760, %v4479_v32 }
 0x110   : > { %2903 = vmatpush1.bf16.msra.mxu0 %v2902_v47  ;;  %v679_v48 = vand.u32 4294901760, %v678_v4  ;;  %v1569_v25 = vand.u32 4294901760, %v1568_v12  ;;  %v1578_v61 = vsub.f32 %v4416_v27, %v6998_v19  ;;  %v7536_v1 = vand.u32 4294901760, %v4445_v36 }
 0x111   : > { %v3286_v60 = vpack.c.bf16 %v1564_v22, %v1554_v10  ;;  %v673_v34 = vsub.f32 %v4437_v13, %v7534_v33  ;;  %v683_v17 = vsub.f32 %v4439_v41, %v7535_v24  ;;  %v7537_v33 = vand.u32 4294901760, %v4447_v30  ;;  %v7574_v41 = vld [vmem:[#allocation108_spill] sm:$0xff] }
 0x112   : > { %v1573_v47 = vsub.f32 %v4445_v36, %v7536_v1  ;;  %v688_v4 = vsub.f32 %v4479_v32, %v7005_v29  ;;  %v2904_v12 = vpack.c.bf16 %v679_v48, %v669_v62  ;;  %v1579_v24 = vand.u32 4294901760, %v1578_v61  ;;  %v7539_v1 = vld [vmem:[#allocation71_spill] sm:$0xff]  ;;  %v7550_v36 = vld [vmem:[#allocation84_spill] sm:$0xff] }
 0x113   : > { %3287 = vmatpush1.bf16.msra.mxu1 %v3286_v60  ;;  %v674_v10 = vand.u32 4294901760, %v673_v34  ;;  %v684_v22 = vand.u32 4294901760, %v683_v17  ;;  %v1583_v35 = vsub.f32 %v4447_v30, %v7537_v33  ;;  %v7007_v19 = vand.u32 4294901760, %v7538_v20  ;;  %v7540_v33 = vld [vmem:[#allocation72_spill] sm:$0xff] }
 0x114   : > { %v1574_v21 = vand.u32 4294901760, %v1573_v47  ;;  %v689_v26 = vand.u32 4294901760, %v688_v4  ;;  %v7006_v60 = vand.u32 4294901760, %v7539_v1  ;;  %2905 = vmatprep.subr.bf16.mxu0 %v2904_v12  ;;  %v3288_v34 = vpack.c.bf16 %v1579_v24, %v1569_v25  ;;  %v7543_v47 = vld [vmem:[#allocation77_spill] sm:$0xff] }
 0x115   : > { %v2906_v45 = vpack.c.bf16 %v684_v22, %v674_v10  ;;  %v1584_v59 = vand.u32 4294901760, %v1583_v35  ;;  %v698_v17 = vsub.f32 %v7538_v20, %v7007_v19  ;;  %v7014_v30 = vand.u32 4294901760, %v7540_v33 }
 0x116   : > { %v7541_v29 = vand.u32 4294901760, %v4509_v16  ;;  %v1588_v35 = vsub.f32 %v7539_v1, %v7006_v60  ;;  %v7542_v61 = vand.u32 4294901760, %v4511_v44  ;;  %v7544_v10 = vand.u32 4294901760, %v7543_v47  ;;  %3289 = vmatprep.subr.bf16.mxu1 %v3288_v34  ;;  %v7548_v34 = vld [vmem:[#allocation82_spill] sm:$0xff] }
 0x117   : > { %2907 = vmatpush1.bf16.msra.mxu0 %v2906_v45  ;;  %v3290_v48 = vpack.c.bf16 %v1584_v59, %v1574_v21  ;;  %v699_v4 = vand.u32 4294901760, %v698_v17  ;;  %v7545_v59 = vld [vmem:[#allocation78_spill] sm:$0xff]  ;;  %v7018_v17 = vand.u32 4294901760, %v7548_v34  ;;  %v7050_v13 = vand.u32 4294901760, %v7574_v41 }
 0x118   : > { %v693_v62 = vsub.f32 %v4509_v16, %v7541_v29  ;;  %v703_v25 = vsub.f32 %v4511_v44, %v7542_v61  ;;  %v1593_v22 = vsub.f32 %v7543_v47, %v7544_v10  ;;  %v1598_v29 = vsub.f32 %v7540_v33, %v7014_v30  ;;  %v7547_v61 = vld [vmem:[#allocation81_spill] sm:$0xff]  ;;  %v7549_v30 = vld [vmem:[#allocation83_spill] sm:$0xff] }
 0x119   : > { %v7546_v21 = vand.u32 4294901760, %v7545_v59  ;;  %3291 = vmatpush1.bf16.msra.mxu1 %v3290_v48  ;;  %v1589_v24 = vand.u32 4294901760, %v1588_v35  ;;  %v7019_v44 = vand.u32 4294901760, %v7547_v61  ;;  %v2908_v16 = vpack.c.bf16 %v699_v4, %v689_v26 }
 0x11a   : > { %v694_v45 = vand.u32 4294901760, %v693_v62  ;;  %v704_v60 = vand.u32 4294901760, %v703_v25  ;;  %v1594_v19 = vand.u32 4294901760, %v1593_v22  ;;  %v1599_v1 = vand.u32 4294901760, %v1598_v29  ;;  %v7551_v25 = vld [vmem:[#allocation86_spill] sm:$0xff] }
 0x11b   : > { %v1603_v12 = vsub.f32 %v7545_v59, %v7546_v21  ;;  %v708_v62 = vsub.f32 %v7547_v61, %v7019_v44  ;;  %v7020_v33 = vand.u32 4294901760, %v7549_v30  ;;  %v7023_v21 = vand.u32 4294901760, %v7550_v36  ;;  %2909 = vmatprep.subr.bf16.mxu0 %v2908_v16 }
 0x11c   : > { %v2910_v47 = vpack.c.bf16 %v704_v60, %v694_v45  ;;  %v3292_v48 = vpack.c.bf16 %v1599_v1, %v1589_v24  ;;  %v718_v26 = vsub.f32 %v7548_v34, %v7018_v17  ;;  %v7552_v22 = vand.u32 4294901760, %v7551_v25  ;;  %v7553_v1 = vld [vmem:[#allocation87_spill] sm:$0xff] }
 0x11d   : > { %v1604_v10 = vand.u32 4294901760, %v1603_v12  ;;  %v709_v60 = vand.u32 4294901760, %v708_v62  ;;  %v1608_v29 = vsub.f32 %v7549_v30, %v7020_v33  ;;  %v1618_v16 = vsub.f32 %v7550_v36, %v7023_v21  ;;  %v7557_v62 = vld [vmem:[#allocation90_spill] sm:$0xff]  ;;  %v7559_v21 = vld [vmem:[#allocation93_spill] sm:$0xff] }
 0x11e   : > { %v713_v4 = vsub.f32 %v7551_v25, %v7552_v22  ;;  %2911 = vmatpush1.bf16.msra.mxu0 %v2910_v47  ;;  %3293 = vmatprep.subr.bf16.mxu1 %v3292_v48  ;;  %v719_v12 = vand.u32 4294901760, %v718_v26  ;;  %v7558_v22 = vand.u32 4294901760, %v7557_v62  ;;  %v7032_v36 = vand.u32 4294901760, %v7559_v21  ;;  %v7560_v48 = vld [vmem:[#allocation94_spill] sm:$0xff] }
 0x11f   : > { %v3294_v35 = vpack.c.bf16 %v1604_v10, %v1594_v19  ;;  %v7554_v19 = vand.u32 4294901760, %v7553_v1  ;;  %v7555_v10 = vld [vmem:[#allocation89_spill] sm:$0xff]  ;;  %v1609_v33 = vand.u32 4294901760, %v1608_v29  ;;  %v1619_v25 = vand.u32 4294901760, %v1618_v16  ;;  %v7562_v16 = vld [vmem:[#allocation96_spill] sm:$0xff] }
 0x120   : > { %v714_v24 = vand.u32 4294901760, %v713_v4  ;;  %v7556_v17 = vand.u32 4294901760, %v7555_v10  ;;  %v1623_v44 = vsub.f32 %v7557_v62, %v7558_v22  ;;  %v2912_v59 = vpack.c.bf16 %v719_v12, %v709_v60  ;;  %v7571_v62 = vld [vmem:[#allocation104_spill] sm:$0xff] }
 0x121   : > { %v723_v45 = vsub.f32 %v7553_v1, %v7554_v19  ;;  %3295 = vmatpush1.bf16.msra.mxu1 %v3294_v35  ;;  %v7030_v26 = vand.u32 4294901760, %v7560_v48  ;;  %v3296_v4 = vpack.c.bf16 %v1619_v25, %v1609_v33  ;;  %v7039_v60 = vand.u32 4294901760, %v7562_v16  ;;  %v7565_v25 = vld [vmem:[#allocation99_spill] sm:$0xff] }
 0x122   : > { %v1613_v47 = vsub.f32 %v7555_v10, %v7556_v17  ;;  %v1624_v19 = vand.u32 4294901760, %v1623_v44  ;;  %v728_v17 = vsub.f32 %v7559_v21, %v7032_v36  ;;  %v7561_v10 = vld [vmem:[#allocation95_spill] sm:$0xff]  ;;  %2913 = vmatprep.subr.bf16.mxu0 %v2912_v59  ;;  %v7566_v59 = vand.u32 4294901760, %v7565_v25 }
 0x123   : > { %v724_v30 = vand.u32 4294901760, %v723_v45  ;;  %v7031_v61 = vand.u32 4294901760, %v7561_v10  ;;  %v738_v29 = vsub.f32 %v7560_v48, %v7030_v26  ;;  %v7563_v45 = vld [vmem:[#allocation98_spill] sm:$0xff]  ;;  %3297 = vmatprep.subr.bf16.mxu1 %v3296_v4  ;;  %v1638_v4 = vsub.f32 %v7562_v16, %v7039_v60 }
 0x124   : > { %v1614_v34 = vand.u32 4294901760, %v1613_v47  ;;  %v7564_v44 = vand.u32 4294901760, %v7563_v45  ;;  %v7082_v11 = vand.u32 4294901760, %v7598_v8 }
 0x125   : > { %v2914_v1 = vpack.c.bf16 %v724_v30, %v714_v24  ;;  %v729_v30 = vand.u32 4294901760, %v728_v17  ;;  %v1628_v33 = vsub.f32 %v7561_v10, %v7031_v61  ;;  %v7567_v24 = vld [vmem:[#allocation101_spill] sm:$0xff]  ;;  %v7569_v17 = vld [vmem:[#allocation102_spill] sm:$0xff]  ;;  %v1639_v20 = vand.u32 4294901760, %v1638_v4 }
 0x126   : > { %v3298_v35 = vpack.c.bf16 %v1624_v19, %v1614_v34  ;;  %v733_v12 = vsub.f32 %v7563_v45, %v7564_v44  ;;  %v743_v34 = vsub.f32 %v7565_v25, %v7566_v59  ;;  %v7568_v47 = vand.u32 4294901760, %v7567_v24 }
 0x127   : > { %2915 = vmatpush1.bf16.msra.mxu0 %v2914_v1  ;;  %v739_v19 = vand.u32 4294901760, %v738_v29  ;;  %v7570_v44 = vand.u32 4294901760, %v7569_v17  ;;  %v1629_v61 = vand.u32 4294901760, %v1628_v33  ;;  %v7046_v59 = vand.u32 4294901760, %v7571_v62 }
 0x128   : > { %v1633_v22 = vsub.f32 %v7567_v24, %v7568_v47  ;;  %3299 = vmatpush1.bf16.msra.mxu1 %v3298_v35  ;;  %v734_v1 = vand.u32 4294901760, %v733_v12  ;;  %v744_v36 = vand.u32 4294901760, %v743_v34  ;;  %v7572_v47 = vld [vmem:[#allocation106_spill] sm:$0xff]  ;;  %v7573_v12 = vld [vmem:[#allocation105_spill] sm:$0xff] }
 0x129   : > { %v1643_v26 = vsub.f32 %v7569_v17, %v7570_v44  ;;  %v2916_v25 = vpack.c.bf16 %v739_v19, %v729_v30  ;;  %v7045_v35 = vand.u32 4294901760, %v7572_v47  ;;  %v748_v60 = vsub.f32 %v7571_v62, %v7046_v59  ;;  %v7579_v44 = vld [vmem:[#allocation113_spill] sm:$0xff] }
 0x12a   : > { %v1634_v45 = vand.u32 4294901760, %v1633_v22  ;;  %v2918_v29 = vpack.c.bf16 %v744_v36, %v734_v1  ;;  %v7047_v24 = vand.u32 4294901760, %v7573_v12  ;;  %v3300_v33 = vpack.c.bf16 %v1639_v20, %v1629_v61  ;;  %v7575_v22 = vld [vmem:[#allocation110_spill] sm:$0xff]  ;;  %v7577_v20 = vld [vmem:[#allocation111_spill] sm:$0xff] }
 0x12b   : > { %v1644_v32 = vand.u32 4294901760, %v1643_v26  ;;  %2917 = vmatprep.subr.bf16.mxu0 %v2916_v25  ;;  %v758_v30 = vsub.f32 %v7572_v47, %v7045_v35  ;;  %v7576_v26 = vand.u32 4294901760, %v7575_v22  ;;  %v749_v36 = vand.u32 4294901760, %v748_v60  ;;  %v7581_v60 = vld [vmem:[#allocation114_spill] sm:$0xff] }
 0x12c   : > { %2919 = vmatpush1.bf16.msra.mxu0 %v2918_v29  ;;  %v1648_v4 = vsub.f32 %v7573_v12, %v7047_v24  ;;  %v1658_v25 = vsub.f32 %v7574_v41, %v7050_v13  ;;  %3301 = vmatprep.subr.bf16.mxu1 %v3300_v33  ;;  %v7580_v35 = vand.u32 4294901760, %v7579_v44  ;;  %v7583_v13 = vld [vmem:[#allocation116_spill] sm:$0xff]  ;;  %v7584_v33 = vld [vmem:[#allocation117_spill] sm:$0xff] }
 0x12d   : > { %v3302_v34 = vpack.c.bf16 %v1644_v32, %v1634_v45  ;;  %v753_v19 = vsub.f32 %v7575_v22, %v7576_v26  ;;  %v7578_v32 = vand.u32 4294901760, %v7577_v20  ;;  %v759_v45 = vand.u32 4294901760, %v758_v30 }
 0x12e   : > { %v1653_v29 = vsub.f32 %v7579_v44, %v7580_v35  ;;  %v7582_v26 = vand.u32 4294901760, %v7581_v60  ;;  %v1649_v24 = vand.u32 4294901760, %v1648_v4  ;;  %v1659_v22 = vand.u32 4294901760, %v1658_v25  ;;  %v7585_v44 = vld [vmem:[#allocation119_spill] sm:$0xff]  ;;  %v7586_v25 = vld [vmem:[#allocation120_spill] sm:$0xff] }
 0x12f   : > { %v763_v61 = vsub.f32 %v7577_v20, %v7578_v32  ;;  %v754_v1 = vand.u32 4294901760, %v753_v19  ;;  %3303 = vmatpush1.bf16.msra.mxu1 %v3302_v34  ;;  %v7063_v27 = vand.u32 4294901760, %v7583_v13  ;;  %v2920_v53 = vpack.c.bf16 %v759_v45, %v749_v36 }
 0x130   : > { %v1663_v59 = vsub.f32 %v7581_v60, %v7582_v26  ;;  %v1654_v31 = vand.u32 4294901760, %v1653_v29  ;;  %v7061_v30 = vand.u32 4294901760, %v7584_v33  ;;  %v3304_v19 = vpack.c.bf16 %v1659_v22, %v1649_v24  ;;  %v7589_v22 = vld [vmem:[#allocation123_spill] sm:$0xff]  ;;  %v7595_v60 = vld [vmem:[#allocation128_spill] sm:$0xff] }
 0x131   : > { %v764_v17 = vand.u32 4294901760, %v763_v61  ;;  %v768_v35 = vsub.f32 %v7583_v13, %v7063_v27  ;;  %v7062_v28 = vand.u32 4294901760, %v7585_v44  ;;  %2921 = vmatprep.subr.bf16.mxu0 %v2920_v53  ;;  %v7071_v36 = vand.u32 4294901760, %v7586_v25  ;;  %v7587_v61 = vld [vmem:[#allocation122_spill] sm:$0xff] }
 0x132   : > { %v1664_v32 = vand.u32 4294901760, %v1663_v59  ;;  %v778_v4 = vsub.f32 %v7584_v33, %v7061_v30  ;;  %v7588_v59 = vand.u32 4294901760, %v7587_v61  ;;  %3305 = vmatprep.subr.bf16.mxu1 %v3304_v19  ;;  %v7590_v53 = vand.u32 4294901760, %v7589_v22 }
 0x133   : > { %v2922_v20 = vpack.c.bf16 %v764_v17, %v754_v1  ;;  %v769_v24 = vand.u32 4294901760, %v768_v35  ;;  %v1668_v17 = vsub.f32 %v7585_v44, %v7062_v28  ;;  %v7591_v1 = vld [vmem:[#allocation125_spill] sm:$0xff]  ;;  %v1678_v19 = vsub.f32 %v7586_v25, %v7071_v36  ;;  %v7593_v35 = vld [vmem:[#allocation126_spill] sm:$0xff] }
 0x134   : > { %v3306_v34 = vpack.c.bf16 %v1664_v32, %v1654_v31  ;;  %v773_v45 = vsub.f32 %v7587_v61, %v7588_v59  ;;  %v783_v31 = vsub.f32 %v7589_v22, %v7590_v53  ;;  %v7592_v29 = vand.u32 4294901760, %v7591_v1 }
 0x135   : > { %2923 = vmatpush1.bf16.msra.mxu0 %v2922_v20  ;;  %v779_v32 = vand.u32 4294901760, %v778_v4  ;;  %v7594_v59 = vand.u32 4294901760, %v7593_v35  ;;  %v1669_v28 = vand.u32 4294901760, %v1668_v17  ;;  %v7078_v53 = vand.u32 4294901760, %v7595_v60 }
 0x136   : > { %v1673_v26 = vsub.f32 %v7591_v1, %v7592_v29  ;;  %3307 = vmatpush1.bf16.msra.mxu1 %v3306_v34  ;;  %v774_v20 = vand.u32 4294901760, %v773_v45  ;;  %v784_v27 = vand.u32 4294901760, %v783_v31  ;;  %v1679_v46 = vand.u32 4294901760, %v1678_v19  ;;  %v7596_v29 = vld [vmem:[#allocation129_spill] sm:$0xff]  ;;  %v7597_v45 = vld [vmem:[#allocation131_spill] sm:$0xff] }
 0x137   : > { %v1683_v30 = vsub.f32 %v7593_v35, %v7594_v59  ;;  %v2924_v22 = vpack.c.bf16 %v779_v32, %v769_v24  ;;  %v7077_v34 = vand.u32 4294901760, %v7596_v29  ;;  %v788_v36 = vsub.f32 %v7595_v60, %v7078_v53  ;;  %v7603_v59 = vld [vmem:[#allocation137_spill] sm:$0xff] }
 0x138   : > { %v1674_v61 = vand.u32 4294901760, %v1673_v26  ;;  %v2926_v4 = vpack.c.bf16 %v784_v27, %v774_v20  ;;  %v7079_v1 = vand.u32 4294901760, %v7597_v45  ;;  %v3308_v17 = vpack.c.bf16 %v1679_v46, %v1669_v28  ;;  %v7599_v26 = vld [vmem:[#allocation134_spill] sm:$0xff]  ;;  %v7601_v46 = vld [vmem:[#allocation135_spill] sm:$0xff] }
 0x139   : > { %v1684_v55 = vand.u32 4294901760, %v1683_v30  ;;  %2925 = vmatprep.subr.bf16.mxu0 %v2924_v22  ;;  %v798_v24 = vsub.f32 %v7596_v29, %v7077_v34  ;;  %v7600_v30 = vand.u32 4294901760, %v7599_v26  ;;  %v789_v27 = vand.u32 4294901760, %v788_v36  ;;  %v7605_v36 = vld [vmem:[#allocation138_spill] sm:$0xff] }
 0x13a   : > { %2927 = vmatpush1.bf16.msra.mxu0 %v2926_v4  ;;  %v1688_v19 = vsub.f32 %v7597_v45, %v7079_v1  ;;  %v1698_v22 = vsub.f32 %v7598_v8, %v7082_v11  ;;  %v7602_v28 = vand.u32 4294901760, %v7601_v46  ;;  %3309 = vmatprep.subr.bf16.mxu1 %v3308_v17  ;;  %v7604_v34 = vand.u32 4294901760, %v7603_v59  ;;  %v7607_v11 = vld [vmem:[#allocation139_spill] sm:$0xff]  ;;  %v7608_v17 = vld [vmem:[#allocation141_spill] sm:$0xff] }
 0x13b   : > { %v3310_v31 = vpack.c.bf16 %v1684_v55, %v1674_v61  ;;  %v793_v32 = vsub.f32 %v7599_v26, %v7600_v30  ;;  %v799_v61 = vand.u32 4294901760, %v798_v24  ;;  %v7606_v30 = vand.u32 4294901760, %v7605_v36 }
 0x13c   : > { %v803_v55 = vsub.f32 %v7601_v46, %v7602_v28  ;;  %v1693_v4 = vsub.f32 %v7603_v59, %v7604_v34  ;;  %v1689_v1 = vand.u32 4294901760, %v1688_v19  ;;  %v1699_v26 = vand.u32 4294901760, %v1698_v22  ;;  %v7609_v59 = vld [vmem:[#allocation143_spill] sm:$0xff]  ;;  %v7610_v22 = vld [vmem:[#allocation144_spill] sm:$0xff] }
 0x13d   : > { %v794_v20 = vand.u32 4294901760, %v793_v32  ;;  %v1703_v53 = vsub.f32 %v7605_v36, %v7606_v30  ;;  %3311 = vmatpush1.bf16.msra.mxu1 %v3310_v31  ;;  %v7095_v5 = vand.u32 4294901760, %v7607_v11  ;;  %v2928_v51 = vpack.c.bf16 %v799_v61, %v789_v27  ;;  %v7619_v36 = vld [vmem:[#allocation152_spill] sm:$0xff] }
 0x13e   : > { %v804_v35 = vand.u32 4294901760, %v803_v55  ;;  %v1694_v6 = vand.u32 4294901760, %v1693_v4  ;;  %v7093_v24 = vand.u32 4294901760, %v7608_v17  ;;  %v3312_v32 = vpack.c.bf16 %v1699_v26, %v1689_v1  ;;  %v7611_v55 = vld [vmem:[#allocation146_spill] sm:$0xff]  ;;  %v7613_v26 = vld [vmem:[#allocation147_spill] sm:$0xff] }
 0x13f   : > { %v1704_v28 = vand.u32 4294901760, %v1703_v53  ;;  %v808_v34 = vsub.f32 %v7607_v11, %v7095_v5  ;;  %v7094_v14 = vand.u32 4294901760, %v7609_v59  ;;  %2929 = vmatprep.subr.bf16.mxu0 %v2928_v51  ;;  %v7101_v27 = vand.u32 4294901760, %v7610_v22 }
 0x140   : > { %v2930_v46 = vpack.c.bf16 %v804_v35, %v794_v20  ;;  %v818_v19 = vsub.f32 %v7608_v17, %v7093_v24  ;;  %v7612_v53 = vand.u32 4294901760, %v7611_v55  ;;  %3313 = vmatprep.subr.bf16.mxu1 %v3312_v32  ;;  %v7614_v51 = vand.u32 4294901760, %v7613_v26  ;;  %v7615_v20 = vld [vmem:[#allocation149_spill] sm:$0xff] }
 0x141   : > { %v3314_v31 = vpack.c.bf16 %v1704_v28, %v1694_v6  ;;  %v809_v1 = vand.u32 4294901760, %v808_v34  ;;  %v1708_v35 = vsub.f32 %v7609_v59, %v7094_v14  ;;  %v7616_v4 = vand.u32 4294901760, %v7615_v20  ;;  %v7617_v34 = vld [vmem:[#allocation150_spill] sm:$0xff] }
 0x142   : > { %v813_v61 = vsub.f32 %v7611_v55, %v7612_v53  ;;  %2931 = vmatpush1.bf16.msra.mxu0 %v2930_v46  ;;  %v823_v6 = vsub.f32 %v7613_v26, %v7614_v51  ;;  %v819_v28 = vand.u32 4294901760, %v818_v19  ;;  %v1718_v32 = vsub.f32 %v7610_v22, %v7101_v27  ;;  %v7622_v22 = vld [vmem:[#allocation156_spill] sm:$0xff] }
 0x143   : > { %v1713_v30 = vsub.f32 %v7615_v20, %v7616_v4  ;;  %3315 = vmatpush1.bf16.msra.mxu1 %v3314_v31  ;;  %v7618_v53 = vand.u32 4294901760, %v7617_v34  ;;  %v1709_v14 = vand.u32 4294901760, %v1708_v35  ;;  %v7107_v51 = vand.u32 4294901760, %v7619_v36  ;;  %v7620_v4 = vld [vmem:[#allocation153_spill] sm:$0xff] }
 0x144   : > { %v814_v46 = vand.u32 4294901760, %v813_v61  ;;  %v824_v5 = vand.u32 4294901760, %v823_v6  ;;  %v2932_v26 = vpack.c.bf16 %v819_v28, %v809_v1  ;;  %v1719_v59 = vand.u32 4294901760, %v1718_v32  ;;  %v7621_v61 = vld [vmem:[#allocation155_spill] sm:$0xff] }
 0x145   : > { %v1723_v24 = vsub.f32 %v7617_v34, %v7618_v53  ;;  %v1714_v55 = vand.u32 4294901760, %v1713_v30  ;;  %v7105_v31 = vand.u32 4294901760, %v7620_v4  ;;  %v828_v27 = vsub.f32 %v7619_v36, %v7107_v51 }
 0x146   : > { %v2934_v19 = vpack.c.bf16 %v824_v5, %v814_v46  ;;  %v7106_v20 = vand.u32 4294901760, %v7621_v61  ;;  %v7110_v11 = vand.u32 4294901760, %v7622_v22  ;;  %2933 = vmatprep.subr.bf16.mxu0 %v2932_v26  ;;  %v3316_v35 = vpack.c.bf16 %v1719_v59, %v1709_v14  ;;  %v7624_v14 = vld [vmem:[#allocation159_spill] sm:$0xff]  ;;  %v7626_v46 = vld [vmem:[#allocation161_spill] sm:$0xff] }
 0x147   : > { %v1724_v17 = vand.u32 4294901760, %v1723_v24  ;;  %v838_v1 = vsub.f32 %v7620_v4, %v7105_v31  ;;  %v7623_v24 = vand.u32 4294901760, %v5009_v18  ;;  %v829_v5 = vand.u32 4294901760, %v828_v27  ;;  %v7628_v27 = vld [vmem:[#allocation162_spill] sm:$0xff] }
 0x148   : > { %2935 = vmatpush1.bf16.msra.mxu0 %v2934_v19  ;;  %v1728_v28 = vsub.f32 %v7621_v61, %v7106_v20  ;;  %v1738_v26 = vsub.f32 %v7622_v22, %v7110_v11  ;;  %v7625_v59 = vand.u32 4294901760, %v7624_v14  ;;  %3317 = vmatprep.subr.bf16.mxu1 %v3316_v35  ;;  %v7627_v53 = vand.u32 4294901760, %v7626_v46  ;;  %v7630_v11 = vld [vmem:[#allocation163_spill] sm:$0xff]  ;;  %v7631_v35 = vld [vmem:[#allocation165_spill] sm:$0xff] }
 0x149   : > { %v3318_v6 = vpack.c.bf16 %v1724_v17, %v1714_v55  ;;  %v833_v30 = vsub.f32 %v5009_v18, %v7623_v24  ;;  %v839_v55 = vand.u32 4294901760, %v838_v1  ;;  %v7629_v24 = vand.u32 4294901760, %v7628_v27 }
 0x14a   : > { %v843_v17 = vsub.f32 %v7624_v14, %v7625_v59  ;;  %v1733_v19 = vsub.f32 %v7626_v46, %v7627_v53  ;;  %v1729_v20 = vand.u32 4294901760, %v1728_v28  ;;  %v1739_v51 = vand.u32 4294901760, %v1738_v26  ;;  %v7632_v46 = vld [vmem:[#allocation167_spill] sm:$0xff]  ;;  %v7633_v26 = vld [vmem:[#allocation168_spill] sm:$0xff] }
 0x14b   : > { %v834_v32 = vand.u32 4294901760, %v833_v30  ;;  %v1743_v31 = vsub.f32 %v7628_v27, %v7629_v24  ;;  %3319 = vmatpush1.bf16.msra.mxu1 %v3318_v6  ;;  %v7119_v34 = vand.u32 4294901760, %v7630_v11  ;;  %v2936_v22 = vpack.c.bf16 %v839_v55, %v829_v5  ;;  %v7642_v27 = vld [vmem:[#allocation176_spill] sm:$0xff] }
 0x14c   : > { %v844_v18 = vand.u32 4294901760, %v843_v17  ;;  %v1734_v61 = vand.u32 4294901760, %v1733_v19  ;;  %v7117_v1 = vand.u32 4294901760, %v7631_v35  ;;  %v3320_v30 = vpack.c.bf16 %v1739_v51, %v1729_v20  ;;  %v7634_v17 = vld [vmem:[#allocation170_spill] sm:$0xff]  ;;  %v7636_v51 = vld [vmem:[#allocation171_spill] sm:$0xff] }
 0x14d   : > { %v1744_v59 = vand.u32 4294901760, %v1743_v31  ;;  %v848_v53 = vsub.f32 %v7630_v11, %v7119_v34  ;;  %v7118_v4 = vand.u32 4294901760, %v7632_v46  ;;  %2937 = vmatprep.subr.bf16.mxu0 %v2936_v22  ;;  %v7125_v5 = vand.u32 4294901760, %v7633_v26 }
 0x14e   : > { %v2938_v14 = vpack.c.bf16 %v844_v18, %v834_v32  ;;  %v858_v28 = vsub.f32 %v7631_v35, %v7117_v1  ;;  %v7635_v31 = vand.u32 4294901760, %v7634_v17  ;;  %3321 = vmatprep.subr.bf16.mxu1 %v3320_v30  ;;  %v7637_v22 = vand.u32 4294901760, %v7636_v51  ;;  %v7638_v32 = vld [vmem:[#allocation173_spill] sm:$0xff] }
 0x14f   : > { %v3322_v6 = vpack.c.bf16 %v1744_v59, %v1734_v61  ;;  %v849_v18 = vand.u32 4294901760, %v848_v53  ;;  %v1748_v20 = vsub.f32 %v7632_v46, %v7118_v4  ;;  %v7639_v19 = vand.u32 4294901760, %v7638_v32  ;;  %v7640_v53 = vld [vmem:[#allocation174_spill] sm:$0xff] }
 0x150   : > { %v853_v55 = vsub.f32 %v7634_v17, %v7635_v31  ;;  %2939 = vmatpush1.bf16.msra.mxu0 %v2938_v14  ;;  %v863_v61 = vsub.f32 %v7636_v51, %v7637_v22  ;;  %v859_v59 = vand.u32 4294901760, %v858_v28  ;;  %v1758_v30 = vsub.f32 %v7633_v26, %v7125_v5  ;;  %v7645_v26 = vld [vmem:[#allocation180_spill] sm:$0xff] }
 0x151   : > { %v1753_v24 = vsub.f32 %v7638_v32, %v7639_v19  ;;  %3323 = vmatpush1.bf16.msra.mxu1 %v3322_v6  ;;  %v7641_v31 = vand.u32 4294901760, %v7640_v53  ;;  %v1749_v4 = vand.u32 4294901760, %v1748_v20  ;;  %v7132_v22 = vand.u32 4294901760, %v7642_v27  ;;  %v7643_v19 = vld [vmem:[#allocation177_spill] sm:$0xff] }
 0x152   : > { %v854_v14 = vand.u32 4294901760, %v853_v55  ;;  %v864_v34 = vand.u32 4294901760, %v863_v61  ;;  %v2940_v51 = vpack.c.bf16 %v859_v59, %v849_v18  ;;  %v1759_v46 = vand.u32 4294901760, %v1758_v30  ;;  %v7644_v55 = vld [vmem:[#allocation179_spill] sm:$0xff] }
 0x153   : > { %v1763_v1 = vsub.f32 %v7640_v53, %v7641_v31  ;;  %v1754_v17 = vand.u32 4294901760, %v1753_v24  ;;  %v7130_v6 = vand.u32 4294901760, %v7643_v19  ;;  %v868_v5 = vsub.f32 %v7642_v27, %v7132_v22 }
 0x154   : > { %v2942_v28 = vpack.c.bf16 %v864_v34, %v854_v14  ;;  %v7129_v32 = vand.u32 4294901760, %v7644_v55  ;;  %v7131_v11 = vand.u32 4294901760, %v7645_v26  ;;  %2941 = vmatprep.subr.bf16.mxu0 %v2940_v51  ;;  %v3324_v20 = vpack.c.bf16 %v1759_v46, %v1749_v4 }
 0x155   : > { %v1764_v35 = vand.u32 4294901760, %v1763_v1  ;;  %v878_v18 = vsub.f32 %v7643_v19, %v7130_v6  ;;  %v7646_v1 = vand.u32 4294901760, %v5147_v23  ;;  %v869_v34 = vand.u32 4294901760, %v868_v5  ;;  %v7649_v5 = vld [vmem:[#allocation186_spill] sm:$0xff] }
 0x156   : > { %2943 = vmatpush1.bf16.msra.mxu0 %v2942_v28  ;;  %v1768_v59 = vsub.f32 %v7644_v55, %v7129_v32  ;;  %v1778_v51 = vsub.f32 %v7645_v26, %v7131_v11  ;;  %v7647_v4 = vand.u32 4294901760, %v5149_v58  ;;  %3325 = vmatprep.subr.bf16.mxu1 %v3324_v20  ;;  %v7648_v30 = vand.u32 4294901760, %v5160_v15  ;;  %v7651_v11 = vld [vmem:[#allocation187_spill] sm:$0xff]  ;;  %v7652_v20 = vld [vmem:[#allocation189_spill] sm:$0xff] }
 0x157   : > { %v3326_v61 = vpack.c.bf16 %v1764_v35, %v1754_v17  ;;  %v873_v24 = vsub.f32 %v5147_v23, %v7646_v1  ;;  %v879_v35 = vand.u32 4294901760, %v878_v18  ;;  %v7650_v31 = vand.u32 4294901760, %v7649_v5 }
 0x158   : > { %v883_v46 = vsub.f32 %v5149_v58, %v7647_v4  ;;  %v1773_v14 = vsub.f32 %v5160_v15, %v7648_v30  ;;  %v1769_v1 = vand.u32 4294901760, %v1768_v59  ;;  %v1779_v32 = vand.u32 4294901760, %v1778_v51  ;;  %v7653_v15 = vld [vmem:[#allocation191_spill] sm:$0xff]  ;;  %v7654_v51 = vld [vmem:[#allocation192_spill] sm:$0xff] }
 0x159   : > { %v874_v17 = vand.u32 4294901760, %v873_v24  ;;  %v1783_v28 = vsub.f32 %v7649_v5, %v7650_v31  ;;  %3327 = vmatpush1.bf16.msra.mxu1 %v3326_v61  ;;  %v7143_v22 = vand.u32 4294901760, %v7651_v11  ;;  %v2944_v23 = vpack.c.bf16 %v879_v35, %v869_v34  ;;  %v7659_v31 = vld [vmem:[#allocation197_spill] sm:$0xff] }
 0x15a   : > { %v884_v6 = vand.u32 4294901760, %v883_v46  ;;  %v1774_v53 = vand.u32 4294901760, %v1773_v14  ;;  %v7141_v18 = vand.u32 4294901760, %v7652_v20  ;;  %v3328_v24 = vpack.c.bf16 %v1779_v32, %v1769_v1  ;;  %v7655_v46 = vld [vmem:[#allocation194_spill] sm:$0xff] }
 0x15b   : > { %v1784_v4 = vand.u32 4294901760, %v1783_v28  ;;  %v888_v30 = vsub.f32 %v7651_v11, %v7143_v22  ;;  %v7142_v26 = vand.u32 4294901760, %v7653_v15  ;;  %2945 = vmatprep.subr.bf16.mxu0 %v2944_v23  ;;  %v7150_v34 = vand.u32 4294901760, %v7654_v51 }
 0x15c   : > { %v2946_v58 = vpack.c.bf16 %v884_v6, %v874_v17  ;;  %v898_v59 = vsub.f32 %v7652_v20, %v7141_v18  ;;  %v7656_v35 = vand.u32 4294901760, %v7655_v46  ;;  %3329 = vmatprep.subr.bf16.mxu1 %v3328_v24  ;;  %v7657_v17 = vld [vmem:[#allocation195_spill] sm:$0xff]  ;;  %v7660_v28 = vand.u32 4294901760, %v7659_v31  ;;  %v7664_v20 = vld [vmem:[#allocation13_spill] sm:$0xff] }
 0x15d   : > { %v3330_v61 = vpack.c.bf16 %v1784_v4, %v1774_v53  ;;  %v889_v32 = vand.u32 4294901760, %v888_v30  ;;  %v1788_v6 = vsub.f32 %v7653_v15, %v7142_v26  ;;  %v7658_v23 = vand.u32 4294901760, %v7657_v17  ;;  %v7661_v30 = vld [vmem:[#allocation199_spill] sm:$0xff]  ;;  %v7663_v15 = vld [vmem:[#allocation12_spill] sm:$0xff] }
 0x15e   : > { %v893_v14 = vsub.f32 %v7655_v46, %v7656_v35  ;;  %2947 = vmatpush1.bf16.msra.mxu0 %v2946_v58  ;;  %v1793_v1 = vsub.f32 %v7659_v31, %v7660_v28  ;;  %v899_v4 = vand.u32 4294901760, %v898_v59  ;;  %v1798_v24 = vsub.f32 %v7654_v51, %v7150_v34  ;;  %v7665_v34 = vld [vmem:[#allocation16_spill] sm:$0xff]  ;;  %v7666_v51 = vld [vmem:[#allocation17_spill] sm:$0xff] }
 0x15f   : > { %v903_v53 = vsub.f32 %v7657_v17, %v7658_v23  ;;  %3331 = vmatpush1.bf16.msra.mxu1 %v3330_v61  ;;  %v7662_v35 = vand.u32 4294901760, %v7661_v30  ;;  %v1789_v26 = vand.u32 4294901760, %v1788_v6  ;;  %v2952_v28 = vpack.c.bf16 %v7664_v20, %v7663_v15  ;;  %v7668_v6 = vld [vmem:[#allocation20_spill] sm:$0xff] }
 0x160   : > { %v894_v58 = vand.u32 4294901760, %v893_v14  ;;  %v1794_v46 = vand.u32 4294901760, %v1793_v1  ;;  %v2948_v5 = vpack.c.bf16 %v899_v4, %v889_v32  ;;  %v1799_v23 = vand.u32 4294901760, %v1798_v24  ;;  %v7674_v24 = vld [vmem:[#allocation143_spill] sm:$0xff]  ;;  %v7675_v1 = vld [vmem:[#allocation144_spill] sm:$0xff] }
 0x161   : > { %v1803_v18 = vsub.f32 %v7661_v30, %v7662_v35  ;;  %v904_v22 = vand.u32 4294901760, %v903_v53  ;;  %v3336_v14 = vpack.c.bf16 %v4103_v38, %v4101_v37  ;;  %v2954_v35 = vpack.c.bf16 %v7666_v51, %v7665_v34 }
 0x162   : > { %2949 = vmatprep.subr.bf16.mxu0 %v2948_v5  ;;  %v3332_v59 = vpack.c.bf16 %v1799_v23, %v1789_v26  ;;  %v2956_v32 = vpack.c.bf16 %v4192_v0, %v4190_v63  ;;  %v3340_v26 = vpack.c.bf16 %v4196_v3, %v4194_v2  ;;  %v2958_v5 = vpack.c.bf16 %v4223_v40, %v4221_v7  ;;  %v7696_v40 = vld [vmem:[#allocation60_spill] sm:$0xff]  ;;  %v7699_v7 = vld [vmem:[#allocation63_spill] sm:$0xff]  ;;  %v7703_v3 = vld [vmem:[#allocation66_spill] sm:$0xff] }
 0x163   : > { %v1804_v17 = vand.u32 4294901760, %v1803_v18  ;;  %v2950_v61 = vpack.c.bf16 %v904_v22, %v894_v58  ;;  %v7667_v18 = vld [vmem:[#allocation19_spill] sm:$0xff]  ;;  %v7669_v22 = vld [vmem:[#allocation201_spill] sm:$0xff]  ;;  %v3344_v4 = vpack.c.bf16 %v4272_v56, %v4270_v57  ;;  %v2962_v23 = vpack.c.bf16 %v4295_v54, %v4293_v9  ;;  %v7686_v57 = vld [vmem:[#allocation168_spill] sm:$0xff] }
 0x164   : > { %3333 = vmatprep.subr.bf16.mxu1 %v3332_v59  ;;  %v3338_v53 = vpack.c.bf16 %v7668_v6, %v7667_v18  ;;  %v2964_v59 = vpack.c.bf16 %v4337_v39, %v4335_v52  ;;  %v7673_v58 = vld [vmem:[#allocation141_spill] sm:$0xff]  ;;  %v7679_v39 = vld [vmem:[#allocation155_spill] sm:$0xff]  ;;  %v7680_v52 = vld [vmem:[#allocation156_spill] sm:$0xff] }
 0x165   : > { %v3334_v31 = vpack.c.bf16 %v1804_v17, %v1794_v46  ;;  %2951 = vmatpush1.bf16.msra.mxu0 %v2950_v61  ;;  %v2960_v46 = vpack.c.bf16 %v4265_v49, %v4263_v50  ;;  %v3342_v17 = vpack.c.bf16 %v4231_v43, %v4229_v42  ;;  %v7682_v54 = vld [vmem:[#allocation51_spill] sm:$0xff]  ;;  %v7684_v9 = vld [vmem:[#allocation165_spill] sm:$0xff]  ;;  %v7688_v43 = vld [vmem:[#allocation58_spill] sm:$0xff] }
 0x166   : > { %2953 = vmatprep.subr.bf16.mxu0 %v2952_v28  ;;  %v7685_v56 = vld [vmem:[#allocation167_spill] sm:$0xff]  ;;  %v7691_v42 = vld [vmem:[#allocation54_spill] sm:$0xff]  ;;  %v7694_v50 = vld [vmem:[#allocation192_spill] sm:$0xff] }
 0x167   : > { %3335 = vmatpush1.bf16.msra.mxu1 %v3334_v31  ;;  %v2980_v31 = vpack.c.bf16 %v7560_v48, %v7559_v21  ;;  %v7678_v21 = vld [vmem:[#allocation153_spill] sm:$0xff]  ;;  %v7693_v49 = vld [vmem:[#allocation191_spill] sm:$0xff]  ;;  %v7705_v2 = vld [vmem:[#allocation72_spill] sm:$0xff] }
 0x168   : > { %3337 = vmatprep.subr.bf16.mxu1 %v3336_v14  ;;  %909 = vmatmul.mubr.f32.vlgmr.msra.gmra.mrb[0].mxu0 %v7669_v22  ;;  %v7698_v14 = vld [vmem:[#allocation62_spill] sm:$0xff]  ;;  %v7702_v28 = vld [vmem:[#allocation65_spill] sm:$0xff] }
 0x169   : > { %2955 = vmatpush1.bf16.msra.mxu0 %v2954_v35  ;;  %v2970_v35 = vpack.c.bf16 %v7699_v7, %v7698_v14  ;;  %v3354_v61 = vpack.c.bf16 %v7703_v3, %v7702_v28  ;;  %v7708_v7 = vld [vmem:[#allocation81_spill] sm:$0xff]  ;;  %v7709_v14 = vld [vmem:[#allocation82_spill] sm:$0xff]  ;;  %v7715_v28 = vld [vmem:[#allocation87_spill] sm:$0xff] }
 0x16a   : > { %1809 = vmatmul.mubr.f32.vlgmr.msra.gmra.mrb[0].mxu1 %v7669_v22  ;;  %2957 = vmatprep.subr.bf16.mxu0 %v2956_v32  ;;  %v7670_v32 = vld [vmem:[#allocation41_spill] sm:$0xff]  ;;  %v7677_v22 = vld [vmem:[#allocation48_spill] sm:$0xff]  ;;  %v7711_v18 = vld [vmem:[#allocation78_spill] sm:$0xff] }
 0x16b   : > { %3339 = vmatpush1.bf16.msra.mxu1 %v3338_v53  ;;  %v7671_v53 = vld [vmem:[#allocation42_spill] sm:$0xff] }
 0x16c   : > { %3341 = vmatprep.subr.bf16.mxu1 %v3340_v26  ;;  %v3346_v26 = vpack.c.bf16 %v7671_v53, %v7670_v32  ;;  %v7683_v32 = vld [vmem:[#allocation163_spill] sm:$0xff] }
 0x16d   : > { %2959 = vmatpush1.bf16.msra.mxu0 %v2958_v5  ;;  %v7672_v5 = vld [vmem:[#allocation139_spill] sm:$0xff] }
 0x16e   : > { %2961 = vmatprep.subr.bf16.mxu0 %v2960_v46  ;;  %v7676_v46 = vld [vmem:[#allocation47_spill] sm:$0xff] }
 0x16f   : > { %3343 = vmatpush1.bf16.msra.mxu1 %v3342_v17  ;;  %v3348_v48 = vpack.c.bf16 %v7677_v22, %v7676_v46  ;;  %v7681_v17 = vld [vmem:[#allocation50_spill] sm:$0xff]  ;;  %v7689_v46 = vld [vmem:[#allocation180_spill] sm:$0xff] }
 0x170   : > { %3345 = vmatprep.subr.bf16.mxu1 %v3344_v4  ;;  %v2966_v53 = vpack.c.bf16 %v7682_v54, %v7681_v17  ;;  %v7687_v4 = vld [vmem:[#allocation57_spill] sm:$0xff] }
 0x171   : > { %2963 = vmatpush1.bf16.msra.mxu0 %v2962_v23  ;;  %v2968_v22 = vpack.c.bf16 %v7688_v43, %v7687_v4  ;;  %v7690_v23 = vld [vmem:[#allocation53_spill] sm:$0xff]  ;;  %v7697_v4 = vld [vmem:[#allocation200_spill] sm:$0xff] }
 0x172   : > { %2965 = vmatprep.subr.bf16.mxu0 %v2964_v59  ;;  %v3350_v54 = vpack.c.bf16 %v7691_v42, %v7690_v23  ;;  %v7692_v17 = vld [vmem:[#allocation189_spill] sm:$0xff]  ;;  %v7695_v59 = vld [vmem:[#allocation59_spill] sm:$0xff]  ;;  %1045 = vmatprep.mubr.f32.mxu0 %v7697_v4  ;;  %v7701_v42 = vld [vmem:[#allocation70_spill] sm:$0xff] }
 0x173   : > { %3347 = vmatpush1.bf16.msra.mxu1 %v3346_v26  ;;  %v3352_v43 = vpack.c.bf16 %v7696_v40, %v7695_v59  ;;  %1945 = vmatprep.mubr.f32.mxu1 %v7697_v4  ;;  %v7700_v26 = vld [vmem:[#allocation69_spill] sm:$0xff]  ;;  %v7706_v59 = vld [vmem:[#allocation74_spill] sm:$0xff]  ;;  %v2976_v4 = vpack.c.bf16 %v7709_v14, %v7708_v7 }
 0x174   : > { %3349 = vmatprep.subr.bf16.mxu1 %v3348_v48  ;;  %v2972_v23 = vpack.c.bf16 %v7701_v42, %v7700_v26  ;;  %v7704_v48 = vld [vmem:[#allocation71_spill] sm:$0xff]  ;;  %v7713_v26 = vld [vmem:[#allocation84_spill] sm:$0xff]  ;;  %v7718_v14 = vld [vmem:[#allocation98_spill] sm:$0xff] }
 0x175   : > { %2967 = vmatpush1.bf16.msra.mxu0 %v2966_v53  ;;  %v3356_v40 = vpack.c.bf16 %v7705_v2, %v7704_v48  ;;  %v7707_v53 = vld [vmem:[#allocation75_spill] sm:$0xff] }
 0x176   : > { %2969 = vmatprep.subr.bf16.mxu0 %v2968_v22  ;;  %v2974_v6 = vpack.c.bf16 %v7707_v53, %v7706_v59  ;;  %v7710_v22 = vld [vmem:[#allocation77_spill] sm:$0xff]  ;;  %v7717_v53 = vld [vmem:[#allocation90_spill] sm:$0xff] }
 0x177   : > { %3351 = vmatpush1.bf16.msra.mxu1 %v3350_v54  ;;  %v3358_v42 = vpack.c.bf16 %v7711_v18, %v7710_v22  ;;  %v7712_v54 = vld [vmem:[#allocation83_spill] sm:$0xff]  ;;  %v7721_v18 = vld [vmem:[#allocation102_spill] sm:$0xff] }
 0x178   : > { %3353 = vmatprep.subr.bf16.mxu1 %v3352_v43  ;;  %v3360_v3 = vpack.c.bf16 %v7713_v26, %v7712_v54  ;;  %v7714_v43 = vld [vmem:[#allocation86_spill] sm:$0xff] }
 0x179   : > { %2971 = vmatpush1.bf16.msra.mxu0 %v2970_v35  ;;  %v2978_v2 = vpack.c.bf16 %v7715_v28, %v7714_v43  ;;  %v7716_v35 = vld [vmem:[#allocation89_spill] sm:$0xff] }
 0x17a   : > { %2973 = vmatprep.subr.bf16.mxu0 %v2972_v23  ;;  %v3362_v23 = vpack.c.bf16 %v7717_v53, %v7716_v35 }
 0x17b   : > { %3355 = vmatpush1.bf16.msra.mxu1 %v3354_v61  ;;  %v7719_v61 = vld [vmem:[#allocation99_spill] sm:$0xff] }
 0x17c   : > { %3357 = vmatprep.subr.bf16.mxu1 %v3356_v40  ;;  %v2982_v7 = vpack.c.bf16 %v7719_v61, %v7718_v14  ;;  %v7720_v40 = vld [vmem:[#allocation101_spill] sm:$0xff]  ;;  %v7727_v61 = vld [vmem:[#allocation114_spill] sm:$0xff] }
 0x17d   : > { %2975 = vmatpush1.bf16.msra.mxu0 %v2974_v6  ;;  %v3366_v22 = vpack.c.bf16 %v7721_v18, %v7720_v40  ;;  %v7722_v6 = vpack.c.bf16 %v7562_v16, %v7561_v10  ;;  %v7729_v18 = vld [vmem:[#allocation122_spill] sm:$0xff]  ;;  %v7730_v40 = vld [vmem:[#allocation123_spill] sm:$0xff] }
 0x17e   : > { %2977 = vmatprep.subr.bf16.mxu0 %v2976_v4  ;;  %v7723_v4 = vld [vmem:[#allocation110_spill] sm:$0xff] }
 0x17f   : > { %3359 = vmatpush1.bf16.msra.mxu1 %v3358_v42  ;;  %v7724_v42 = vld [vmem:[#allocation111_spill] sm:$0xff] }
 0x180   : > { %3361 = vmatprep.subr.bf16.mxu1 %v3360_v3  ;;  %v2986_v28 = vpack.c.bf16 %v7724_v42, %v7723_v4  ;;  %v7725_v3 = vpack.c.bf16 %v7572_v47, %v7571_v62  ;;  %v7732_v42 = vld [vmem:[#allocation125_spill] sm:$0xff]  ;;  %v7733_v4 = vld [vmem:[#allocation126_spill] sm:$0xff] }
 0x181   : > { %2979 = vmatpush1.bf16.msra.mxu0 %v2978_v2  ;;  %v7726_v2 = vld [vmem:[#allocation113_spill] sm:$0xff] }
 0x182   : > { %2981 = vmatprep.subr.bf16.mxu0 %v2980_v31  ;;  %v3370_v31 = vpack.c.bf16 %v7727_v61, %v7726_v2  ;;  %v7735_v61 = vld [vmem:[#allocation134_spill] sm:$0xff]  ;;  %v7736_v2 = vld [vmem:[#allocation135_spill] sm:$0xff] }
 0x183   : > { %3363 = vmatpush1.bf16.msra.mxu1 %v3362_v23  ;;  %v7728_v23 = vpack.c.bf16 %v7574_v41, %v7573_v12 }
 0x184   : > { %3365 = vmatprep.subr.bf16.mxu1 %v7722_v6  ;;  %v2990_v6 = vpack.c.bf16 %v7730_v40, %v7729_v18  ;;  %v7738_v40 = vld [vmem:[#allocation137_spill] sm:$0xff]  ;;  %v7739_v18 = vld [vmem:[#allocation138_spill] sm:$0xff] }
 0x185   : > { %2983 = vmatpush1.bf16.msra.mxu0 %v2982_v7  ;;  %v7731_v7 = vpack.c.bf16 %v7584_v33, %v7583_v13 }
 0x186   : > { %2985 = vmatprep.subr.bf16.mxu0 %v7725_v3  ;;  %v3374_v3 = vpack.c.bf16 %v7733_v4, %v7732_v42  ;;  %v7741_v4 = vld [vmem:[#allocation146_spill] sm:$0xff]  ;;  %v7742_v42 = vld [vmem:[#allocation147_spill] sm:$0xff] }
 0x187   : > { %3367 = vmatpush1.bf16.msra.mxu1 %v3366_v22  ;;  %v7734_v22 = vpack.c.bf16 %v7586_v25, %v7585_v44 }
 0x188   : > { %3369 = vmatprep.subr.bf16.mxu1 %v7728_v23  ;;  %v2994_v23 = vpack.c.bf16 %v7736_v2, %v7735_v61  ;;  %v7744_v2 = vld [vmem:[#allocation149_spill] sm:$0xff]  ;;  %v7745_v61 = vld [vmem:[#allocation150_spill] sm:$0xff] }
 0x189   : > { %2987 = vmatpush1.bf16.msra.mxu0 %v2986_v28  ;;  %v7737_v28 = vpack.c.bf16 %v7596_v29, %v7595_v60 }
 0x18a   : > { %2989 = vmatprep.subr.bf16.mxu0 %v7731_v7  ;;  %v3378_v7 = vpack.c.bf16 %v7739_v18, %v7738_v40  ;;  %v7747_v18 = vld [vmem:[#allocation158_spill] sm:$0xff]  ;;  %v7748_v40 = vld [vmem:[#allocation159_spill] sm:$0xff] }
 0x18b   : > { %3371 = vmatpush1.bf16.msra.mxu1 %v3370_v31  ;;  %v7740_v31 = vpack.c.bf16 %v7598_v8, %v7597_v45 }
 0x18c   : > { %3373 = vmatprep.subr.bf16.mxu1 %v7734_v22  ;;  %v2998_v22 = vpack.c.bf16 %v7742_v42, %v7741_v4  ;;  %v7750_v42 = vld [vmem:[#allocation161_spill] sm:$0xff]  ;;  %v7751_v4 = vld [vmem:[#allocation162_spill] sm:$0xff] }
 0x18d   : > { %2991 = vmatpush1.bf16.msra.mxu0 %v2990_v6  ;;  %v7743_v6 = vpack.c.bf16 %v7673_v58, %v7672_v5 }
 0x18e   : > { %2993 = vmatprep.subr.bf16.mxu0 %v7737_v28  ;;  %v3382_v28 = vpack.c.bf16 %v7745_v61, %v7744_v2  ;;  %v7753_v61 = vld [vmem:[#allocation170_spill] sm:$0xff]  ;;  %v7754_v2 = vld [vmem:[#allocation171_spill] sm:$0xff] }
 0x18f   : > { %3375 = vmatpush1.bf16.msra.mxu1 %v3374_v3  ;;  %v7746_v3 = vpack.c.bf16 %v7675_v1, %v7674_v24 }
 0x190   : > { %3377 = vmatprep.subr.bf16.mxu1 %v7740_v31  ;;  %v3002_v31 = vpack.c.bf16 %v7748_v40, %v7747_v18  ;;  %v7756_v40 = vld [vmem:[#allocation173_spill] sm:$0xff]  ;;  %v7757_v18 = vld [vmem:[#allocation174_spill] sm:$0xff] }
 0x191   : > { %2995 = vmatpush1.bf16.msra.mxu0 %v2994_v23  ;;  %v7749_v23 = vpack.c.bf16 %v7678_v21, %v7619_v36 }
 0x192   : > { %2997 = vmatprep.subr.bf16.mxu0 %v7743_v6  ;;  %v3386_v6 = vpack.c.bf16 %v7751_v4, %v7750_v42  ;;  %v7759_v4 = vld [vmem:[#allocation182_spill] sm:$0xff]  ;;  %v7760_v42 = vld [vmem:[#allocation183_spill] sm:$0xff] }
 0x193   : > { %3379 = vmatpush1.bf16.msra.mxu1 %v3378_v7  ;;  %v7752_v7 = vpack.c.bf16 %v7680_v52, %v7679_v39 }
 0x194   : > { %3381 = vmatprep.subr.bf16.mxu1 %v7746_v3  ;;  %v3006_v3 = vpack.c.bf16 %v7754_v2, %v7753_v61  ;;  %v7762_v2 = vld [vmem:[#allocation185_spill] sm:$0xff]  ;;  %v7763_v61 = vld [vmem:[#allocation186_spill] sm:$0xff] }
 0x195   : > { %2999 = vmatpush1.bf16.msra.mxu0 %v2998_v22  ;;  %v7755_v22 = vpack.c.bf16 %v7684_v9, %v7683_v32 }
 0x196   : > { %3001 = vmatprep.subr.bf16.mxu0 %v7749_v23  ;;  %v3390_v23 = vpack.c.bf16 %v7757_v18, %v7756_v40  ;;  %v7765_v18 = vld [vmem:[#allocation194_spill] sm:$0xff]  ;;  %v7766_v40 = vld [vmem:[#allocation195_spill] sm:$0xff] }
 0x197   : > { %3383 = vmatpush1.bf16.msra.mxu1 %v3382_v28  ;;  %v7758_v28 = vpack.c.bf16 %v7686_v57, %v7685_v56 }
 0x198   : > { %3385 = vmatprep.subr.bf16.mxu1 %v7752_v7  ;;  %v3010_v7 = vpack.c.bf16 %v7760_v42, %v7759_v4  ;;  %v7768_v42 = vld [vmem:[#allocation197_spill] sm:$0xff] }
 0x199   : > { %3003 = vmatpush1.bf16.msra.mxu0 %v3002_v31  ;;  %v7761_v31 = vpack.c.bf16 %v7643_v19, %v7642_v27 }
 0x19a   : > { %3005 = vmatprep.subr.bf16.mxu0 %v7755_v22  ;;  %v3394_v22 = vpack.c.bf16 %v7763_v61, %v7762_v2  ;;  %v7770_v61 = vmov 1.0|1.0   ;;  %v7889_v2 = vand.u32 4294901760, %v4103_v38  ;;  %v7896_v38 = vld [vmem:[#allocation19_spill] sm:$0xff] }
 0x19b   : > { %3387 = vmatpush1.bf16.msra.mxu1 %v3386_v6  ;;  %v7764_v6 = vpack.c.bf16 %v7689_v46, %v7644_v55 }
 0x19c   : > { %3389 = vmatprep.subr.bf16.mxu1 %v7758_v28  ;;  %v3014_v28 = vpack.c.bf16 %v7766_v40, %v7765_v18  ;;  %v7924_v18 = vld [vmem:[#allocation39_spill] sm:$0xff] }
 0x19d   : > { %3007 = vmatpush1.bf16.msra.mxu0 %v3006_v3  ;;  %v7767_v3 = vpack.c.bf16 %v7692_v17, %v7651_v11 }
 0x19e   : > { %3009 = vmatprep.subr.bf16.mxu0 %v7761_v31  ;;  %v3398_v31 = vpack.c.bf16 %v7661_v30, %v7768_v42 }
 0x19f   : > { %3391 = vmatpush1.bf16.msra.mxu1 %v3390_v23  ;;  %v7769_v23 = vpack.c.bf16 %v7694_v50, %v7693_v49 }
 0x1a0   : > { %3393 = vmatprep.subr.bf16.mxu1 %v7764_v6  ;;  %v7773_v6 = vld [vmem:[#allocation203_spill] sm:$0xff] }
 0x1a1   : > { %3011 = vmatpush1.bf16.msra.mxu0 %v3010_v7 }
 0x1a2   : > { %3013 = vmatprep.subr.bf16.mxu0 %v7767_v3  ;;  %v7775_v3 = vld [vmem:[#allocation202_spill] sm:$0xff] }
 0x1a3   : > { %3395 = vmatpush1.bf16.msra.mxu1 %v3394_v22  ;;  %v7788_v22 = vld [vmem:[#allocation40_spill] sm:$0xff] }
 0x1a4   : > { %3397 = vmatprep.subr.bf16.mxu1 %v7769_v23  ;;  %v7786_v23 = vld [vmem:[#allocation43_spill] sm:$0xff] }
 0x1a5   : > { %3015 = vmatpush1.bf16.msra.mxu0 %v3014_v28  ;;  %vm7787_vm7 = vnez %v7786_v23  ;;  %v7792_v28 = vld [vmem:[#allocation49_spill] sm:$0xff]  ;;  %v7798_v23 = vld [vmem:[#allocation56_spill] sm:$0xff] }
 0x1a6   : > { %3017 = vmatprep.subr.msk.bf16.mxu0 %vm4084_vm4, %v7770_v61 }
 0x1a7   : > { %3399 = vmatpush1.bf16.msra.mxu1 %v3398_v31  ;;  %v7782_v31 = vld [vmem:[#allocation32_spill] sm:$0xff] }
 0x1a8   : > { %3401 = vmatprep.subr.msk.bf16.mxu1 %vm4097_vm5, %v7770_v61  ;;  %1048 = vmatmul.mubr.f32.vlgmr.msra.gmra.mrb[0].mxu0 %v7773_v6  ;;  %vm7783_vm12 = vnez %v7782_v31  ;;  %v7794_v31 = vld [vmem:[#allocation55_spill] sm:$0xff] }
 0x1a9   : > { %3019 = vmatpush1.bf16.msk.msra.mxu0 %vm4116_vm10, %v7770_v61  ;;  %1121 = vmatprep.mubr.f32.mxu0 %v7775_v3 }
 0x1aa   : > { %1948 = vmatmul.mubr.f32.vlgmr.msra.gmra.mrb[0].mxu1 %v7773_v6  ;;  %3021 = vmatprep.subr.msk.bf16.mxu0 %vm4152_vm0, %v7770_v61  ;;  %v7790_v6 = vld [vmem:[#allocation44_spill] sm:$0xff] }
 0x1ab   : > { %3403 = vmatpush1.bf16.msk.msra.mxu1 %vm4129_vm11, %v7770_v61  ;;  %2021 = vmatprep.mubr.f32.mxu1 %v7775_v3  ;;  %v7784_v3 = vld [vmem:[#allocation37_spill] sm:$0xff] }
 0x1ac   : > { %3405 = vmatprep.subr.msk.bf16.mxu1 %vm4163_vm1, %v7770_v61  ;;  %vm7785_vm13 = vnez %v7784_v3  ;;  %v7796_v3 = vld [vmem:[#allocation52_spill] sm:$0xff] }
 0x1ad   : > { %3023 = vmatpush1.bf16.msk.msra.mxu0 %vm4212_vm8, %v7770_v61  ;;  %vm7789_vm8 = vnez %v7788_v22  ;;  %v7800_v22 = vld [vmem:[#allocation61_spill] sm:$0xff] }
 0x1ae   : > { %3025 = vmatprep.subr.msk.bf16.mxu0 %vm4248_vm2, %v7770_v61  ;;  %vm7791_vm2 = vnez %v7790_v6  ;;  %v7802_v6 = vld [vmem:[#allocation67_spill] sm:$0xff] }
 0x1af   : > { %3407 = vmatpush1.bf16.msk.msra.mxu1 %vm4225_vm9, %v7770_v61  ;;  %vm7793_vm9 = vnez %v7792_v28  ;;  %v7804_v28 = vld [vmem:[#allocation64_spill] sm:$0xff] }
 0x1b0   : > { %3409 = vmatprep.subr.msk.bf16.mxu1 %vm7783_vm12, %v7770_v61  ;;  %vm7795_vm12 = vnez %v7794_v31  ;;  %v7806_v31 = vld [vmem:[#allocation68_spill] sm:$0xff] }
 0x1b1   : > { %3027 = vmatpush1.bf16.msk.msra.mxu0 %vm7785_vm13, %v7770_v61  ;;  %vm7797_vm13 = vnez %v7796_v3  ;;  %v7808_v3 = vld [vmem:[#allocation73_spill] sm:$0xff] }
 0x1b2   : > { %3029 = vmatprep.subr.msk.bf16.mxu0 %vm7787_vm7, %v7770_v61  ;;  %vm7799_vm7 = vnez %v7798_v23  ;;  %v7810_v23 = vld [vmem:[#allocation79_spill] sm:$0xff] }
 0x1b3   : > { %3411 = vmatpush1.bf16.msk.msra.mxu1 %vm7789_vm8, %v7770_v61  ;;  %vm7801_vm8 = vnez %v7800_v22  ;;  %v7812_v22 = vld [vmem:[#allocation76_spill] sm:$0xff] }
 0x1b4   : > { %3413 = vmatprep.subr.msk.bf16.mxu1 %vm7791_vm2, %v7770_v61  ;;  %vm7803_vm2 = vnez %v7802_v6  ;;  %v7814_v6 = vld [vmem:[#allocation80_spill] sm:$0xff] }
 0x1b5   : > { %3031 = vmatpush1.bf16.msk.msra.mxu0 %vm7793_vm9, %v7770_v61  ;;  %vm7805_vm9 = vnez %v7804_v28  ;;  %v7816_v28 = vld [vmem:[#allocation85_spill] sm:$0xff] }
 0x1b6   : > { %3033 = vmatprep.subr.msk.bf16.mxu0 %vm7795_vm12, %v7770_v61  ;;  %vm7807_vm12 = vnez %v7806_v31  ;;  %v7818_v31 = vld [vmem:[#allocation91_spill] sm:$0xff] }
 0x1b7   : > { %3415 = vmatpush1.bf16.msk.msra.mxu1 %vm7797_vm13, %v7770_v61  ;;  %vm7809_vm13 = vnez %v7808_v3  ;;  %v7820_v3 = vld [vmem:[#allocation88_spill] sm:$0xff] }
 0x1b8   : > { %3417 = vmatprep.subr.msk.bf16.mxu1 %vm7799_vm7, %v7770_v61  ;;  %vm7811_vm7 = vnez %v7810_v23  ;;  %v7822_v23 = vld [vmem:[#allocation92_spill] sm:$0xff] }
 0x1b9   : > { %3035 = vmatpush1.bf16.msk.msra.mxu0 %vm7801_vm8, %v7770_v61  ;;  %vm7813_vm8 = vnez %v7812_v22  ;;  %v7824_v22 = vld [vmem:[#allocation97_spill] sm:$0xff] }
 0x1ba   : > { %3037 = vmatprep.subr.msk.bf16.mxu0 %vm7803_vm2, %v7770_v61  ;;  %vm7815_vm2 = vnez %v7814_v6  ;;  %v7826_v6 = vld [vmem:[#allocation103_spill] sm:$0xff] }
 0x1bb   : > { %3419 = vmatpush1.bf16.msk.msra.mxu1 %vm7805_vm9, %v7770_v61  ;;  %vm7817_vm9 = vnez %v7816_v28  ;;  %v7828_v28 = vld [vmem:[#allocation100_spill] sm:$0xff] }
 0x1bc   : > { %3421 = vmatprep.subr.msk.bf16.mxu1 %vm7807_vm12, %v7770_v61  ;;  %vm7819_vm12 = vnez %v7818_v31  ;;  %v7830_v31 = vld [vmem:[#allocation107_spill] sm:$0xff] }
 0x1bd   : > { %3039 = vmatpush1.bf16.msk.msra.mxu0 %vm7809_vm13, %v7770_v61  ;;  %vm7821_vm13 = vnez %v7820_v3  ;;  %v7832_v3 = vld [vmem:[#allocation109_spill] sm:$0xff] }
 0x1be   : > { %3041 = vmatprep.subr.msk.bf16.mxu0 %vm7811_vm7, %v7770_v61  ;;  %vm7823_vm7 = vnez %v7822_v23  ;;  %v7834_v23 = vld [vmem:[#allocation115_spill] sm:$0xff] }
 0x1bf   : > { %3423 = vmatpush1.bf16.msk.msra.mxu1 %vm7813_vm8, %v7770_v61  ;;  %vm7825_vm8 = vnez %v7824_v22  ;;  %v7836_v22 = vld [vmem:[#allocation112_spill] sm:$0xff] }
 0x1c0   : > { %3425 = vmatprep.subr.msk.bf16.mxu1 %vm7815_vm2, %v7770_v61  ;;  %vm7827_vm2 = vnez %v7826_v6  ;;  %v7838_v6 = vld [vmem:[#allocation118_spill] sm:$0xff] }
 0x1c1   : > { %3043 = vmatpush1.bf16.msk.msra.mxu0 %vm7817_vm9, %v7770_v61  ;;  %vm7829_vm9 = vnez %v7828_v28  ;;  %v7840_v28 = vld [vmem:[#allocation121_spill] sm:$0xff] }
 0x1c2   : > { %3045 = vmatprep.subr.msk.bf16.mxu0 %vm7819_vm12, %v7770_v61  ;;  %vm7831_vm12 = vnez %v7830_v31  ;;  %v7842_v31 = vld [vmem:[#allocation127_spill] sm:$0xff] }
 0x1c3   : > { %3427 = vmatpush1.bf16.msk.msra.mxu1 %vm7821_vm13, %v7770_v61  ;;  %vm7833_vm13 = vnez %v7832_v3  ;;  %v7844_v3 = vld [vmem:[#allocation124_spill] sm:$0xff] }
 0x1c4   : > { %3429 = vmatprep.subr.msk.bf16.mxu1 %vm7823_vm7, %v7770_v61  ;;  %vm7835_vm7 = vnez %v7834_v23  ;;  %v7846_v23 = vld [vmem:[#allocation130_spill] sm:$0xff] }
 0x1c5   : > { %3047 = vmatpush1.bf16.msk.msra.mxu0 %vm7825_vm8, %v7770_v61  ;;  %vm7837_vm8 = vnez %v7836_v22  ;;  %v7848_v22 = vld [vmem:[#allocation133_spill] sm:$0xff] }
 0x1c6   : > { %3049 = vmatprep.subr.msk.bf16.mxu0 %vm7827_vm2, %v7770_v61  ;;  %vm7839_vm2 = vnez %v7838_v6  ;;  %v7850_v6 = vld [vmem:[#allocation140_spill] sm:$0xff] }
 0x1c7   : > { %3431 = vmatpush1.bf16.msk.msra.mxu1 %vm7829_vm9, %v7770_v61  ;;  %vm7841_vm9 = vnez %v7840_v28  ;;  %v7852_v28 = vld [vmem:[#allocation136_spill] sm:$0xff] }
 0x1c8   : > { %3433 = vmatprep.subr.msk.bf16.mxu1 %vm7831_vm12, %v7770_v61  ;;  %vm7843_vm12 = vnez %v7842_v31  ;;  %v7854_v31 = vld [vmem:[#allocation142_spill] sm:$0xff] }
 0x1c9   : > { %3051 = vmatpush1.bf16.msk.msra.mxu0 %vm7833_vm13, %v7770_v61  ;;  %vm7845_vm13 = vnez %v7844_v3  ;;  %v7856_v3 = vld [vmem:[#allocation145_spill] sm:$0xff] }
 0x1ca   : > { %3053 = vmatprep.subr.msk.bf16.mxu0 %vm7835_vm7, %v7770_v61  ;;  %vm7847_vm7 = vnez %v7846_v23  ;;  %v7858_v23 = vld [vmem:[#allocation151_spill] sm:$0xff] }
 0x1cb   : > { %3435 = vmatpush1.bf16.msk.msra.mxu1 %vm7837_vm8, %v7770_v61  ;;  %vm7849_vm8 = vnez %v7848_v22  ;;  %v7860_v22 = vld [vmem:[#allocation148_spill] sm:$0xff] }
 0x1cc   : > { %3437 = vmatprep.subr.msk.bf16.mxu1 %vm7839_vm2, %v7770_v61  ;;  %vm7851_vm2 = vnez %v7850_v6  ;;  %v7862_v6 = vld [vmem:[#allocation154_spill] sm:$0xff] }
 0x1cd   : > { %3055 = vmatpush1.bf16.msk.msra.mxu0 %vm7841_vm9, %v7770_v61  ;;  %vm7853_vm9 = vnez %v7852_v28  ;;  %v7864_v28 = vld [vmem:[#allocation157_spill] sm:$0xff] }
 0x1ce   : > { %3057 = vmatprep.subr.msk.bf16.mxu0 %vm7843_vm12, %v7770_v61  ;;  %vm7855_vm12 = vnez %v7854_v31  ;;  %v7866_v31 = vld [vmem:[#allocation164_spill] sm:$0xff] }
 0x1cf   : > { %3439 = vmatpush1.bf16.msk.msra.mxu1 %vm7845_vm13, %v7770_v61  ;;  %vm7857_vm13 = vnez %v7856_v3  ;;  %v7868_v3 = vld [vmem:[#allocation160_spill] sm:$0xff] }
 0x1d0   : > { %3441 = vmatprep.subr.msk.bf16.mxu1 %vm7847_vm7, %v7770_v61  ;;  %vm7859_vm7 = vnez %v7858_v23  ;;  %v7870_v23 = vld [vmem:[#allocation166_spill] sm:$0xff] }
 0x1d1   : > { %3059 = vmatpush1.bf16.msk.msra.mxu0 %vm7849_vm8, %v7770_v61  ;;  %vm7861_vm8 = vnez %v7860_v22  ;;  %v7872_v22 = vld [vmem:[#allocation169_spill] sm:$0xff] }
 0x1d2   : > { %3061 = vmatprep.subr.msk.bf16.mxu0 %vm7851_vm2, %v7770_v61  ;;  %vm7863_vm2 = vnez %v7862_v6  ;;  %v7874_v6 = vld [vmem:[#allocation175_spill] sm:$0xff] }
 0x1d3   : > { %3443 = vmatpush1.bf16.msk.msra.mxu1 %vm7853_vm9, %v7770_v61  ;;  %vm7865_vm9 = vnez %v7864_v28  ;;  %v7876_v28 = vld [vmem:[#allocation172_spill] sm:$0xff] }
 0x1d4   : > { %3445 = vmatprep.subr.msk.bf16.mxu1 %vm7855_vm12, %v7770_v61  ;;  %vm7867_vm12 = vnez %v7866_v31  ;;  %v7878_v31 = vld [vmem:[#allocation178_spill] sm:$0xff] }
 0x1d5   : > { %3063 = vmatpush1.bf16.msk.msra.mxu0 %vm7857_vm13, %v7770_v61  ;;  %vm7869_vm13 = vnez %v7868_v3  ;;  %v7880_v3 = vld [vmem:[#allocation181_spill] sm:$0xff] }
 0x1d6   : > { %3065 = vmatprep.subr.msk.bf16.mxu0 %vm7859_vm7, %v7770_v61  ;;  %vm7871_vm7 = vnez %v7870_v23 }
 0x1d7   : > { %3447 = vmatpush1.bf16.msk.msra.mxu1 %vm7861_vm8, %v7770_v61  ;;  %vm7873_vm8 = vnez %v7872_v22  ;;  %v7883_v22 = vand.u32 4294901760, %v7663_v15  ;;  %v7891_v15 = vand.u32 4294901760, %v7665_v34  ;;  %v7900_v34 = vld [vmem:[#allocation204_spill] sm:$0xff] }
 0x1d8   : > { %3449 = vmatprep.subr.msk.bf16.mxu1 %vm7863_vm2, %v7770_v61  ;;  %vm7875_vm2 = vnez %v7874_v6  ;;  %v7884_v6 = vand.u32 4294901760, %v7664_v20  ;;  %v7892_v20 = vand.u32 4294901760, %v7666_v51  ;;  %v7901_v51 = vld [vmem:[#allocation23_spill] sm:$0xff] }
 0x1d9   : > { %3067 = vmatpush1.bf16.msk.msra.mxu0 %vm7865_vm9, %v7770_v61  ;;  %vm7877_vm9 = vnez %v7876_v28  ;;  %v7885_v28 = vld [vmem:[#allocation184_spill] sm:$0xff] }
 0x1da   : > { %3069 = vmatprep.subr.msk.bf16.mxu0 %vm7867_vm12, %v7770_v61  ;;  %vm7879_vm12 = vnez %v7878_v31  ;;  %v3080_v7 = vpack.c.bf16 %v7884_v6, %v7883_v22  ;;  %v3082_v22 = vpack.c.bf16 %v7892_v20, %v7891_v15  ;;  %v7893_v6 = vand.u32 4294901760, %v4190_v63 }
 0x1db   : > { %3451 = vmatpush1.bf16.msk.msra.mxu1 %vm7869_vm13, %v7770_v61  ;;  %vm7881_vm13 = vnez %v7880_v3  ;;  %v7888_v3 = vand.u32 4294901760, %v4101_v37  ;;  %v7894_v31 = vand.u32 4294901760, %v4192_v0  ;;  %v7902_v15 = vand.u32 4294901760, %v7901_v51  ;;  %v7905_v0 = vld [vmem:[#allocation26_spill] sm:$0xff]  ;;  %v7914_v51 = vld [vmem:[#allocation29_spill] sm:$0xff] }
 0x1dc   : > { %3453 = vmatprep.subr.msk.bf16.mxu1 %vm7871_vm7, %v7770_v61 }
 0x1dd   : > { %3071 = vmatpush1.bf16.msk.msra.mxu0 %vm7873_vm8, %v7770_v61  ;;  %v3464_v30 = vpack.c.bf16 %v7889_v2, %v7888_v3  ;;  %v7897_v2 = vand.u32 4294901760, %v7896_v38  ;;  %v7898_v3 = vld [vmem:[#allocation20_spill] sm:$0xff]  ;;  %v7912_v38 = vld [vmem:[#allocation34_spill] sm:$0xff] }
 0x1de   : > { %3073 = vmatprep.subr.msk.bf16.mxu0 %vm7875_vm2, %v7770_v61  ;;  %v7899_v23 = vand.u32 4294901760, %v7898_v3 }
 0x1df   : > { %3455 = vmatpush1.bf16.msk.msra.mxu1 %vm7877_vm9, %v7770_v61  ;;  %vm7886_vm9 = vnez %v7885_v28  ;;  %v3084_v28 = vpack.c.bf16 %v7894_v31, %v7893_v6  ;;  %v7906_v31 = vand.u32 4294901760, %v7905_v0  ;;  %v7907_v6 = vld [vmem:[#allocation27_spill] sm:$0xff] }
 0x1e0   : > { %3457 = vmatprep.subr.msk.bf16.mxu1 %vm7879_vm12, %v7770_v61  ;;  %v3466_v42 = vpack.c.bf16 %v7899_v23, %v7897_v2  ;;  %v7908_v40 = vand.u32 4294901760, %v7907_v6  ;;  %v7910_v23 = vld [vmem:[#allocation33_spill] sm:$0xff]  ;;  %v7913_v2 = vand.u32 4294901760, %v7912_v38  ;;  %v7925_v38 = vand.u32 4294901760, %v7924_v18  ;;  %v7938_v18 = vld [vmem:[#allocation50_spill] sm:$0xff] }
 0x1e1   : > { %3075 = vmatpush1.bf16.msk.msra.mxu0 %vm7881_vm13, %v7770_v61 }
 0x1e2   : > { %3077 = vmatprep.subr.msk.bf16.mxu0 %vm5178_vm15, %v7770_v61  ;;  %v3086_v37 = vpack.c.bf16 %v7908_v40, %v7906_v31  ;;  %v7918_v40 = vld [vmem:[#allocation35_spill] sm:$0xff]  ;;  %v7920_v31 = vld [vmem:[#allocation36_spill] sm:$0xff] }
 0x1e3   : > { %3459 = vmatpush1.bf16.msk.msra.mxu1 %vm7886_vm9, %v7770_v61  ;;  %v7919_v0 = vand.u32 4294901760, %v7918_v40  ;;  %v7921_v6 = vand.u32 4294901760, %v7920_v31  ;;  %v7936_v31 = vld [vmem:[#allocation48_spill] sm:$0xff] }
 0x1e4   : > { %3461 = vmatprep.subr.msk.bf16.mxu1 %vm5192_vm14, %v7770_v61 }
 0x1e5   : > { %3079 = vmatpush1.bf16.msk.msra.mxu0 %vm5206_vm3, %v7770_v61 }
 0x1e6   : > { %3081 = vmatprep.subr.bf16.mxu0 %v3080_v7  ;;  %v7903_v7 = vld [vmem:[#allocation24_spill] sm:$0xff] }
 0x1e7   : > { %3463 = vmatpush1.bf16.msk.msra.mxu1 %vm5222_vm6, %v7770_v61  ;;  %v7904_v20 = vand.u32 4294901760, %v7903_v7  ;;  %v7909_v61 = vld [vmem:[#allocation198_spill] sm:$0xff]  ;;  %v7915_v7 = vand.u32 4294901760, %v7914_v51 }
 0x1e8   : > { %3465 = vmatprep.subr.bf16.mxu1 %v3464_v30  ;;  %1125 = vmatmul.mubr.f32.vlgmr.msra.gmra.mrb[0].mxu0 %v7900_v34  ;;  %v7911_v30 = vand.u32 4294901760, %v7910_v23  ;;  %v7928_v51 = vld [vmem:[#allocation46_spill] sm:$0xff] }
 0x1e9   : > { %v3468_v63 = vpack.c.bf16 %v7904_v20, %v7902_v15  ;;  %3083 = vmatpush1.bf16.msra.mxu0 %v3082_v22  ;;  %1324 = vmatprep.mubr.f32.mxu0 %v7909_v61  ;;  %v7916_v15 = vld [vmem:[#allocation30_spill] sm:$0xff] }
 0x1ea   : > { %2025 = vmatmul.mubr.f32.vlgmr.msra.gmra.mrb[0].mxu1 %v7900_v34  ;;  %3085 = vmatprep.subr.bf16.mxu0 %v3084_v28  ;;  %v3088_v3 = vpack.c.bf16 %v7913_v2, %v7911_v30  ;;  %v7917_v22 = vand.u32 4294901760, %v7916_v15  ;;  %v3472_v34 = vpack.c.bf16 %v7921_v6, %v7919_v0  ;;  %v7922_v28 = vld [vmem:[#allocation38_spill] sm:$0xff]  ;;  %v7929_v15 = vand.u32 4294901760, %v7928_v51  ;;  %v7934_v0 = vld [vmem:[#allocation47_spill] sm:$0xff] }
 0x1eb   : > { %3467 = vmatpush1.bf16.msra.mxu1 %v3466_v42  ;;  %2224 = vmatprep.mubr.f32.mxu1 %v7909_v61  ;;  %v7923_v23 = vand.u32 4294901760, %v7922_v28  ;;  %v7926_v42 = vld [vmem:[#allocation45_spill] sm:$0xff]  ;;  %v7932_v61 = vld [vmem:[#allocation42_spill] sm:$0xff]  ;;  %v7937_v6 = vand.u32 4294901760, %v7936_v31  ;;  %v7952_v31 = vld [vmem:[#allocation60_spill] sm:$0xff] }
 0x1ec   : > { %v3470_v20 = vpack.c.bf16 %v7917_v22, %v7915_v7  ;;  %3469 = vmatprep.subr.bf16.mxu1 %v3468_v63  ;;  %v7927_v2 = vand.u32 4294901760, %v7926_v42  ;;  %v7930_v22 = vld [vmem:[#allocation41_spill] sm:$0xff]  ;;  %v7933_v40 = vand.u32 4294901760, %v7932_v61  ;;  %v7944_v51 = vld [vmem:[#allocation58_spill] sm:$0xff] }
 0x1ed   : > { %3087 = vmatpush1.bf16.msra.mxu0 %v3086_v37  ;;  %v3090_v30 = vpack.c.bf16 %v7925_v38, %v7923_v23  ;;  %v7931_v63 = vand.u32 4294901760, %v7930_v22  ;;  %v7935_v37 = vand.u32 4294901760, %v7934_v0  ;;  %v7940_v23 = vld [vmem:[#allocation51_spill] sm:$0xff]  ;;  %v7946_v61 = vld [vmem:[#allocation53_spill] sm:$0xff] }
 0x1ee   : > { %3089 = vmatprep.subr.bf16.mxu0 %v3088_v3  ;;  %v3092_v7 = vpack.c.bf16 %v7929_v15, %v7927_v2  ;;  %v7939_v3 = vand.u32 4294901760, %v7938_v18  ;;  %v7941_v38 = vand.u32 4294901760, %v7940_v23  ;;  %v7942_v2 = vld [vmem:[#allocation57_spill] sm:$0xff]  ;;  %v7945_v15 = vand.u32 4294901760, %v7944_v51  ;;  %v7956_v23 = vld [vmem:[#allocation63_spill] sm:$0xff]  ;;  %v7960_v51 = vld [vmem:[#allocation70_spill] sm:$0xff] }
 0x1ef   : > { %3471 = vmatpush1.bf16.msra.mxu1 %v3470_v20  ;;  %v3474_v50 = vpack.c.bf16 %v7933_v40, %v7931_v63  ;;  %v3476_v28 = vpack.c.bf16 %v7937_v6, %v7935_v37  ;;  %v7943_v20 = vand.u32 4294901760, %v7942_v2  ;;  %v7948_v63 = vld [vmem:[#allocation54_spill] sm:$0xff]  ;;  %v7950_v37 = vld [vmem:[#allocation59_spill] sm:$0xff]  ;;  %v7953_v6 = vand.u32 4294901760, %v7952_v31 }
 0x1f0   : > { %3473 = vmatprep.subr.bf16.mxu1 %v3472_v34  ;;  %v3094_v42 = vpack.c.bf16 %v7941_v38, %v7939_v3  ;;  %v7947_v34 = vand.u32 4294901760, %v7946_v61  ;;  %v7949_v40 = vand.u32 4294901760, %v7948_v63  ;;  %v7954_v3 = vld [vmem:[#allocation62_spill] sm:$0xff]  ;;  %v7957_v38 = vand.u32 4294901760, %v7956_v23 }
 0x1f1   : > { %3091 = vmatpush1.bf16.msra.mxu0 %v3090_v30  ;;  %v3096_v22 = vpack.c.bf16 %v7945_v15, %v7943_v20  ;;  %v7951_v30 = vand.u32 4294901760, %v7950_v37  ;;  %v7958_v20 = vld [vmem:[#allocation69_spill] sm:$0xff]  ;;  %v7961_v15 = vand.u32 4294901760, %v7960_v51  ;;  %v7964_v63 = vld [vmem:[#allocation66_spill] sm:$0xff] }
 0x1f2   : > { %3093 = vmatprep.subr.bf16.mxu0 %v3092_v7  ;;  %v3478_v0 = vpack.c.bf16 %v7949_v40, %v7947_v34  ;;  %v7955_v7 = vand.u32 4294901760, %v7954_v3  ;;  %v7962_v34 = vld [vmem:[#allocation65_spill] sm:$0xff]  ;;  %v7965_v40 = vand.u32 4294901760, %v7964_v63  ;;  %v7970_v3 = vld [vmem:[#allocation75_spill] sm:$0xff] }
 0x1f3   : > { %3475 = vmatpush1.bf16.msra.mxu1 %v3474_v50  ;;  %v3480_v18 = vpack.c.bf16 %v7953_v6, %v7951_v30  ;;  %v7959_v50 = vand.u32 4294901760, %v7958_v20  ;;  %v7967_v30 = vld [vmem:[#allocation72_spill] sm:$0xff]  ;;  %v7974_v20 = vld [vmem:[#allocation82_spill] sm:$0xff] }
 0x1f4   : > { %3477 = vmatprep.subr.bf16.mxu1 %v3476_v28  ;;  %v3098_v2 = vpack.c.bf16 %v7957_v38, %v7955_v7  ;;  %v7963_v28 = vand.u32 4294901760, %v7962_v34  ;;  %v7968_v31 = vand.u32 4294901760, %v7967_v30  ;;  %v7971_v7 = vand.u32 4294901760, %v7970_v3  ;;  %v7972_v38 = vld [vmem:[#allocation81_spill] sm:$0xff]  ;;  %v7978_v34 = vld [vmem:[#allocation78_spill] sm:$0xff] }
 0x1f5   : > { %3095 = vmatpush1.bf16.msra.mxu0 %v3094_v42  ;;  %v3100_v61 = vpack.c.bf16 %v7961_v15, %v7959_v50  ;;  %v7966_v42 = vand.u32 4294901760, %v7704_v48  ;;  %v7975_v50 = vand.u32 4294901760, %v7974_v20  ;;  %v7976_v15 = vld [vmem:[#allocation77_spill] sm:$0xff]  ;;  %v7979_v48 = vand.u32 4294901760, %v7978_v34  ;;  %v7994_v20 = vld [vmem:[#allocation99_spill] sm:$0xff] }
 0x1f6   : > { %3097 = vmatprep.subr.bf16.mxu0 %v3096_v22  ;;  %v3482_v37 = vpack.c.bf16 %v7965_v40, %v7963_v28  ;;  %v7969_v22 = vand.u32 4294901760, %v7706_v59  ;;  %v7981_v59 = vand.u32 4294901760, %v7713_v26  ;;  %v7983_v40 = vld [vmem:[#allocation87_spill] sm:$0xff]  ;;  %v7991_v26 = vand.u32 4294901760, %v7561_v10 }
 0x1f7   : > { %3479 = vmatpush1.bf16.msra.mxu1 %v3478_v0  ;;  %v3484_v6 = vpack.c.bf16 %v7968_v31, %v7966_v42  ;;  %v7973_v0 = vand.u32 4294901760, %v7972_v38  ;;  %v7984_v42 = vand.u32 4294901760, %v7983_v40  ;;  %v7985_v31 = vld [vmem:[#allocation93_spill] sm:$0xff] }
 0x1f8   : > { %3481 = vmatprep.subr.bf16.mxu1 %v3480_v18  ;;  %v3102_v23 = vpack.c.bf16 %v7971_v7, %v7969_v22  ;;  %v7977_v18 = vand.u32 4294901760, %v7976_v15  ;;  %v7987_v22 = vld [vmem:[#allocation94_spill] sm:$0xff]  ;;  %v7996_v15 = vand.u32 4294901760, %v7571_v62 }
 0x1f9   : > { %3099 = vmatpush1.bf16.msra.mxu0 %v3098_v2  ;;  %v3104_v51 = vpack.c.bf16 %v7975_v50, %v7973_v0  ;;  %v7980_v2 = vand.u32 4294901760, %v7712_v54  ;;  %v7988_v3 = vand.u32 4294901760, %v7987_v22  ;;  %v7990_v54 = vand.u32 4294901760, %v7717_v53  ;;  %v7998_v53 = vld [vmem:[#allocation101_spill] sm:$0xff]  ;;  %v8012_v22 = vld [vmem:[#allocation114_spill] sm:$0xff] }
 0x1fa   : > { %3101 = vmatprep.subr.bf16.mxu0 %v3100_v61  ;;  %v3486_v28 = vpack.c.bf16 %v7979_v48, %v7977_v18  ;;  %v7982_v61 = vand.u32 4294901760, %v7714_v43  ;;  %v7992_v43 = vand.u32 4294901760, %v7562_v16  ;;  %v7993_v0 = vand.u32 4294901760, %v7718_v14  ;;  %v8000_v48 = vld [vmem:[#allocation102_spill] sm:$0xff] }
 0x1fb   : > { %3483 = vmatpush1.bf16.msra.mxu1 %v3482_v37  ;;  %v3488_v63 = vpack.c.bf16 %v7981_v59, %v7980_v2  ;;  %v7986_v37 = vand.u32 4294901760, %v7985_v31  ;;  %v7995_v50 = vand.u32 4294901760, %v7994_v20  ;;  %v7999_v34 = vand.u32 4294901760, %v7998_v53  ;;  %v8004_v59 = vld [vmem:[#allocation110_spill] sm:$0xff]  ;;  %v8010_v31 = vld [vmem:[#allocation113_spill] sm:$0xff] }
 0x1fc   : > { %3485 = vmatprep.subr.bf16.mxu1 %v3484_v6  ;;  %v3106_v30 = vpack.c.bf16 %v7984_v42, %v7982_v61  ;;  %v7989_v6 = vand.u32 4294901760, %v7716_v35  ;;  %v7997_v35 = vand.u32 4294901760, %v7572_v47  ;;  %v8001_v10 = vand.u32 4294901760, %v8000_v48  ;;  %v8006_v61 = vld [vmem:[#allocation111_spill] sm:$0xff]  ;;  %v8022_v20 = vld [vmem:[#allocation125_spill] sm:$0xff]  ;;  %v8028_v53 = vld [vmem:[#allocation134_spill] sm:$0xff] }
 0x1fd   : > { %3103 = vmatpush1.bf16.msra.mxu0 %v3102_v23  ;;  %v3108_v7 = vpack.c.bf16 %v7988_v3, %v7986_v37  ;;  %v3492_v23 = vpack.c.bf16 %v7992_v43, %v7991_v26  ;;  %v8002_v16 = vand.u32 4294901760, %v7573_v12  ;;  %v8003_v14 = vand.u32 4294901760, %v7574_v41  ;;  %v8018_v26 = vld [vmem:[#allocation123_spill] sm:$0xff] }
 0x1fe   : > { %3105 = vmatprep.subr.bf16.mxu0 %v3104_v51  ;;  %v3490_v38 = vpack.c.bf16 %v7990_v54, %v7989_v6  ;;  %v3110_v51 = vpack.c.bf16 %v7995_v50, %v7993_v0  ;;  %v3112_v18 = vpack.c.bf16 %v7997_v35, %v7996_v15  ;;  %v8007_v62 = vand.u32 4294901760, %v8006_v61  ;;  %v8016_v54 = vld [vmem:[#allocation122_spill] sm:$0xff]  ;;  %v8030_v48 = vld [vmem:[#allocation135_spill] sm:$0xff] }
 0x1ff   : > { %3487 = vmatpush1.bf16.msra.mxu1 %v3486_v28  ;;  %v3494_v28 = vpack.c.bf16 %v8001_v10, %v7999_v34  ;;  %v3496_v2 = vpack.c.bf16 %v8003_v14, %v8002_v16  ;;  %v8008_v47 = vand.u32 4294901760, %v7583_v13  ;;  %v8009_v42 = vand.u32 4294901760, %v7584_v33  ;;  %v8034_v14 = vld [vmem:[#allocation137_spill] sm:$0xff] }
 0x200   : > { %3489 = vmatprep.subr.bf16.mxu1 %v3488_v63  ;;  %v8005_v63 = vand.u32 4294901760, %v8004_v59  ;;  %v8011_v37 = vand.u32 4294901760, %v8010_v31  ;;  %v8013_v12 = vand.u32 4294901760, %v8012_v22  ;;  %v8014_v41 = vand.u32 4294901760, %v7585_v44  ;;  %v8036_v59 = vld [vmem:[#allocation138_spill] sm:$0xff]  ;;  %v8046_v22 = vld [vmem:[#allocation149_spill] sm:$0xff] }
 0x201   : > { %3107 = vmatpush1.bf16.msra.mxu0 %v3106_v30  ;;  %v3116_v30 = vpack.c.bf16 %v8009_v42, %v8008_v47  ;;  %v8019_v13 = vand.u32 4294901760, %v8018_v26  ;;  %v8020_v33 = vand.u32 4294901760, %v7595_v60  ;;  %v8023_v50 = vand.u32 4294901760, %v8022_v20  ;;  %v8042_v42 = vld [vmem:[#allocation147_spill] sm:$0xff]  ;;  %v8060_v20 = vld [vmem:[#allocation162_spill] sm:$0xff] }
 0x202   : > { %3109 = vmatprep.subr.bf16.mxu0 %v3108_v7  ;;  %v3114_v40 = vpack.c.bf16 %v8007_v62, %v8005_v63  ;;  %v3498_v3 = vpack.c.bf16 %v8013_v12, %v8011_v37  ;;  %v8015_v7 = vand.u32 4294901760, %v7586_v25  ;;  %v8026_v25 = vand.u32 4294901760, %v7597_v45  ;;  %v8054_v26 = vld [vmem:[#allocation159_spill] sm:$0xff] }
 0x203   : > { %3491 = vmatpush1.bf16.msra.mxu1 %v3490_v38  ;;  %v8017_v38 = vand.u32 4294901760, %v8016_v54  ;;  %v8027_v35 = vand.u32 4294901760, %v7598_v8  ;;  %v8029_v34 = vand.u32 4294901760, %v8028_v53  ;;  %v8031_v60 = vand.u32 4294901760, %v8030_v48  ;;  %v8052_v54 = vld [vmem:[#allocation158_spill] sm:$0xff]  ;;  %v8070_v48 = vld [vmem:[#allocation173_spill] sm:$0xff] }
 0x204   : > { %3493 = vmatprep.subr.bf16.mxu1 %v3492_v23  ;;  %v3500_v6 = vpack.c.bf16 %v8015_v7, %v8014_v41  ;;  %v8021_v23 = vand.u32 4294901760, %v7596_v29  ;;  %v8032_v29 = vand.u32 4294901760, %v7672_v5  ;;  %v8037_v45 = vand.u32 4294901760, %v8036_v59 }
 0x205   : > { %3111 = vmatpush1.bf16.msra.mxu0 %v3110_v51  ;;  %v3118_v43 = vpack.c.bf16 %v8019_v13, %v8017_v38  ;;  %v8024_v51 = vld [vmem:[#allocation126_spill] sm:$0xff]  ;;  %v3122_v10 = vpack.c.bf16 %v8031_v60, %v8029_v34  ;;  %v8038_v8 = vand.u32 4294901760, %v7674_v24  ;;  %v8039_v61 = vand.u32 4294901760, %v7675_v1 }
 0x206   : > { %3113 = vmatprep.subr.bf16.mxu0 %v3112_v18  ;;  %v3120_v0 = vpack.c.bf16 %v8021_v23, %v8020_v33  ;;  %v8025_v44 = vand.u32 4294901760, %v8024_v51  ;;  %v3504_v18 = vpack.c.bf16 %v8027_v35, %v8026_v25  ;;  %v8043_v5 = vand.u32 4294901760, %v8042_v42  ;;  %v8058_v23 = vld [vmem:[#allocation161_spill] sm:$0xff]  ;;  %v8066_v35 = vld [vmem:[#allocation171_spill] sm:$0xff] }
 0x207   : > { %3495 = vmatpush1.bf16.msra.mxu1 %v3494_v28  ;;  %v8033_v28 = vand.u32 4294901760, %v7673_v58  ;;  %v3508_v62 = vpack.c.bf16 %v8039_v61, %v8038_v8  ;;  %v8044_v58 = vand.u32 4294901760, %v7619_v36  ;;  %v8045_v31 = vand.u32 4294901760, %v7678_v21  ;;  %v8081_v8 = vld [vmem:[#allocation185_spill] sm:$0xff] }
 0x208   : > { %3497 = vmatprep.subr.bf16.mxu1 %v3496_v2  ;;  %v3502_v15 = vpack.c.bf16 %v8025_v44, %v8023_v50  ;;  %v8035_v2 = vand.u32 4294901760, %v8034_v14  ;;  %v8047_v12 = vand.u32 4294901760, %v8046_v22  ;;  %v8050_v1 = vand.u32 4294901760, %v7679_v39  ;;  %v8094_v22 = vld [vmem:[#allocation199_spill] sm:$0xff] }
 0x209   : > { %3115 = vmatpush1.bf16.msra.mxu0 %v3114_v40  ;;  %v3124_v16 = vpack.c.bf16 %v8033_v28, %v8032_v29  ;;  %v8040_v40 = vld [vmem:[#allocation146_spill] sm:$0xff]  ;;  %v3128_v37 = vpack.c.bf16 %v8045_v31, %v8044_v58  ;;  %v8051_v7 = vand.u32 4294901760, %v7680_v52  ;;  %v8053_v38 = vand.u32 4294901760, %v8052_v54  ;;  %v8090_v58 = vld [vmem:[#allocation195_spill] sm:$0xff] }
 0x20a   : > { %3117 = vmatprep.subr.bf16.mxu0 %v3116_v30  ;;  %v3506_v63 = vpack.c.bf16 %v8037_v45, %v8035_v2  ;;  %v8041_v47 = vand.u32 4294901760, %v8040_v40  ;;  %v8055_v36 = vand.u32 4294901760, %v8054_v26  ;;  %v8056_v21 = vand.u32 4294901760, %v7683_v32  ;;  %v8077_v2 = vld [vmem:[#allocation183_spill] sm:$0xff] }
 0x20b   : > { %3499 = vmatpush1.bf16.msra.mxu1 %v3498_v3  ;;  %v8048_v3 = vld [vmem:[#allocation150_spill] sm:$0xff]  ;;  %v8061_v39 = vand.u32 4294901760, %v8060_v20  ;;  %v8062_v52 = vand.u32 4294901760, %v7685_v56  ;;  %v8063_v51 = vand.u32 4294901760, %v7686_v57  ;;  %v8067_v32 = vand.u32 4294901760, %v8066_v35  ;;  %v8119_v20 = vld [vmem:[#allocation44_spill] sm:$0xff] }
 0x20c   : > { %3501 = vmatprep.subr.bf16.mxu1 %v3500_v6  ;;  %v3126_v30 = vpack.c.bf16 %v8043_v5, %v8041_v47  ;;  %v8049_v24 = vand.u32 4294901760, %v8048_v3  ;;  %v3512_v6 = vpack.c.bf16 %v8051_v7, %v8050_v1  ;;  %v3130_v13 = vpack.c.bf16 %v8055_v36, %v8053_v38  ;;  %v8086_v47 = vld [vmem:[#allocation192_spill] sm:$0xff]  ;;  %v8088_v5 = vld [vmem:[#allocation194_spill] sm:$0xff]  ;;  %v8099_v1 = vld [vmem:[#allocation201_spill] sm:$0xff] }
 0x20d   : > { %3119 = vmatpush1.bf16.msra.mxu0 %v3118_v43  ;;  %v8057_v43 = vand.u32 4294901760, %v7684_v9  ;;  %v3516_v44 = vpack.c.bf16 %v8063_v51, %v8062_v52  ;;  %v8068_v9 = vand.u32 4294901760, %v7642_v27  ;;  %v8069_v53 = vand.u32 4294901760, %v7643_v19  ;;  %v8105_v36 = vld [vmem:[#allocation25_spill] sm:$0xff]  ;;  %v8125_v52 = vld [vmem:[#allocation52_spill] sm:$0xff] }
 0x20e   : > { %3121 = vmatprep.subr.bf16.mxu0 %v3120_v0  ;;  %v3510_v41 = vpack.c.bf16 %v8049_v24, %v8047_v12  ;;  %v8059_v0 = vand.u32 4294901760, %v8058_v23  ;;  %v8071_v60 = vand.u32 4294901760, %v8070_v48  ;;  %v8074_v57 = vand.u32 4294901760, %v7644_v55  ;;  %v8115_v23 = vld [vmem:[#allocation43_spill] sm:$0xff]  ;;  %v8127_v51 = vld [vmem:[#allocation56_spill] sm:$0xff] }
 0x20f   : > { %3503 = vmatpush1.bf16.msra.mxu1 %v3502_v15  ;;  %v3132_v33 = vpack.c.bf16 %v8057_v43, %v8056_v21  ;;  %v8064_v15 = vld [vmem:[#allocation170_spill] sm:$0xff]  ;;  %v3136_v34 = vpack.c.bf16 %v8069_v53, %v8068_v9  ;;  %v8075_v28 = vand.u32 4294901760, %v7689_v46  ;;  %v8076_v14 = vand.u32 4294901760, %v7759_v4  ;;  %v8109_v21 = vld [vmem:[#allocation28_spill] sm:$0xff]  ;;  %v8147_v48 = vld [vmem:[#allocation91_spill] sm:$0xff] }
 0x210   : > { %3505 = vmatprep.subr.bf16.mxu1 %v3504_v18  ;;  %v3514_v50 = vpack.c.bf16 %v8061_v39, %v8059_v0  ;;  %v8065_v25 = vand.u32 4294901760, %v8064_v15  ;;  %v8078_v27 = vand.u32 4294901760, %v8077_v2  ;;  %v8079_v19 = vand.u32 4294901760, %v7651_v11  ;;  %v8111_v43 = vld [vmem:[#allocation32_spill] sm:$0xff]  ;;  %v8121_v39 = vld [vmem:[#allocation49_spill] sm:$0xff]  ;;  %v8131_v15 = vld [vmem:[#allocation67_spill] sm:$0xff] }
 0x211   : > { %3123 = vmatpush1.bf16.msra.mxu0 %v3122_v10  ;;  %v8072_v10 = vld [vmem:[#allocation174_spill] sm:$0xff]  ;;  %v8080_v45 = vand.u32 4294901760, %v7692_v17  ;;  %v8082_v61 = vand.u32 4294901760, %v8081_v8  ;;  %v8085_v46 = vand.u32 4294901760, %v7693_v49  ;;  %v8087_v4 = vand.u32 4294901760, %v8086_v47  ;;  %v8092_v17 = vld [vmem:[#allocation197_spill] sm:$0xff] }
 0x212   : > { %3125 = vmatprep.subr.bf16.mxu0 %v3124_v16  ;;  %v3134_v18 = vpack.c.bf16 %v8067_v32, %v8065_v25  ;;  %v8073_v56 = vand.u32 4294901760, %v8072_v10  ;;  %v3520_v16 = vpack.c.bf16 %v8075_v28, %v8074_v57  ;;  %v3138_v59 = vpack.c.bf16 %v8078_v27, %v8076_v14  ;;  %v8117_v0 = vld [vmem:[#allocation40_spill] sm:$0xff]  ;;  %v8137_v32 = vld [vmem:[#allocation73_spill] sm:$0xff]  ;;  %v8159_v28 = vld [vmem:[#allocation107_spill] sm:$0xff] }
 0x213   : > { %3507 = vmatpush1.bf16.msra.mxu1 %v3506_v63  ;;  %v3140_v63 = vpack.c.bf16 %v8080_v45, %v8079_v19  ;;  %v3524_v42 = vpack.c.bf16 %v8087_v4, %v8085_v46  ;;  %v8091_v11 = vand.u32 4294901760, %v8090_v58  ;;  %v8095_v12 = vand.u32 4294901760, %v8094_v22  ;;  %v8133_v25 = vld [vmem:[#allocation64_spill] sm:$0xff]  ;;  %v8163_v14 = vld [vmem:[#allocation115_spill] sm:$0xff]  ;;  %v8167_v27 = vld [vmem:[#allocation118_spill] sm:$0xff] }
 0x214   : > { %3509 = vmatprep.subr.bf16.mxu1 %v3508_v62  ;;  %v3518_v29 = vpack.c.bf16 %v8073_v56, %v8071_v60  ;;  %v8083_v62 = vld [vmem:[#allocation186_spill] sm:$0xff]  ;;  %v8096_v24 = vmov 1.0|1.0   ;;  %v8135_v35 = vld [vmem:[#allocation68_spill] sm:$0xff]  ;;  %v8153_v56 = vld [vmem:[#allocation97_spill] sm:$0xff] }
 0x215   : > { %3127 = vmatpush1.bf16.msra.mxu0 %v3126_v30  ;;  %v8084_v55 = vand.u32 4294901760, %v8083_v62  ;;  %v8089_v30 = vand.u32 4294901760, %v8088_v5  ;;  %v8141_v9 = vld [vmem:[#allocation76_spill] sm:$0xff]  ;;  %v8171_v19 = vld [vmem:[#allocation127_spill] sm:$0xff]  ;;  %v8177_v8 = vld [vmem:[#allocation133_spill] sm:$0xff] }
 0x216   : > { %3129 = vmatprep.subr.bf16.mxu0 %v3128_v37  ;;  %v8093_v37 = vand.u32 4294901760, %v8092_v17  ;;  %v8143_v53 = vld [vmem:[#allocation80_spill] sm:$0xff]  ;;  %v8187_v46 = vld [vmem:[#allocation151_spill] sm:$0xff]  ;;  %v8191_v4 = vld [vmem:[#allocation154_spill] sm:$0xff] }
 0x217   : > { %3511 = vmatpush1.bf16.msra.mxu1 %v3510_v41  ;;  %v3522_v40 = vpack.c.bf16 %v8084_v55, %v8082_v61  ;;  %v3142_v31 = vpack.c.bf16 %v8091_v11, %v8089_v30  ;;  %v8149_v60 = vld [vmem:[#allocation88_spill] sm:$0xff]  ;;  %v8183_v55 = vld [vmem:[#allocation142_spill] sm:$0xff] }
 0x218   : > { %3513 = vmatprep.subr.bf16.mxu1 %v3512_v6  ;;  %v3526_v3 = vpack.c.bf16 %v8095_v12, %v8093_v37  ;;  %v8101_v6 = vld [vmem:[#allocation198_spill] sm:$0xff]  ;;  %v8151_v10 = vld [vmem:[#allocation92_spill] sm:$0xff] }
 0x219   : > { %3131 = vmatpush1.bf16.msra.mxu0 %v3130_v13  ;;  %v8107_v13 = vld [vmem:[#allocation31_spill] sm:$0xff]  ;;  %v8157_v57 = vld [vmem:[#allocation100_spill] sm:$0xff] }
 0x21a   : > { %3133 = vmatprep.subr.bf16.mxu0 %v3132_v33  ;;  %v8113_v33 = vld [vmem:[#allocation37_spill] sm:$0xff]  ;;  %v8165_v2 = vld [vmem:[#allocation112_spill] sm:$0xff] }
 0x21b   : > { %3515 = vmatpush1.bf16.msra.mxu1 %v3514_v50  ;;  %v8123_v50 = vld [vmem:[#allocation55_spill] sm:$0xff]  ;;  %v8173_v45 = vld [vmem:[#allocation124_spill] sm:$0xff] }
 0x21c   : > { %3517 = vmatprep.subr.bf16.mxu1 %v3516_v44  ;;  %v8129_v44 = vld [vmem:[#allocation61_spill] sm:$0xff]  ;;  %v8179_v61 = vld [vmem:[#allocation140_spill] sm:$0xff] }
 0x21d   : > { %3135 = vmatpush1.bf16.msra.mxu0 %v3134_v18  ;;  %v8139_v18 = vld [vmem:[#allocation79_spill] sm:$0xff]  ;;  %v8181_v62 = vld [vmem:[#allocation136_spill] sm:$0xff] }
 0x21e   : > { %3137 = vmatprep.subr.bf16.mxu0 %v3136_v34  ;;  %v8145_v34 = vld [vmem:[#allocation85_spill] sm:$0xff]  ;;  %v8189_v47 = vld [vmem:[#allocation148_spill] sm:$0xff] }
 0x21f   : > { %3519 = vmatpush1.bf16.msra.mxu1 %v3518_v29  ;;  %v8155_v29 = vld [vmem:[#allocation103_spill] sm:$0xff]  ;;  %v8195_v5 = vld [vmem:[#allocation164_spill] sm:$0xff] }
 0x220   : > { %3521 = vmatprep.subr.bf16.mxu1 %v3520_v16  ;;  %v8161_v16 = vld [vmem:[#allocation109_spill] sm:$0xff]  ;;  %v8197_v30 = vld [vmem:[#allocation160_spill] sm:$0xff] }
 0x221   : > { %3139 = vmatpush1.bf16.msra.mxu0 %v3138_v59  ;;  %v8169_v59 = vld [vmem:[#allocation121_spill] sm:$0xff]  ;;  %v8202_v17 = vld [vmem:[#allocation172_spill] sm:$0xff] }
 0x222   : > { %3141 = vmatprep.subr.bf16.mxu0 %v3140_v63  ;;  %v8175_v63 = vld [vmem:[#allocation130_spill] sm:$0xff] }
 0x223   : > { %3523 = vmatpush1.bf16.msra.mxu1 %v3522_v40  ;;  %v8185_v40 = vld [vmem:[#allocation145_spill] sm:$0xff] }
 0x224   : > { %3525 = vmatprep.subr.bf16.mxu1 %v3524_v42  ;;  %v8193_v42 = vld [vmem:[#allocation157_spill] sm:$0xff] }
 0x225   : > { %3143 = vmatpush1.bf16.msra.mxu0 %v3142_v31 }
 0x226   : > { %3145 = vmatprep.subr.msk.bf16.mxu0 %vm4084_vm4, %v8096_v24  ;;  %vm8106_vm4 = vnez %v8105_v36 }
 0x227   : > { %3527 = vmatpush1.bf16.msra.mxu1 %v3526_v3 }
 0x228   : > { %3529 = vmatprep.subr.msk.bf16.mxu1 %vm4097_vm5, %v8096_v24  ;;  %1326 = vmatmul.mubr.f32.vlgmr.msra.gmra.mrb[0].mxu0 %v8099_v1  ;;  %vm8108_vm5 = vnez %v8107_v13 }
 0x229   : > { %3147 = vmatpush1.bf16.msk.msra.mxu0 %vm4116_vm10, %v8096_v24  ;;  %1397 = vmatprep.mubr.f32.mxu0 %v8101_v6  ;;  %vm8110_vm10 = vnez %v8109_v21 }
 0x22a   : > { %2226 = vmatmul.mubr.f32.vlgmr.msra.gmra.mrb[0].mxu1 %v8099_v1  ;;  %3149 = vmatprep.subr.msk.bf16.mxu0 %vm4152_vm0, %v8096_v24  ;;  %vm8114_vm0 = vnez %v8113_v33 }
 0x22b   : > { %3531 = vmatpush1.bf16.msk.msra.mxu1 %vm4129_vm11, %v8096_v24  ;;  %2297 = vmatprep.mubr.f32.mxu1 %v8101_v6  ;;  %vm8112_vm11 = vnez %v8111_v43 }
 0x22c   : > { %3533 = vmatprep.subr.msk.bf16.mxu1 %vm4163_vm1, %v8096_v24  ;;  %vm8116_vm1 = vnez %v8115_v23 }
 0x22d   : > { %3151 = vmatpush1.bf16.msk.msra.mxu0 %vm8106_vm4, %v8096_v24  ;;  %vm8118_vm4 = vnez %v8117_v0 }
 0x22e   : > { %3153 = vmatprep.subr.msk.bf16.mxu0 %vm8108_vm5, %v8096_v24  ;;  %vm8120_vm5 = vnez %v8119_v20 }
 0x22f   : > { %3535 = vmatpush1.bf16.msk.msra.mxu1 %vm8110_vm10, %v8096_v24  ;;  %vm8122_vm10 = vnez %v8121_v39 }
 0x230   : > { %3537 = vmatprep.subr.msk.bf16.mxu1 %vm8112_vm11, %v8096_v24  ;;  %vm8124_vm11 = vnez %v8123_v50 }
 0x231   : > { %3155 = vmatpush1.bf16.msk.msra.mxu0 %vm8114_vm0, %v8096_v24  ;;  %vm8126_vm0 = vnez %v8125_v52 }
 0x232   : > { %3157 = vmatprep.subr.msk.bf16.mxu0 %vm8116_vm1, %v8096_v24  ;;  %vm8128_vm1 = vnez %v8127_v51 }
 0x233   : > { %3539 = vmatpush1.bf16.msk.msra.mxu1 %vm8118_vm4, %v8096_v24  ;;  %vm8130_vm4 = vnez %v8129_v44 }
 0x234   : > { %3541 = vmatprep.subr.msk.bf16.mxu1 %vm8120_vm5, %v8096_v24  ;;  %vm8132_vm5 = vnez %v8131_v15 }
 0x235   : > { %3159 = vmatpush1.bf16.msk.msra.mxu0 %vm8122_vm10, %v8096_v24  ;;  %vm8134_vm10 = vnez %v8133_v25 }
 0x236   : > { %3161 = vmatprep.subr.msk.bf16.mxu0 %vm8124_vm11, %v8096_v24  ;;  %vm8136_vm11 = vnez %v8135_v35 }
 0x237   : > { %3543 = vmatpush1.bf16.msk.msra.mxu1 %vm8126_vm0, %v8096_v24  ;;  %vm8138_vm0 = vnez %v8137_v32 }
 0x238   : > { %3545 = vmatprep.subr.msk.bf16.mxu1 %vm8128_vm1, %v8096_v24  ;;  %vm8140_vm1 = vnez %v8139_v18 }
 0x239   : > { %3163 = vmatpush1.bf16.msk.msra.mxu0 %vm8130_vm4, %v8096_v24  ;;  %vm8142_vm4 = vnez %v8141_v9 }
 0x23a   : > { %3165 = vmatprep.subr.msk.bf16.mxu0 %vm8132_vm5, %v8096_v24  ;;  %vm8144_vm5 = vnez %v8143_v53 }
 0x23b   : > { %3547 = vmatpush1.bf16.msk.msra.mxu1 %vm8134_vm10, %v8096_v24  ;;  %vm8146_vm10 = vnez %v8145_v34 }
 0x23c   : > { %3549 = vmatprep.subr.msk.bf16.mxu1 %vm8136_vm11, %v8096_v24  ;;  %vm8148_vm11 = vnez %v8147_v48 }
 0x23d   : > { %3167 = vmatpush1.bf16.msk.msra.mxu0 %vm8138_vm0, %v8096_v24  ;;  %vm8150_vm0 = vnez %v8149_v60 }
 0x23e   : > { %3169 = vmatprep.subr.msk.bf16.mxu0 %vm8140_vm1, %v8096_v24  ;;  %vm8152_vm1 = vnez %v8151_v10 }
 0x23f   : > { %3551 = vmatpush1.bf16.msk.msra.mxu1 %vm8142_vm4, %v8096_v24  ;;  %vm8154_vm4 = vnez %v8153_v56 }
 0x240   : > { %3553 = vmatprep.subr.msk.bf16.mxu1 %vm8144_vm5, %v8096_v24  ;;  %vm8156_vm5 = vnez %v8155_v29 }
 0x241   : > { %3171 = vmatpush1.bf16.msk.msra.mxu0 %vm8146_vm10, %v8096_v24  ;;  %vm8158_vm10 = vnez %v8157_v57 }
 0x242   : > { %3173 = vmatprep.subr.msk.bf16.mxu0 %vm8148_vm11, %v8096_v24  ;;  %vm8160_vm11 = vnez %v8159_v28 }
 0x243   : > { %3555 = vmatpush1.bf16.msk.msra.mxu1 %vm8150_vm0, %v8096_v24  ;;  %vm8162_vm0 = vnez %v8161_v16 }
 0x244   : > { %3557 = vmatprep.subr.msk.bf16.mxu1 %vm8152_vm1, %v8096_v24  ;;  %vm8164_vm1 = vnez %v8163_v14 }
 0x245   : > { %3175 = vmatpush1.bf16.msk.msra.mxu0 %vm8154_vm4, %v8096_v24  ;;  %vm8166_vm4 = vnez %v8165_v2 }
 0x246   : > { %3177 = vmatprep.subr.msk.bf16.mxu0 %vm8156_vm5, %v8096_v24  ;;  %vm8168_vm5 = vnez %v8167_v27 }
 0x247   : > { %3559 = vmatpush1.bf16.msk.msra.mxu1 %vm8158_vm10, %v8096_v24  ;;  %vm8170_vm10 = vnez %v8169_v59 }
 0x248   : > { %3561 = vmatprep.subr.msk.bf16.mxu1 %vm8160_vm11, %v8096_v24  ;;  %vm8172_vm11 = vnez %v8171_v19 }
 0x249   : > { %3179 = vmatpush1.bf16.msk.msra.mxu0 %vm8162_vm0, %v8096_v24  ;;  %vm8174_vm0 = vnez %v8173_v45 }
 0x24a   : > { %3181 = vmatprep.subr.msk.bf16.mxu0 %vm8164_vm1, %v8096_v24  ;;  %vm8176_vm1 = vnez %v8175_v63 }
 0x24b   : > { %3563 = vmatpush1.bf16.msk.msra.mxu1 %vm8166_vm4, %v8096_v24  ;;  %vm8178_vm4 = vnez %v8177_v8 }
 0x24c   : > { %3565 = vmatprep.subr.msk.bf16.mxu1 %vm8168_vm5, %v8096_v24  ;;  %vm8180_vm5 = vnez %v8179_v61 }
 0x24d   : > { %3183 = vmatpush1.bf16.msk.msra.mxu0 %vm8170_vm10, %v8096_v24  ;;  %vm8182_vm10 = vnez %v8181_v62 }
 0x24e   : > { %3185 = vmatprep.subr.msk.bf16.mxu0 %vm8172_vm11, %v8096_v24  ;;  %vm8184_vm11 = vnez %v8183_v55 }
 0x24f   : > { %3567 = vmatpush1.bf16.msk.msra.mxu1 %vm8174_vm0, %v8096_v24  ;;  %vm8186_vm0 = vnez %v8185_v40 }
 0x250   : > { %3569 = vmatprep.subr.msk.bf16.mxu1 %vm8176_vm1, %v8096_v24  ;;  %vm8188_vm1 = vnez %v8187_v46 }
 0x251   : > { %3187 = vmatpush1.bf16.msk.msra.mxu0 %vm8178_vm4, %v8096_v24  ;;  %vm8190_vm4 = vnez %v8189_v47 }
 0x252   : > { %3189 = vmatprep.subr.msk.bf16.mxu0 %vm8180_vm5, %v8096_v24  ;;  %vm8192_vm5 = vnez %v8191_v4 }
 0x253   : > { %3571 = vmatpush1.bf16.msk.msra.mxu1 %vm8182_vm10, %v8096_v24  ;;  %vm8194_vm10 = vnez %v8193_v42 }
 0x254   : > { %3573 = vmatprep.subr.msk.bf16.mxu1 %vm8184_vm11, %v8096_v24  ;;  %vm8196_vm11 = vnez %v8195_v5 }
 0x255   : > { %3191 = vmatpush1.bf16.msk.msra.mxu0 %vm8186_vm0, %v8096_v24  ;;  %vm8198_vm0 = vnez %v8197_v30 }
 0x256   : > { %3193 = vmatprep.subr.msk.bf16.mxu0 %vm8188_vm1, %v8096_v24  ;;  %vm8203_vm1 = vnez %v8202_v17 }
 0x257   : > { %3575 = vmatpush1.bf16.msk.msra.mxu1 %vm8190_vm4, %v8096_v24 }
 0x258   : > { %3577 = vmatprep.subr.msk.bf16.mxu1 %vm8192_vm5, %v8096_v24 }
 0x259   : > { %3195 = vmatpush1.bf16.msk.msra.mxu0 %vm8194_vm10, %v8096_v24 }
 0x25a   : > { %3197 = vmatprep.subr.msk.bf16.mxu0 %vm8196_vm11, %v8096_v24 }
 0x25b   : > { %3579 = vmatpush1.bf16.msk.msra.mxu1 %vm8198_vm0, %v8096_v24 }
 0x25c   : > { %3581 = vmatprep.subr.msk.bf16.mxu1 %vm7871_vm7, %v8096_v24 }
 0x25d   : > { %3199 = vmatpush1.bf16.msk.msra.mxu0 %vm7873_vm8, %v8096_v24 }
 0x25e   : > { %3201 = vmatprep.subr.msk.bf16.mxu0 %vm7875_vm2, %v8096_v24 }
 0x25f   : > { %3583 = vmatpush1.bf16.msk.msra.mxu1 %vm8203_vm1, %v8096_v24 }
 0x260   : > { %3585 = vmatprep.subr.msk.bf16.mxu1 %vm7879_vm12, %v8096_v24 }
 0x261   : > { %3203 = vmatpush1.bf16.msk.msra.mxu0 %vm7881_vm13, %v8096_v24 }
 0x262   : > { %3205 = vmatprep.subr.msk.bf16.mxu0 %vm5178_vm15, %v8096_v24 }
 0x263   : > { %3587 = vmatpush1.bf16.msk.msra.mxu1 %vm7886_vm9, %v8096_v24 }
 0x264   : > { %3589 = vmatprep.subr.msk.bf16.mxu1 %vm5192_vm14, %v8096_v24 }
 0x265   : > { %3207 = vmatpush1.bf16.msk.msra.mxu0 %vm5206_vm3, %v8096_v24 }
 0x267   : > { %3591 = vmatpush1.bf16.msk.msra.mxu1 %vm5222_vm6, %v8096_v24 }
 0x268   : > { %1399 = vmatmul.mubr.f32.vlgmr.msra.gmra.mrb[0].mxu0 %v8099_v1 }
 0x26a   : > { %2299 = vmatmul.mubr.f32.vlgmr.msra.gmra.mrb[0].mxu1 %v8099_v1 }
 0x33b   : > { %v1400_v6 = vpop.f32.mrb[0].mxu0 }
 0x33c   : > { %2305 = vst [vmem:[%s194_s19] sm:$0xff] %v1400_v6  ;;  %v1402_v54 = vpop.f32.mrb[1].mxu0 }
 0x33d   : > { %v2300_v38 = vpop.f32.mrb[0].mxu1  ;;  %2306 = vst [vmem:[%s194_s19 + $0x8] sm:$0xff] %v1402_v54 }
 0x33e   : > { %2307 = vst [vmem:[%s194_s19 + $0x10] sm:$0xff] %v2300_v38  ;;  %v2302_v24 = vpop.f32.mrb[1].mxu1 }
 0x33f   : > { %2308 = vst [vmem:[%s194_s19 + $0x18] sm:$0xff] %v2302_v24 }
 0x340   : > { %3758 = shalt.err (!%p3755_p5)
}
 0x341   : > { %s3759_s27 = scalar_lea.hbm %s6547_s8, 512  ;;  %s3763_s18 = scalar_lea.hbm %s6596_s2, 1024 }
 0x342   : > { %p3760_p10 = scmp.ne.s32.totalorder %s6547_s8, %s3759_s27  ;;  %p3764_p7 = scmp.lt.u32.totalorder %s6547_s8, %s6596_s2 }
 0x343   : > { %p3765_p3 = scmp.lt.u32.totalorder %s3763_s18, %s3759_s27  ;;  %p3767_p11 = scmp.lt.u32.totalorder %s3759_s27, %s6547_s8 }
 0x344   : > { %p3761_p1 = pnand %p3760_p10, %p3954_p13 }
 0x345   : > { %p3766_p4 = por %p3765_p3, %p3764_p7 }
 0x346   : > { %p3762_p2 = pneg %p3761_p1 }
 0x347   : > { %p3768_p6 = por %p3767_p11, %p3766_p4 }
 0x349   : > { %p3769_p8 = pnand %p3768_p6, %p3762_p2 }
 0x34b   : > { %3772 = shalt.err (!%p3769_p8)
}
 0x34c   : > { %3618 = dma.vmem_to_hbm [thread:$0]  (%p3954_p13), %s6542_s21, 512, %s6547_s8, %s2310_s15  }
 0x34d PF: > { %s2338_s7 = sand.u32 1, %s3811_s9   ;;  %p8211_p9 = scmp.ne.s32.totalorder %s7179_s20, 0 }
 0x34e   : > { %p8212_p12 = scmp.ge.s32.totalorder %s3831_s14, 2  ;;  %s2339_s17 = scalar_lea.sflag [#allocation4], %s2338_s7 }
 0x350   : > { %p3629_p0 = pnand %p8212_p12, %p8211_p9 }
 0x352   : > { %3806 = dma.done.wait (!%p3629_p0), %s2339_s17, 512  }
 0x353   : > { %3808 = vsyncadd (!%p3629_p0), %s2339_s17, 4294966784  ;;  %s19_s14 = sadd.s32 1, %s3831_s14   ;;  %s8213_s9 = smov %s3815_s10 }
 0x354   : > { %p16_p5 = scmp.ge.s32.totalorder %s19_s14, 4   ;;  %s8214_s10 = smov %s3819_s11 }
 0x355   : > { %s8215_s11 = smov %s3962_s28  ;;  %s8216_s12 = smov %s3827_s13 }
 0x356   : > { %s8217_s13 = smov %s8219_s25  ;;  %18 = sbr.rel (!%p16_p5) target bundleno = 7 (0x7), region = 79 }
 0x35d   :  { %2344 = vsyncpa [#allocation3], 1 }
 0x35e   :  { %2346 = vsyncpa [#allocation3 + $0x1], 1 }
 0x35f   :  { %2347 = vsyncpa [#allocation6], 1 }
 0x360   :  { %2349 = vsyncpa [#allocation6 + $0x1], 1 }
 0x361   :  { %2350 = vsyncpa [#allocation4], 1 }
 0x362   :  { %2352 = vsyncpa [#allocation4 + $0x1], 1 }

</bundles_post_ra>
